<compile_context>
chip_gen: v5e
topology: v5e:2x2
jax: 0.10.0
libtpu: 0.0.40
codegen_flags: <defaults>
</compile_context>

<pallas_src>
import functools

import jax
import jax.numpy as jnp
from jax.experimental import pallas as pl
from jax.experimental.pallas import tpu as pltpu


def _pick_row_tile(H, P, target=32):
    """Largest divisor of H that is <= target and can source a 2P-row halo."""
    best = H
    for t in range(1, H + 1):
        if H % t != 0:
            continue
        if t < 2 * P and H // t > 1:   # halo rows are taken from neighbour tiles
            continue
        if t <= target:
            best = t
    return best


def _resblock_kernel(xb_ref, xt_ref, xn_ref, w1_ref, b1_ref, w2_ref, b2_ref,
                     o_ref, pad_ref, *, TH, W, C, K, res_scale, cdt):
    """One (batch, row-tile) grid step.

    xb_ref : (1, TH, W, C)      input rows of this tile (also the residual)
    xt_ref : (1, TH, W, C)      previous row tile (top-halo source; clamped index)
    xn_ref : (1, TH, W, C)      next row tile     (bottom-halo source; clamped index)
    w*_ref : (K*K, C, C)        per-tap conv weights (tap-major, HWIO), compute dtype
    b*_ref : (1, C)             conv bias, float32
    o_ref  : (1, TH, W, C)      output rows of this tile
    pad_ref: (TH+4P, W+2P, C)   scratch (compute dtype): zero-padded input window
                                for conv1, then rows [0, TH+2P) are reused for the
                                zero-padded conv1 activation consumed by conv2.
    """
    P = K // 2
    Wp = W + 2 * P
    Hp = TH + 4 * P
    Hc = TH + 2 * P                       # activation rows needed (incl. conv2 halo)
    r = pl.program_id(1)
    last = pl.num_programs(1) - 1
    f32 = jnp.float32

    # Zero the W-halo column strips once per step; everything else in pad_ref is
    # fully overwritten below.  Done every step (not under pl.when) so it stays
    # correct when the parallel grid axes are split across TensorCores.
    # TODO(synk): fold these small masked column-strip stores into full-width
    # slab writes once unaligned sublane concatenation lowers everywhere.
    if P > 0:
        zcol = jnp.zeros((Hp, P, C), cdt)
        pad_ref[:, 0:P, :] = zcol
        pad_ref[:, P + W:Wp, :] = zcol

    # ---- zero-padded input window for conv1: image rows [r*TH-2P, r*TH+TH+2P)
    pad_ref[2 * P:2 * P + TH, P:P + W, :] = xb_ref[0].astype(cdt)
    if P > 0:
        @pl.when(r > 0)
        def _():
            pad_ref[0:2 * P, P:P + W, :] = xt_ref[0, TH - 2 * P:TH].astype(cdt)

        @pl.when(r == 0)
        def _():
            pad_ref[0:2 * P, P:P + W, :] = jnp.zeros((2 * P, W, C), cdt)

        @pl.when(r < last)
        def _():
            pad_ref[2 * P + TH:Hp, P:P + W, :] = xn_ref[0, 0:2 * P].astype(cdt)

        @pl.when(r == last)
        def _():
            pad_ref[2 * P + TH:Hp, P:P + W, :] = jnp.zeros((2 * P, W, C), cdt)

    def conv(rows_out, w_ref):
        """K*K per-tap MXU matmul-accumulates over shifted views of pad_ref."""
        acc = jnp.zeros((rows_out * W, C), f32)
        for dy in range(K):
            for dx in range(K):
                lhs = pad_ref[dy:dy + rows_out, dx:dx + W, :].reshape(rows_out * W, C)
                acc = acc + jnp.dot(lhs, w_ref[dy * K + dx],
                                    preferred_element_type=f32)
        return acc

    # ---- conv1 + bias + ReLU over TH+2P rows (the extra P rows are conv2's halo)
    act = jnp.maximum(conv(Hc, w1_ref) + b1_ref[...].astype(f32), 0.0)

    # ---- reuse pad_ref rows [0, Hc) as the zero-padded conv1 activation
    pad_ref[0:Hc, P:P + W, :] = act.astype(cdt).reshape(Hc, W, C)
    if P > 0:
        # Activation rows that lie outside the image are zero under SAME padding.
        @pl.when(r == 0)
        def _():
            pad_ref[0:P, P:P + W, :] = jnp.zeros((P, W, C), cdt)

        @pl.when(r == last)
        def _():
            pad_ref[TH + P:Hc, P:P + W, :] = jnp.zeros((P, W, C), cdt)

    # ---- conv2 + bias, then res_scale * body(x) + x
    body = conv(TH, w2_ref) + b2_ref[...].astype(f32)
    if res_scale != 1.0:
        body = body * f32(res_scale)
    res = body + xb_ref[0].reshape(TH * W, C).astype(f32)
    o_ref[0] = res.reshape(TH, W, C).astype(o_ref.dtype)


def resblock_pallas(x, w1, b1, w2, b2, *, res_scale=1.0,
                    compute_dtype=jnp.bfloat16, row_tile=None):
    """x: (N, H, W, C) NHWC.  w: (K, K, C, C) HWIO.  b: (C,).

    compute_dtype: dtype fed to the MXU (weights + padded activations, and the
    conv1->conv2 intermediate).  Accumulation is always float32; bias / ReLU /
    res_scale / residual math is float32.  Default bf16 uses the bf16-native
    MXU on v6e/v7x; pass jnp.float32 for reference-exact numerics.
    """
    N, H, W, C = x.shape
    K = w1.shape[0]
    assert w1.shape == (K, K, C, C) and w2.shape == (K, K, C, C)
    assert b1.shape == (C,) and b2.shape == (C,)
    assert K % 2 == 1, "SAME zero padding here assumes an odd kernel size"
    P = K // 2

    TH = _pick_row_tile(H, P) if row_tile is None else row_tile
    assert H % TH == 0, "row tile must divide H"
    nrt = H // TH
    assert nrt == 1 or TH >= 2 * P, "row tile must cover the 2P-row halo"

    cdt = jnp.dtype(compute_dtype)
    # Per-tap weight layout (K*K, C, C); tiny, cast once in the wrapper.
    w1t = w1.reshape(K * K, C, C).astype(cdt)
    w2t = w2.reshape(K * K, C, C).astype(cdt)
    b1r = b1.reshape(1, C).astype(jnp.float32)
    b2r = b2.reshape(1, C).astype(jnp.float32)

    kern = functools.partial(_resblock_kernel, TH=TH, W=W, C=C, K=K,
                             res_scale=float(res_scale), cdt=cdt)

    tile_spec = pl.BlockSpec((1, TH, W, C), lambda n, r: (n, r, 0, 0))
    # Top/bottom halo rows come from the neighbouring row tiles (indices clamped
    # at the image edges; the kernel replaces the clamped copies with zeros).
    top_spec = pl.BlockSpec((1, TH, W, C),
                            lambda n, r: (n, jnp.maximum(r - 1, 0), 0, 0))
    bot_spec = pl.BlockSpec((1, TH, W, C),
                            lambda n, r: (n, jnp.minimum(r + 1, nrt - 1), 0, 0))
    # Weights/bias: constant index_map -> fetched once and kept resident.
    # TODO(synk): single-buffer these (pipeline_mode=pl.Buffered(1)) once that
    # path is universally available; the double buffer only costs ~2*K*K*C*C bytes.
    w_spec = pl.BlockSpec((K * K, C, C), lambda n, r: (0, 0, 0))
    b_spec = pl.BlockSpec((1, C), lambda n, r: (0, 0))

    # TODO(synk): for very large W also tile the width axis (same neighbour-halo
    # trick); at EDSR-like sizes row tiling alone keeps the working set well
    # under v7x's 64 MiB per-TC VMEM.
    return pl.pallas_call(
        kern,
        out_shape=jax.ShapeDtypeStruct((N, H, W, C), x.dtype),
        grid_spec=pltpu.PrefetchScalarGridSpec(
            num_scalar_prefetch=0,
            grid=(N, nrt),
            in_specs=[tile_spec, top_spec, bot_spec,
                      w_spec, b_spec, w_spec, b_spec],
            out_specs=tile_spec,
            scratch_shapes=[
                pltpu.VMEM((TH + 4 * P, W + 2 * P, C), cdt),
            ],
        ),
        compiler_params=pltpu.CompilerParams(
            dimension_semantics=("parallel", "parallel"),
            vmem_limit_bytes=48 * 1024 * 1024),
    )(x, x, x, w1t, b1r, w2t, b2r)


def resblock_reference(x, w1, b1, w2, b2, *, res_scale=1.0):
    """Pure-JAX reference (same NHWC / HWIO convention), float32 throughout."""
    dn = ("NHWC", "HWIO", "NHWC")
    y = jax.lax.conv_general_dilated(x, w1, (1, 1), "SAME",
                                     dimension_numbers=dn) + b1.reshape(1, 1, 1, -1)
    y = jnp.maximum(y, 0.0)
    y = jax.lax.conv_general_dilated(y, w2, (1, 1), "SAME",
                                     dimension_numbers=dn) + b2.reshape(1, 1, 1, -1)
    return y * res_scale + x


if __name__ == "__main__":
    # Small shapes consistent with the module: n_feats channels, 3x3 kernel.
    N, H, W, C, K = 2, 16, 16, 8, 3
    res_scale = 0.1

    key = jax.random.PRNGKey(0)
    kx, kw1, kb1, kw2, kb2 = jax.random.split(key, 5)

    x = jax.random.normal(kx, (N, H, W, C), dtype=jnp.float32)
    fan_in = C * K * K
    w1 = jax.random.normal(kw1, (K, K, C, C), dtype=jnp.float32) / jnp.sqrt(fan_in)
    b1 = jax.random.normal(kb1, (C,), dtype=jnp.float32) * 0.01
    w2 = jax.random.normal(kw2, (K, K, C, C), dtype=jnp.float32) / jnp.sqrt(fan_in)
    b2 = jax.random.normal(kb2, (C,), dtype=jnp.float32) * 0.01

    ref = jax.block_until_ready(
        resblock_reference(x, w1, b1, w2, b2, res_scale=res_scale))

    # Exact-path check: f32 operands, 2 row tiles per image (exercises the halo
    # handling at both image-edge and interior tile boundaries).
    out_f32 = jax.block_until_ready(
        resblock_pallas(x, w1, b1, w2, b2, res_scale=res_scale,
                        compute_dtype=jnp.float32, row_tile=8))
    assert out_f32.shape == (N, H, W, C)
    assert jnp.allclose(out_f32, ref, atol=1e-4, rtol=1e-4), (
        f"f32 max abs err = {jnp.max(jnp.abs(out_f32 - ref))}")

    # Default path: bf16 MXU operands / f32 accumulation -> looser tolerance
    # against the f32 reference (documented mixed-precision behaviour).
    out_bf16 = jax.block_until_ready(
        resblock_pallas(x, w1, b1, w2, b2, res_scale=res_scale))
    assert out_bf16.shape == (N, H, W, C)
    assert jnp.allclose(out_bf16, ref, atol=5e-2, rtol=5e-2), (
        f"bf16 max abs err = {jnp.max(jnp.abs(out_bf16 - ref))}")

    print("KERNEL_OK")
</pallas_src>

<mosaic_0001>
module attributes {stable_mosaic.version = 11 : i64} {
  func.func @_resblock_kernel(%arg0: i32, %arg1: i32, %arg2: memref<1x8x16x8xf32, #tpu.memory_space<vmem>>, %arg3: memref<1x8x16x8xf32, #tpu.memory_space<vmem>>, %arg4: memref<1x8x16x8xf32, #tpu.memory_space<vmem>>, %arg5: memref<9x8x8xf32, #tpu.memory_space<vmem>>, %arg6: memref<1x8xf32, #tpu.memory_space<vmem>>, %arg7: memref<9x8x8xf32, #tpu.memory_space<vmem>>, %arg8: memref<1x8xf32, #tpu.memory_space<vmem>>, %arg9: memref<1x8x16x8xf32, #tpu.memory_space<vmem>>, %arg10: memref<12x18x8xf32, #tpu.memory_space<vmem>>) attributes {dimension_semantics = [#tpu.dimension_semantics<parallel>, #tpu.dimension_semantics<parallel>], iteration_bounds = array<i64: 2, 2>, scalar_prefetch = 0 : i64, scratch_operands = 1 : i64, tpu.core_type = #tpu.core_type<tc>, window_params = [{transform_indices = @transform_0, window_bounds = array<i64: 1, 8, 16, 8>}, {transform_indices = @transform_1, window_bounds = array<i64: 1, 8, 16, 8>}, {transform_indices = @transform_2, window_bounds = array<i64: 1, 8, 16, 8>}, {pipeline_mode = #tpu.pipeline_mode<synchronous>, transform_indices = @transform_3, window_bounds = array<i64: 9, 8, 8>}, {pipeline_mode = #tpu.pipeline_mode<synchronous>, transform_indices = @transform_4, window_bounds = array<i64: 1, 8>}, {pipeline_mode = #tpu.pipeline_mode<synchronous>, transform_indices = @transform_5, window_bounds = array<i64: 9, 8, 8>}, {pipeline_mode = #tpu.pipeline_mode<synchronous>, transform_indices = @transform_6, window_bounds = array<i64: 1, 8>}, {transform_indices = @transform_7, window_bounds = array<i64: 1, 8, 16, 8>}]} {
    %cst = arith.constant 0.000000e+00 : f32
    %0 = vector.broadcast %cst : f32 to vector<12x1x8xf32>
    %c0 = arith.constant 0 : index
    %c0_0 = arith.constant 0 : index
    %c0_1 = arith.constant 0 : index
    %1 = vector.load %arg10[%c0, %c0_0, %c0_1] : memref<12x18x8xf32, #tpu.memory_space<vmem>>, vector<12x1x8xf32>
    tpu.vector_store %arg10[%c0, %c0_0, %c0_1], %0 {strides = array<i32>} : memref<12x18x8xf32, #tpu.memory_space<vmem>>, vector<12x1x8xf32>,
    %c0_2 = arith.constant 0 : index
    %c17 = arith.constant 17 : index
    %c0_3 = arith.constant 0 : index
    %2 = vector.load %arg10[%c0_2, %c17, %c0_3] : memref<12x18x8xf32, #tpu.memory_space<vmem>>, vector<12x1x8xf32>
    tpu.vector_store %arg10[%c0_2, %c17, %c0_3], %0 {strides = array<i32>} : memref<12x18x8xf32, #tpu.memory_space<vmem>>, vector<12x1x8xf32>,
    %c0_4 = arith.constant 0 : index
    %c0_5 = arith.constant 0 : index
    %c0_6 = arith.constant 0 : index
    %c0_7 = arith.constant 0 : index
    %3 = vector.load %arg2[%c0_4, %c0_5, %c0_6, %c0_7] : memref<1x8x16x8xf32, #tpu.memory_space<vmem>>, vector<1x8x16x8xf32>
    %4 = vector.shape_cast %3 : vector<1x8x16x8xf32> to vector<8x16x8xf32>
    %c2 = arith.constant 2 : index
    %c1 = arith.constant 1 : index
    %c0_8 = arith.constant 0 : index
    %5 = vector.load %arg10[%c2, %c1, %c0_8] : memref<12x18x8xf32, #tpu.memory_space<vmem>>, vector<8x16x8xf32>
    tpu.vector_store %arg10[%c2, %c1, %c0_8], %4 {strides = array<i32>} : memref<12x18x8xf32, #tpu.memory_space<vmem>>, vector<8x16x8xf32>,
    %c0_i32 = arith.constant 0 : i32
    %6 = arith.cmpi sgt, %arg1, %c0_i32 : i32
    %7 = arith.extui %6 : i1 to i32
    %c0_i32_9 = arith.constant 0 : i32
    %8 = arith.cmpi ne, %7, %c0_i32_9 : i32
    scf.if %8 {
      %c0_158 = arith.constant 0 : index
      %c6_159 = arith.constant 6 : index
      %c0_160 = arith.constant 0 : index
      %c0_161 = arith.constant 0 : index
      %154 = vector.load %arg3[%c0_158, %c6_159, %c0_160, %c0_161] : memref<1x8x16x8xf32, #tpu.memory_space<vmem>>, vector<1x2x16x8xf32>
      %155 = vector.shape_cast %154 : vector<1x2x16x8xf32> to vector<2x16x8xf32>
      %c0_162 = arith.constant 0 : index
      %c1_163 = arith.constant 1 : index
      %c0_164 = arith.constant 0 : index
      %156 = vector.load %arg10[%c0_162, %c1_163, %c0_164] : memref<12x18x8xf32, #tpu.memory_space<vmem>>, vector<2x16x8xf32>
      tpu.vector_store %arg10[%c0_162, %c1_163, %c0_164], %155 {strides = array<i32>} : memref<12x18x8xf32, #tpu.memory_space<vmem>>, vector<2x16x8xf32>,
    } else {
    }
    %c0_i32_10 = arith.constant 0 : i32
    %9 = arith.cmpi eq, %arg1, %c0_i32_10 : i32
    %10 = arith.extui %9 : i1 to i32
    %c0_i32_11 = arith.constant 0 : i32
    %11 = arith.cmpi ne, %10, %c0_i32_11 : i32
    scf.if %11 {
      %cst_158 = arith.constant 0.000000e+00 : f32
      %154 = vector.broadcast %cst_158 : f32 to vector<2x16x8xf32>
      %c0_159 = arith.constant 0 : index
      %c1_160 = arith.constant 1 : index
      %c0_161 = arith.constant 0 : index
      %155 = vector.load %arg10[%c0_159, %c1_160, %c0_161] : memref<12x18x8xf32, #tpu.memory_space<vmem>>, vector<2x16x8xf32>
      tpu.vector_store %arg10[%c0_159, %c1_160, %c0_161], %154 {strides = array<i32>} : memref<12x18x8xf32, #tpu.memory_space<vmem>>, vector<2x16x8xf32>,
    } else {
    }
    %c1_i32 = arith.constant 1 : i32
    %12 = arith.cmpi slt, %arg1, %c1_i32 : i32
    %13 = arith.extui %12 : i1 to i32
    %c0_i32_12 = arith.constant 0 : i32
    %14 = arith.cmpi ne, %13, %c0_i32_12 : i32
    scf.if %14 {
      %c0_158 = arith.constant 0 : index
      %c0_159 = arith.constant 0 : index
      %c0_160 = arith.constant 0 : index
      %c0_161 = arith.constant 0 : index
      %154 = vector.load %arg4[%c0_158, %c0_159, %c0_160, %c0_161] : memref<1x8x16x8xf32, #tpu.memory_space<vmem>>, vector<1x2x16x8xf32>
      %155 = vector.shape_cast %154 : vector<1x2x16x8xf32> to vector<2x16x8xf32>
      %c10 = arith.constant 10 : index
      %c1_162 = arith.constant 1 : index
      %c0_163 = arith.constant 0 : index
      %156 = vector.load %arg10[%c10, %c1_162, %c0_163] : memref<12x18x8xf32, #tpu.memory_space<vmem>>, vector<2x16x8xf32>
      tpu.vector_store %arg10[%c10, %c1_162, %c0_163], %155 {strides = array<i32>} : memref<12x18x8xf32, #tpu.memory_space<vmem>>, vector<2x16x8xf32>,
    } else {
    }
    %c1_i32_13 = arith.constant 1 : i32
    %15 = arith.cmpi eq, %arg1, %c1_i32_13 : i32
    %16 = arith.extui %15 : i1 to i32
    %c0_i32_14 = arith.constant 0 : i32
    %17 = arith.cmpi ne, %16, %c0_i32_14 : i32
    scf.if %17 {
      %cst_158 = arith.constant 0.000000e+00 : f32
      %154 = vector.broadcast %cst_158 : f32 to vector<2x16x8xf32>
      %c10 = arith.constant 10 : index
      %c1_159 = arith.constant 1 : index
      %c0_160 = arith.constant 0 : index
      %155 = vector.load %arg10[%c10, %c1_159, %c0_160] : memref<12x18x8xf32, #tpu.memory_space<vmem>>, vector<2x16x8xf32>
      tpu.vector_store %arg10[%c10, %c1_159, %c0_160], %154 {strides = array<i32>} : memref<12x18x8xf32, #tpu.memory_space<vmem>>, vector<2x16x8xf32>,
    } else {
    }
    %cst_15 = arith.constant 0.000000e+00 : f32
    %18 = vector.broadcast %cst_15 : f32 to vector<160x8xf32>
    %c0_16 = arith.constant 0 : index
    %c0_17 = arith.constant 0 : index
    %c0_18 = arith.constant 0 : index
    %19 = vector.load %arg10[%c0_16, %c0_17, %c0_18] : memref<12x18x8xf32, #tpu.memory_space<vmem>>, vector<10x16x8xf32>
    %20 = vector.shape_cast %19 : vector<10x16x8xf32> to vector<160x8xf32>
    %c0_19 = arith.constant 0 : index
    %c0_20 = arith.constant 0 : index
    %c0_21 = arith.constant 0 : index
    %21 = vector.load %arg5[%c0_19, %c0_20, %c0_21] : memref<9x8x8xf32, #tpu.memory_space<vmem>>, vector<1x8x8xf32>
    %22 = vector.shape_cast %21 : vector<1x8x8xf32> to vector<8x8xf32>
    %cst_22 = arith.constant dense<0.000000e+00> : vector<160x8xf32>
    %23 = tpu.matmul %20, %22, %cst_22 {dimension_numbers = #tpu.dot_dimension_numbers<[1], [0], [0], [1], [0, 0, 1, 1], [], []>} : vector<160x8xf32>, vector<8x8xf32>, vector<160x8xf32> -> vector<160x8xf32>
    %24 = arith.addf %18, %23 : vector<160x8xf32>
    %c0_23 = arith.constant 0 : index
    %c1_24 = arith.constant 1 : index
    %c0_25 = arith.constant 0 : index
    %25 = vector.load %arg10[%c0_23, %c1_24, %c0_25] : memref<12x18x8xf32, #tpu.memory_space<vmem>>, vector<10x16x8xf32>
    %26 = vector.shape_cast %25 : vector<10x16x8xf32> to vector<160x8xf32>
    %c1_26 = arith.constant 1 : index
    %c0_27 = arith.constant 0 : index
    %c0_28 = arith.constant 0 : index
    %27 = vector.load %arg5[%c1_26, %c0_27, %c0_28] : memref<9x8x8xf32, #tpu.memory_space<vmem>>, vector<1x8x8xf32>
    %28 = vector.shape_cast %27 : vector<1x8x8xf32> to vector<8x8xf32>
    %cst_29 = arith.constant dense<0.000000e+00> : vector<160x8xf32>
    %29 = tpu.matmul %26, %28, %cst_29 {dimension_numbers = #tpu.dot_dimension_numbers<[1], [0], [0], [1], [0, 0, 1, 1], [], []>} : vector<160x8xf32>, vector<8x8xf32>, vector<160x8xf32> -> vector<160x8xf32>
    %30 = arith.addf %24, %29 : vector<160x8xf32>
    %c0_30 = arith.constant 0 : index
    %c2_31 = arith.constant 2 : index
    %c0_32 = arith.constant 0 : index
    %31 = vector.load %arg10[%c0_30, %c2_31, %c0_32] : memref<12x18x8xf32, #tpu.memory_space<vmem>>, vector<10x16x8xf32>
    %32 = vector.shape_cast %31 : vector<10x16x8xf32> to vector<160x8xf32>
    %c2_33 = arith.constant 2 : index
    %c0_34 = arith.constant 0 : index
    %c0_35 = arith.constant 0 : index
    %33 = vector.load %arg5[%c2_33, %c0_34, %c0_35] : memref<9x8x8xf32, #tpu.memory_space<vmem>>, vector<1x8x8xf32>
    %34 = vector.shape_cast %33 : vector<1x8x8xf32> to vector<8x8xf32>
    %cst_36 = arith.constant dense<0.000000e+00> : vector<160x8xf32>
    %35 = tpu.matmul %32, %34, %cst_36 {dimension_numbers = #tpu.dot_dimension_numbers<[1], [0], [0], [1], [0, 0, 1, 1], [], []>} : vector<160x8xf32>, vector<8x8xf32>, vector<160x8xf32> -> vector<160x8xf32>
    %36 = arith.addf %30, %35 : vector<160x8xf32>
    %c1_37 = arith.constant 1 : index
    %c0_38 = arith.constant 0 : index
    %c0_39 = arith.constant 0 : index
    %37 = vector.load %arg10[%c1_37, %c0_38, %c0_39] : memref<12x18x8xf32, #tpu.memory_space<vmem>>, vector<10x16x8xf32>
    %38 = vector.shape_cast %37 : vector<10x16x8xf32> to vector<160x8xf32>
    %c3 = arith.constant 3 : index
    %c0_40 = arith.constant 0 : index
    %c0_41 = arith.constant 0 : index
    %39 = vector.load %arg5[%c3, %c0_40, %c0_41] : memref<9x8x8xf32, #tpu.memory_space<vmem>>, vector<1x8x8xf32>
    %40 = vector.shape_cast %39 : vector<1x8x8xf32> to vector<8x8xf32>
    %cst_42 = arith.constant dense<0.000000e+00> : vector<160x8xf32>
    %41 = tpu.matmul %38, %40, %cst_42 {dimension_numbers = #tpu.dot_dimension_numbers<[1], [0], [0], [1], [0, 0, 1, 1], [], []>} : vector<160x8xf32>, vector<8x8xf32>, vector<160x8xf32> -> vector<160x8xf32>
    %42 = arith.addf %36, %41 : vector<160x8xf32>
    %c1_43 = arith.constant 1 : index
    %c1_44 = arith.constant 1 : index
    %c0_45 = arith.constant 0 : index
    %43 = vector.load %arg10[%c1_43, %c1_44, %c0_45] : memref<12x18x8xf32, #tpu.memory_space<vmem>>, vector<10x16x8xf32>
    %44 = vector.shape_cast %43 : vector<10x16x8xf32> to vector<160x8xf32>
    %c4 = arith.constant 4 : index
    %c0_46 = arith.constant 0 : index
    %c0_47 = arith.constant 0 : index
    %45 = vector.load %arg5[%c4, %c0_46, %c0_47] : memref<9x8x8xf32, #tpu.memory_space<vmem>>, vector<1x8x8xf32>
    %46 = vector.shape_cast %45 : vector<1x8x8xf32> to vector<8x8xf32>
    %cst_48 = arith.constant dense<0.000000e+00> : vector<160x8xf32>
    %47 = tpu.matmul %44, %46, %cst_48 {dimension_numbers = #tpu.dot_dimension_numbers<[1], [0], [0], [1], [0, 0, 1, 1], [], []>} : vector<160x8xf32>, vector<8x8xf32>, vector<160x8xf32> -> vector<160x8xf32>
    %48 = arith.addf %42, %47 : vector<160x8xf32>
    %c1_49 = arith.constant 1 : index
    %c2_50 = arith.constant 2 : index
    %c0_51 = arith.constant 0 : index
    %49 = vector.load %arg10[%c1_49, %c2_50, %c0_51] : memref<12x18x8xf32, #tpu.memory_space<vmem>>, vector<10x16x8xf32>
    %50 = vector.shape_cast %49 : vector<10x16x8xf32> to vector<160x8xf32>
    %c5 = arith.constant 5 : index
    %c0_52 = arith.constant 0 : index
    %c0_53 = arith.constant 0 : index
    %51 = vector.load %arg5[%c5, %c0_52, %c0_53] : memref<9x8x8xf32, #tpu.memory_space<vmem>>, vector<1x8x8xf32>
    %52 = vector.shape_cast %51 : vector<1x8x8xf32> to vector<8x8xf32>
    %cst_54 = arith.constant dense<0.000000e+00> : vector<160x8xf32>
    %53 = tpu.matmul %50, %52, %cst_54 {dimension_numbers = #tpu.dot_dimension_numbers<[1], [0], [0], [1], [0, 0, 1, 1], [], []>} : vector<160x8xf32>, vector<8x8xf32>, vector<160x8xf32> -> vector<160x8xf32>
    %54 = arith.addf %48, %53 : vector<160x8xf32>
    %c2_55 = arith.constant 2 : index
    %c0_56 = arith.constant 0 : index
    %c0_57 = arith.constant 0 : index
    %55 = vector.load %arg10[%c2_55, %c0_56, %c0_57] : memref<12x18x8xf32, #tpu.memory_space<vmem>>, vector<10x16x8xf32>
    %56 = vector.shape_cast %55 : vector<10x16x8xf32> to vector<160x8xf32>
    %c6 = arith.constant 6 : index
    %c0_58 = arith.constant 0 : index
    %c0_59 = arith.constant 0 : index
    %57 = vector.load %arg5[%c6, %c0_58, %c0_59] : memref<9x8x8xf32, #tpu.memory_space<vmem>>, vector<1x8x8xf32>
    %58 = vector.shape_cast %57 : vector<1x8x8xf32> to vector<8x8xf32>
    %cst_60 = arith.constant dense<0.000000e+00> : vector<160x8xf32>
    %59 = tpu.matmul %56, %58, %cst_60 {dimension_numbers = #tpu.dot_dimension_numbers<[1], [0], [0], [1], [0, 0, 1, 1], [], []>} : vector<160x8xf32>, vector<8x8xf32>, vector<160x8xf32> -> vector<160x8xf32>
    %60 = arith.addf %54, %59 : vector<160x8xf32>
    %c2_61 = arith.constant 2 : index
    %c1_62 = arith.constant 1 : index
    %c0_63 = arith.constant 0 : index
    %61 = vector.load %arg10[%c2_61, %c1_62, %c0_63] : memref<12x18x8xf32, #tpu.memory_space<vmem>>, vector<10x16x8xf32>
    %62 = vector.shape_cast %61 : vector<10x16x8xf32> to vector<160x8xf32>
    %c7 = arith.constant 7 : index
    %c0_64 = arith.constant 0 : index
    %c0_65 = arith.constant 0 : index
    %63 = vector.load %arg5[%c7, %c0_64, %c0_65] : memref<9x8x8xf32, #tpu.memory_space<vmem>>, vector<1x8x8xf32>
    %64 = vector.shape_cast %63 : vector<1x8x8xf32> to vector<8x8xf32>
    %cst_66 = arith.constant dense<0.000000e+00> : vector<160x8xf32>
    %65 = tpu.matmul %62, %64, %cst_66 {dimension_numbers = #tpu.dot_dimension_numbers<[1], [0], [0], [1], [0, 0, 1, 1], [], []>} : vector<160x8xf32>, vector<8x8xf32>, vector<160x8xf32> -> vector<160x8xf32>
    %66 = arith.addf %60, %65 : vector<160x8xf32>
    %c2_67 = arith.constant 2 : index
    %c2_68 = arith.constant 2 : index
    %c0_69 = arith.constant 0 : index
    %67 = vector.load %arg10[%c2_67, %c2_68, %c0_69] : memref<12x18x8xf32, #tpu.memory_space<vmem>>, vector<10x16x8xf32>
    %68 = vector.shape_cast %67 : vector<10x16x8xf32> to vector<160x8xf32>
    %c8 = arith.constant 8 : index
    %c0_70 = arith.constant 0 : index
    %c0_71 = arith.constant 0 : index
    %69 = vector.load %arg5[%c8, %c0_70, %c0_71] : memref<9x8x8xf32, #tpu.memory_space<vmem>>, vector<1x8x8xf32>
    %70 = vector.shape_cast %69 : vector<1x8x8xf32> to vector<8x8xf32>
    %cst_72 = arith.constant dense<0.000000e+00> : vector<160x8xf32>
    %71 = tpu.matmul %68, %70, %cst_72 {dimension_numbers = #tpu.dot_dimension_numbers<[1], [0], [0], [1], [0, 0, 1, 1], [], []>} : vector<160x8xf32>, vector<8x8xf32>, vector<160x8xf32> -> vector<160x8xf32>
    %72 = arith.addf %66, %71 : vector<160x8xf32>
    %c0_73 = arith.constant 0 : index
    %c0_74 = arith.constant 0 : index
    %73 = vector.load %arg6[%c0_73, %c0_74] : memref<1x8xf32, #tpu.memory_space<vmem>>, vector<1x8xf32>
    %74 = vector.broadcast %73 : vector<1x8xf32> to vector<160x8xf32>
    %75 = arith.addf %72, %74 : vector<160x8xf32>
    %cst_75 = arith.constant 0.000000e+00 : f32
    %76 = vector.broadcast %cst_75 : f32 to vector<160x8xf32>
    %77 = arith.maximumf %75, %76 : vector<160x8xf32>
    %78 = vector.shape_cast %77 : vector<160x8xf32> to vector<10x16x8xf32>
    %c0_76 = arith.constant 0 : index
    %c1_77 = arith.constant 1 : index
    %c0_78 = arith.constant 0 : index
    %79 = vector.load %arg10[%c0_76, %c1_77, %c0_78] : memref<12x18x8xf32, #tpu.memory_space<vmem>>, vector<10x16x8xf32>
    tpu.vector_store %arg10[%c0_76, %c1_77, %c0_78], %78 {strides = array<i32>} : memref<12x18x8xf32, #tpu.memory_space<vmem>>, vector<10x16x8xf32>,
    %c0_i32_79 = arith.constant 0 : i32
    %80 = arith.cmpi eq, %arg1, %c0_i32_79 : i32
    %81 = arith.extui %80 : i1 to i32
    %c0_i32_80 = arith.constant 0 : i32
    %82 = arith.cmpi ne, %81, %c0_i32_80 : i32
    scf.if %82 {
      %cst_158 = arith.constant 0.000000e+00 : f32
      %154 = vector.broadcast %cst_158 : f32 to vector<1x16x8xf32>
      %c0_159 = arith.constant 0 : index
      %c1_160 = arith.constant 1 : index
      %c0_161 = arith.constant 0 : index
      %155 = vector.load %arg10[%c0_159, %c1_160, %c0_161] : memref<12x18x8xf32, #tpu.memory_space<vmem>>, vector<1x16x8xf32>
      tpu.vector_store %arg10[%c0_159, %c1_160, %c0_161], %154 {strides = array<i32>} : memref<12x18x8xf32, #tpu.memory_space<vmem>>, vector<1x16x8xf32>,
    } else {
    }
    %c1_i32_81 = arith.constant 1 : i32
    %83 = arith.cmpi eq, %arg1, %c1_i32_81 : i32
    %84 = arith.extui %83 : i1 to i32
    %c0_i32_82 = arith.constant 0 : i32
    %85 = arith.cmpi ne, %84, %c0_i32_82 : i32
    scf.if %85 {
      %cst_158 = arith.constant 0.000000e+00 : f32
      %154 = vector.broadcast %cst_158 : f32 to vector<1x16x8xf32>
      %c9 = arith.constant 9 : index
      %c1_159 = arith.constant 1 : index
      %c0_160 = arith.constant 0 : index
      %155 = vector.load %arg10[%c9, %c1_159, %c0_160] : memref<12x18x8xf32, #tpu.memory_space<vmem>>, vector<1x16x8xf32>
      tpu.vector_store %arg10[%c9, %c1_159, %c0_160], %154 {strides = array<i32>} : memref<12x18x8xf32, #tpu.memory_space<vmem>>, vector<1x16x8xf32>,
    } else {
    }
    %cst_83 = arith.constant 0.000000e+00 : f32
    %86 = vector.broadcast %cst_83 : f32 to vector<128x8xf32>
    %c0_84 = arith.constant 0 : index
    %c0_85 = arith.constant 0 : index
    %c0_86 = arith.constant 0 : index
    %87 = vector.load %arg10[%c0_84, %c0_85, %c0_86] : memref<12x18x8xf32, #tpu.memory_space<vmem>>, vector<8x16x8xf32>
    %88 = vector.shape_cast %87 : vector<8x16x8xf32> to vector<128x8xf32>
    %c0_87 = arith.constant 0 : index
    %c0_88 = arith.constant 0 : index
    %c0_89 = arith.constant 0 : index
    %89 = vector.load %arg7[%c0_87, %c0_88, %c0_89] : memref<9x8x8xf32, #tpu.memory_space<vmem>>, vector<1x8x8xf32>
    %90 = vector.shape_cast %89 : vector<1x8x8xf32> to vector<8x8xf32>
    %cst_90 = arith.constant dense<0.000000e+00> : vector<128x8xf32>
    %91 = tpu.matmul %88, %90, %cst_90 {dimension_numbers = #tpu.dot_dimension_numbers<[1], [0], [0], [1], [0, 0, 1, 1], [], []>} : vector<128x8xf32>, vector<8x8xf32>, vector<128x8xf32> -> vector<128x8xf32>
    %92 = arith.addf %86, %91 : vector<128x8xf32>
    %c0_91 = arith.constant 0 : index
    %c1_92 = arith.constant 1 : index
    %c0_93 = arith.constant 0 : index
    %93 = vector.load %arg10[%c0_91, %c1_92, %c0_93] : memref<12x18x8xf32, #tpu.memory_space<vmem>>, vector<8x16x8xf32>
    %94 = vector.shape_cast %93 : vector<8x16x8xf32> to vector<128x8xf32>
    %c1_94 = arith.constant 1 : index
    %c0_95 = arith.constant 0 : index
    %c0_96 = arith.constant 0 : index
    %95 = vector.load %arg7[%c1_94, %c0_95, %c0_96] : memref<9x8x8xf32, #tpu.memory_space<vmem>>, vector<1x8x8xf32>
    %96 = vector.shape_cast %95 : vector<1x8x8xf32> to vector<8x8xf32>
    %cst_97 = arith.constant dense<0.000000e+00> : vector<128x8xf32>
    %97 = tpu.matmul %94, %96, %cst_97 {dimension_numbers = #tpu.dot_dimension_numbers<[1], [0], [0], [1], [0, 0, 1, 1], [], []>} : vector<128x8xf32>, vector<8x8xf32>, vector<128x8xf32> -> vector<128x8xf32>
    %98 = arith.addf %92, %97 : vector<128x8xf32>
    %c0_98 = arith.constant 0 : index
    %c2_99 = arith.constant 2 : index
    %c0_100 = arith.constant 0 : index
    %99 = vector.load %arg10[%c0_98, %c2_99, %c0_100] : memref<12x18x8xf32, #tpu.memory_space<vmem>>, vector<8x16x8xf32>
    %100 = vector.shape_cast %99 : vector<8x16x8xf32> to vector<128x8xf32>
    %c2_101 = arith.constant 2 : index
    %c0_102 = arith.constant 0 : index
    %c0_103 = arith.constant 0 : index
    %101 = vector.load %arg7[%c2_101, %c0_102, %c0_103] : memref<9x8x8xf32, #tpu.memory_space<vmem>>, vector<1x8x8xf32>
    %102 = vector.shape_cast %101 : vector<1x8x8xf32> to vector<8x8xf32>
    %cst_104 = arith.constant dense<0.000000e+00> : vector<128x8xf32>
    %103 = tpu.matmul %100, %102, %cst_104 {dimension_numbers = #tpu.dot_dimension_numbers<[1], [0], [0], [1], [0, 0, 1, 1], [], []>} : vector<128x8xf32>, vector<8x8xf32>, vector<128x8xf32> -> vector<128x8xf32>
    %104 = arith.addf %98, %103 : vector<128x8xf32>
    %c1_105 = arith.constant 1 : index
    %c0_106 = arith.constant 0 : index
    %c0_107 = arith.constant 0 : index
    %105 = vector.load %arg10[%c1_105, %c0_106, %c0_107] : memref<12x18x8xf32, #tpu.memory_space<vmem>>, vector<8x16x8xf32>
    %106 = vector.shape_cast %105 : vector<8x16x8xf32> to vector<128x8xf32>
    %c3_108 = arith.constant 3 : index
    %c0_109 = arith.constant 0 : index
    %c0_110 = arith.constant 0 : index
    %107 = vector.load %arg7[%c3_108, %c0_109, %c0_110] : memref<9x8x8xf32, #tpu.memory_space<vmem>>, vector<1x8x8xf32>
    %108 = vector.shape_cast %107 : vector<1x8x8xf32> to vector<8x8xf32>
    %cst_111 = arith.constant dense<0.000000e+00> : vector<128x8xf32>
    %109 = tpu.matmul %106, %108, %cst_111 {dimension_numbers = #tpu.dot_dimension_numbers<[1], [0], [0], [1], [0, 0, 1, 1], [], []>} : vector<128x8xf32>, vector<8x8xf32>, vector<128x8xf32> -> vector<128x8xf32>
    %110 = arith.addf %104, %109 : vector<128x8xf32>
    %c1_112 = arith.constant 1 : index
    %c1_113 = arith.constant 1 : index
    %c0_114 = arith.constant 0 : index
    %111 = vector.load %arg10[%c1_112, %c1_113, %c0_114] : memref<12x18x8xf32, #tpu.memory_space<vmem>>, vector<8x16x8xf32>
    %112 = vector.shape_cast %111 : vector<8x16x8xf32> to vector<128x8xf32>
    %c4_115 = arith.constant 4 : index
    %c0_116 = arith.constant 0 : index
    %c0_117 = arith.constant 0 : index
    %113 = vector.load %arg7[%c4_115, %c0_116, %c0_117] : memref<9x8x8xf32, #tpu.memory_space<vmem>>, vector<1x8x8xf32>
    %114 = vector.shape_cast %113 : vector<1x8x8xf32> to vector<8x8xf32>
    %cst_118 = arith.constant dense<0.000000e+00> : vector<128x8xf32>
    %115 = tpu.matmul %112, %114, %cst_118 {dimension_numbers = #tpu.dot_dimension_numbers<[1], [0], [0], [1], [0, 0, 1, 1], [], []>} : vector<128x8xf32>, vector<8x8xf32>, vector<128x8xf32> -> vector<128x8xf32>
    %116 = arith.addf %110, %115 : vector<128x8xf32>
    %c1_119 = arith.constant 1 : index
    %c2_120 = arith.constant 2 : index
    %c0_121 = arith.constant 0 : index
    %117 = vector.load %arg10[%c1_119, %c2_120, %c0_121] : memref<12x18x8xf32, #tpu.memory_space<vmem>>, vector<8x16x8xf32>
    %118 = vector.shape_cast %117 : vector<8x16x8xf32> to vector<128x8xf32>
    %c5_122 = arith.constant 5 : index
    %c0_123 = arith.constant 0 : index
    %c0_124 = arith.constant 0 : index
    %119 = vector.load %arg7[%c5_122, %c0_123, %c0_124] : memref<9x8x8xf32, #tpu.memory_space<vmem>>, vector<1x8x8xf32>
    %120 = vector.shape_cast %119 : vector<1x8x8xf32> to vector<8x8xf32>
    %cst_125 = arith.constant dense<0.000000e+00> : vector<128x8xf32>
    %121 = tpu.matmul %118, %120, %cst_125 {dimension_numbers = #tpu.dot_dimension_numbers<[1], [0], [0], [1], [0, 0, 1, 1], [], []>} : vector<128x8xf32>, vector<8x8xf32>, vector<128x8xf32> -> vector<128x8xf32>
    %122 = arith.addf %116, %121 : vector<128x8xf32>
    %c2_126 = arith.constant 2 : index
    %c0_127 = arith.constant 0 : index
    %c0_128 = arith.constant 0 : index
    %123 = vector.load %arg10[%c2_126, %c0_127, %c0_128] : memref<12x18x8xf32, #tpu.memory_space<vmem>>, vector<8x16x8xf32>
    %124 = vector.shape_cast %123 : vector<8x16x8xf32> to vector<128x8xf32>
    %c6_129 = arith.constant 6 : index
    %c0_130 = arith.constant 0 : index
    %c0_131 = arith.constant 0 : index
    %125 = vector.load %arg7[%c6_129, %c0_130, %c0_131] : memref<9x8x8xf32, #tpu.memory_space<vmem>>, vector<1x8x8xf32>
    %126 = vector.shape_cast %125 : vector<1x8x8xf32> to vector<8x8xf32>
    %cst_132 = arith.constant dense<0.000000e+00> : vector<128x8xf32>
    %127 = tpu.matmul %124, %126, %cst_132 {dimension_numbers = #tpu.dot_dimension_numbers<[1], [0], [0], [1], [0, 0, 1, 1], [], []>} : vector<128x8xf32>, vector<8x8xf32>, vector<128x8xf32> -> vector<128x8xf32>
    %128 = arith.addf %122, %127 : vector<128x8xf32>
    %c2_133 = arith.constant 2 : index
    %c1_134 = arith.constant 1 : index
    %c0_135 = arith.constant 0 : index
    %129 = vector.load %arg10[%c2_133, %c1_134, %c0_135] : memref<12x18x8xf32, #tpu.memory_space<vmem>>, vector<8x16x8xf32>
    %130 = vector.shape_cast %129 : vector<8x16x8xf32> to vector<128x8xf32>
    %c7_136 = arith.constant 7 : index
    %c0_137 = arith.constant 0 : index
    %c0_138 = arith.constant 0 : index
    %131 = vector.load %arg7[%c7_136, %c0_137, %c0_138] : memref<9x8x8xf32, #tpu.memory_space<vmem>>, vector<1x8x8xf32>
    %132 = vector.shape_cast %131 : vector<1x8x8xf32> to vector<8x8xf32>
    %cst_139 = arith.constant dense<0.000000e+00> : vector<128x8xf32>
    %133 = tpu.matmul %130, %132, %cst_139 {dimension_numbers = #tpu.dot_dimension_numbers<[1], [0], [0], [1], [0, 0, 1, 1], [], []>} : vector<128x8xf32>, vector<8x8xf32>, vector<128x8xf32> -> vector<128x8xf32>
    %134 = arith.addf %128, %133 : vector<128x8xf32>
    %c2_140 = arith.constant 2 : index
    %c2_141 = arith.constant 2 : index
    %c0_142 = arith.constant 0 : index
    %135 = vector.load %arg10[%c2_140, %c2_141, %c0_142] : memref<12x18x8xf32, #tpu.memory_space<vmem>>, vector<8x16x8xf32>
    %136 = vector.shape_cast %135 : vector<8x16x8xf32> to vector<128x8xf32>
    %c8_143 = arith.constant 8 : index
    %c0_144 = arith.constant 0 : index
    %c0_145 = arith.constant 0 : index
    %137 = vector.load %arg7[%c8_143, %c0_144, %c0_145] : memref<9x8x8xf32, #tpu.memory_space<vmem>>, vector<1x8x8xf32>
    %138 = vector.shape_cast %137 : vector<1x8x8xf32> to vector<8x8xf32>
    %cst_146 = arith.constant dense<0.000000e+00> : vector<128x8xf32>
    %139 = tpu.matmul %136, %138, %cst_146 {dimension_numbers = #tpu.dot_dimension_numbers<[1], [0], [0], [1], [0, 0, 1, 1], [], []>} : vector<128x8xf32>, vector<8x8xf32>, vector<128x8xf32> -> vector<128x8xf32>
    %140 = arith.addf %134, %139 : vector<128x8xf32>
    %c0_147 = arith.constant 0 : index
    %c0_148 = arith.constant 0 : index
    %141 = vector.load %arg8[%c0_147, %c0_148] : memref<1x8xf32, #tpu.memory_space<vmem>>, vector<1x8xf32>
    %142 = vector.broadcast %141 : vector<1x8xf32> to vector<128x8xf32>
    %143 = arith.addf %140, %142 : vector<128x8xf32>
    %cst_149 = arith.constant 1.000000e-01 : f32
    %144 = vector.broadcast %cst_149 : f32 to vector<128x8xf32>
    %145 = arith.mulf %143, %144 : vector<128x8xf32>
    %c0_150 = arith.constant 0 : index
    %c0_151 = arith.constant 0 : index
    %c0_152 = arith.constant 0 : index
    %c0_153 = arith.constant 0 : index
    %146 = vector.load %arg2[%c0_150, %c0_151, %c0_152, %c0_153] : memref<1x8x16x8xf32, #tpu.memory_space<vmem>>, vector<1x8x16x8xf32>
    %147 = vector.shape_cast %146 : vector<1x8x16x8xf32> to vector<8x16x8xf32>
    %148 = vector.shape_cast %147 : vector<8x16x8xf32> to vector<128x8xf32>
    %149 = arith.addf %145, %148 : vector<128x8xf32>
    %150 = vector.shape_cast %149 : vector<128x8xf32> to vector<8x16x8xf32>
    %c0_154 = arith.constant 0 : index
    %c0_155 = arith.constant 0 : index
    %c0_156 = arith.constant 0 : index
    %c0_157 = arith.constant 0 : index
    %151 = vector.load %arg9[%c0_154, %c0_155, %c0_156, %c0_157] : memref<1x8x16x8xf32, #tpu.memory_space<vmem>>, vector<1x8x16x8xf32>
    %152 = vector.shape_cast %151 : vector<1x8x16x8xf32> to vector<8x16x8xf32>
    %153 = vector.shape_cast %150 : vector<8x16x8xf32> to vector<1x8x16x8xf32>
    tpu.vector_store %arg9[%c0_154, %c0_155, %c0_156, %c0_157], %153 {strides = array<i32>} : memref<1x8x16x8xf32, #tpu.memory_space<vmem>>, vector<1x8x16x8xf32>,
    return
  }
  func.func @transform_0(%arg0: i32, %arg1: i32) -> (i32, i32, i32, i32) {
    %c0_i32 = arith.constant 0 : i32
    %c0_i32_0 = arith.constant 0 : i32
    %c0_i32_1 = arith.constant 0 : i32
    return %arg0, %arg1, %c0_i32, %c0_i32_0 : i32, i32, i32, i32
  }
  func.func @transform_1(%arg0: i32, %arg1: i32) -> (i32, i32, i32, i32) {
    %c1_i32 = arith.constant 1 : i32
    %0 = arith.subi %arg1, %c1_i32 : i32
    %c0_i32 = arith.constant 0 : i32
    %1 = arith.maxsi %0, %c0_i32 : i32
    %c0_i32_0 = arith.constant 0 : i32
    %c0_i32_1 = arith.constant 0 : i32
    %c0_i32_2 = arith.constant 0 : i32
    return %arg0, %1, %c0_i32_0, %c0_i32_1 : i32, i32, i32, i32
  }
  func.func @transform_2(%arg0: i32, %arg1: i32) -> (i32, i32, i32, i32) {
    %c1_i32 = arith.constant 1 : i32
    %0 = arith.addi %arg1, %c1_i32 : i32
    %c1_i32_0 = arith.constant 1 : i32
    %1 = arith.minsi %0, %c1_i32_0 : i32
    %c0_i32 = arith.constant 0 : i32
    %c0_i32_1 = arith.constant 0 : i32
    %c0_i32_2 = arith.constant 0 : i32
    return %arg0, %1, %c0_i32, %c0_i32_1 : i32, i32, i32, i32
  }
  func.func @transform_3(%arg0: i32, %arg1: i32) -> (i32, i32, i32) {
    %c0_i32 = arith.constant 0 : i32
    %c0_i32_0 = arith.constant 0 : i32
    %c0_i32_1 = arith.constant 0 : i32
    %c0_i32_2 = arith.constant 0 : i32
    return %c0_i32, %c0_i32_0, %c0_i32_1 : i32, i32, i32
  }
  func.func @transform_4(%arg0: i32, %arg1: i32) -> (i32, i32) {
    %c0_i32 = arith.constant 0 : i32
    %c0_i32_0 = arith.constant 0 : i32
    %c0_i32_1 = arith.constant 0 : i32
    return %c0_i32, %c0_i32_0 : i32, i32
  }
  func.func @transform_5(%arg0: i32, %arg1: i32) -> (i32, i32, i32) {
    %c0_i32 = arith.constant 0 : i32
    %c0_i32_0 = arith.constant 0 : i32
    %c0_i32_1 = arith.constant 0 : i32
    %c0_i32_2 = arith.constant 0 : i32
    return %c0_i32, %c0_i32_0, %c0_i32_1 : i32, i32, i32
  }
  func.func @transform_6(%arg0: i32, %arg1: i32) -> (i32, i32) {
    %c0_i32 = arith.constant 0 : i32
    %c0_i32_0 = arith.constant 0 : i32
    %c0_i32_1 = arith.constant 0 : i32
    return %c0_i32, %c0_i32_0 : i32, i32
  }
  func.func @transform_7(%arg0: i32, %arg1: i32) -> (i32, i32, i32, i32) {
    %c0_i32 = arith.constant 0 : i32
    %c0_i32_0 = arith.constant 0 : i32
    %c0_i32_1 = arith.constant 0 : i32
    return %arg0, %arg1, %c0_i32, %c0_i32_0 : i32, i32, i32, i32
  }
}

</mosaic_0001>

<bundles_post_ra>
// kernel: tpu_custom_call.1
= control target key start
LH: loop header
LB: loop body
LE: loop exit
PB: predicated region body
PF: predicated region fallthrough
CT: control target
= control target key end

     0   :  { %s4217_s24 = smov 0   ;;  %s4219_s25 = smov 0   ;;  %s5743_s0 = inlined_call_operand.vmem [shape: f32[2,16,16,8], index: 0, kind: input, shape index: {}]   ;;  %s5744_s1 = inlined_call_operand.vmem [shape: f32[2,16,16,8], index: 1, kind: input, shape index: {}]   ;;  %s5745_s2 = inlined_call_operand.vmem [shape: f32[2,16,16,8], index: 2, kind: input, shape index: {}]   ;;  %s5746_s3 = inlined_call_operand.vmem [shape: f32[9,8,8], index: 3, kind: input, shape index: {}]   ;;  %s5747_s4 = inlined_call_operand.vmem [shape: f32[1,8], index: 4, kind: input, shape index: {}]   ;;  %s5748_s5 = inlined_call_operand.vmem [shape: f32[9,8,8], index: 5, kind: input, shape index: {}]   ;;  %s5749_s6 = inlined_call_operand.vmem [shape: f32[1,8], index: 6, kind: input, shape index: {}]   ;;  %s5750_s7 = inlined_call_operand.vmem [shape: f32[2,16,16,8], index: 7, kind: output, shape index: {}]  }
   0x1   :  { %s4221_s26 = smov 0   ;;  %s4223_s27 = smov 0  }
   0x2   :  { %s4225_s28 = smov 0  }
   0x3 LB: > { %s26_s29 = sadd.s32 1, %s4162_s26  ;;  %s29_s30 = sadd.s32 1, %s4166_s27  ;;  %s4170_s28 = sphi %s4225_s28, %s17_s28   ;;  %s4166_s27 = sphi %s4223_s27, %s5826_s27   ;;  %s4162_s26 = sphi %s4221_s26, %s5825_s26   ;;  %s4158_s25 = sphi %s4219_s25, %s5824_s25   ;;  %s4154_s24 = sphi %s4217_s24, %s5823_s24  }
   0x4   : > { %p27_p0 = scmp.ge.s32.totalorder %s26_s29, 2  ;;  %p3712_p1 = scmp.ge.s32.totalorder %s4170_s28, 1 }
   0x5   : > { %p319_p2 = scmp.lt.s32.totalorder %s4170_s28, 5 }
   0x6   : > { %s5828_s29 = smov (%p27_p0, %s26_s29), 0  ;;  %s5830_s30 = smov (!%p27_p0, %s29_s30), %s4166_s27 }
   0x7   : > { %p320_p3 = pnand %p3712_p1, %p319_p2  ;;  %p31_p4 = scmp.ge.s32.totalorder %s5830_s30, 2 }
   0x9   : > { %s5832_s30 = smov (%p31_p4, %s5830_s30), 0  ;;  %323 = sbr.rel (%p320_p3) target bundleno = 1274 (0x4fa), region = 48 }
   0xe   : > { %vm443_vm0 = vcmask 57344   ;;  %s3713_s8 = sshll.u32 %s4154_s24, 3  ;;  %p388_p5 = scmp.lt.s32.totalorder %s4158_s25, 1  ;;  %v4172_v0 = vmov 0.0   ;;  %vm485_vm1 = vcmask 64512  }
   0xf   : > { %444 = vst.msk [vmem:[#allocation2] sm:$0x1] %vm443_vm0, %v4172_v0  ;;  %p390_p6 = scmp.lt.s32.totalorder %s3713_s8, 15  ;;  %s3717_s9 = sadd.s32 4294967295, %s4154_s24 }
  0x10   : > { %445 = vst.msk [vmem:[#allocation2 + $0x18] sm:$0x1] %vm443_vm0, %v4172_v0  ;;  %s5834_s25 = smov (!%p388_p5, %s4158_s25), 1  ;;  %p399_p7 = scmp.gt.s32.totalorder %s3717_s9, 0 }
  0x11   : > { %446 = vst.msk [vmem:[#allocation2 + $0x30] sm:$0x1] %vm443_vm0, %v4172_v0  ;;  %s5836_s8 = smov (!%p390_p6, %s3713_s8), 15  ;;  %s4255_s10 = sshll.u32 %s5834_s25, 5 }
  0x12   : > { %447 = vst.msk [vmem:[#allocation2 + $0x48] sm:$0x1] %vm443_vm0, %v4172_v0  ;;  %s3714_s11 = sshll.u32 %s5836_s8, 1  ;;  %s415_s12 = sadd.s32 1, %s4154_s24 }
  0x13   : > { %448 = vst.msk [vmem:[#allocation2 + $0x60] sm:$0x1] %vm443_vm0, %v4172_v0  ;;  %s394_s13 = sadd.s32 %s4255_s10, %s3714_s11  ;;  %p416_p8 = scmp.lt.s32.totalorder %s415_s12, 1 }
  0x14   : > { %449 = vst.msk [vmem:[#allocation2 + $0x78] sm:$0x1] %vm443_vm0, %v4172_v0  ;;  %s3716_s14 = sshll.u32 %s394_s13, 3  ;;  %s5838_s9 = smov (!%p399_p7, %s3717_s9), 0 }
  0x15   : > { %450 = vst.msk [vmem:[#allocation2 + $0x90] sm:$0x1] %vm443_vm0, %v4172_v0  ;;  %s4266_s17 = scalar_lea.vmem %s5750_s7, %s3716_s14  ;;  %s5840_s12 = smov (!%p416_p8, %s415_s12), 1 }
  0x16   : > { %451 = vst.msk [vmem:[#allocation2 + $0xa8] sm:$0x1] %vm443_vm0, %v4172_v0  ;;  %s3718_s18 = sshll.u32 %s5838_s9, 3  ;;  %s3722_s19 = sshll.u32 %s5840_s12, 3 }
  0x17   : > { %452 = vst.msk [vmem:[#allocation2 + $0xc0] sm:$0x1] %vm443_vm0, %v4172_v0  ;;  %p404_p9 = scmp.lt.s32.totalorder %s3718_s18, 15  ;;  %p421_p10 = scmp.lt.s32.totalorder %s3722_s19, 15 }
  0x18   : > { %453 = vst.msk [vmem:[#allocation2 + $0xd8] sm:$0x1] %vm443_vm0, %v4172_v0  ;;  %s4279_s22 = scalar_lea.vmem %s5743_s0, %s3716_s14  ;;  %p3730_p11 = scmp.le.s32.totalorder %s4154_s24, 0 }
  0x19   : > { %454 = vst.msk [vmem:[#allocation2 + $0xf0] sm:$0x1] %vm443_vm0, %v4172_v0  ;;  %s5842_s18 = smov (!%p404_p9, %s3718_s18), 15  ;;  %s5844_s19 = smov (!%p421_p10, %s3722_s19), 15  ;;  %v468_v1 = vld [vmem:[%s4279_s22] sm:$0xff]  ;;  %v469_v2 = vld [vmem:[%s4279_s22 + $0x8] sm:$0xff] }
  0x1a   : > { %455 = vst.msk [vmem:[#allocation2 + $0x108] sm:$0x1] %vm443_vm0, %v4172_v0  ;;  %s3719_s23 = sshll.u32 %s5842_s18, 1  ;;  %s3723_s8 = sshll.u32 %s5844_s19, 1  ;;  %v470_v3 = vld [vmem:[%s4279_s22 + $0x10] sm:$0xff]  ;;  %v471_v4 = vld [vmem:[%s4279_s22 + $0x18] sm:$0xff] }
  0x1b   : > { %456 = vst.msk [vmem:[#allocation2 + $0x11] sm:$0x1] %vm443_vm0, %v4172_v0  ;;  %s408_s25 = sadd.s32 %s3719_s23, %s4255_s10  ;;  %s425_s11 = sadd.s32 %s3723_s8, %s4255_s10  ;;  %v472_v5 = vld [vmem:[%s4279_s22 + $0x20] sm:$0xff]  ;;  %v473_v6 = vld [vmem:[%s4279_s22 + $0x28] sm:$0xff]  ;;  %v474_v7 = vld [vmem:[%s4279_s22 + $0x30] sm:$0xff] }
  0x1c   : > { %457 = vst.msk [vmem:[#allocation2 + $0x29] sm:$0x1] %vm443_vm0, %v4172_v0  ;;  %s3721_s9 = sshll.u32 %s408_s25, 3  ;;  %s3725_s15 = sshll.u32 %s425_s11, 3  ;;  %v475_v8 = vld [vmem:[%s4279_s22 + $0x38] sm:$0xff]  ;;  %v476_v9 = vld [vmem:[%s4279_s22 + $0x40] sm:$0xff] }
  0x1d   : > { %458 = vst.msk [vmem:[#allocation2 + $0x41] sm:$0x1] %vm443_vm0, %v4172_v0  ;;  %s4289_s14 = scalar_lea.vmem %s5744_s1, %s3721_s9  ;;  %s4295_s19 = scalar_lea.vmem %s5745_s2, %s3725_s15  ;;  %v477_v10 = vld [vmem:[%s4279_s22 + $0x48] sm:$0xff]  ;;  %v478_v11 = vld [vmem:[%s4279_s22 + $0x50] sm:$0xff]  ;;  %v479_v12 = vld [vmem:[%s4279_s22 + $0x58] sm:$0xff] }
  0x1e   : > { %459 = vst.msk [vmem:[#allocation2 + $0x59] sm:$0x1] %vm443_vm0, %v4172_v0  ;;  %v480_v13 = vld [vmem:[%s4279_s22 + $0x60] sm:$0xff]  ;;  %v481_v14 = vld [vmem:[%s4279_s22 + $0x68] sm:$0xff]  ;;  %v482_v15 = vld [vmem:[%s4279_s22 + $0x70] sm:$0xff] }
  0x1f   : > { %460 = vst.msk [vmem:[#allocation2 + $0x71] sm:$0x1] %vm443_vm0, %v4172_v0  ;;  %v483_v16 = vld [vmem:[%s4279_s22 + $0x78] sm:$0xff] }
  0x20   : > { %461 = vst.msk [vmem:[#allocation2 + $0x89] sm:$0x1] %vm443_vm0, %v4172_v0 }
  0x21   : > { %462 = vst.msk [vmem:[#allocation2 + $0xa1] sm:$0x1] %vm443_vm0, %v4172_v0 }
  0x22   : > { %463 = vst.msk [vmem:[#allocation2 + $0xb9] sm:$0x1] %vm443_vm0, %v4172_v0 }
  0x23   : > { %464 = vst.msk [vmem:[#allocation2 + $0xd1] sm:$0x1] %vm443_vm0, %v4172_v0 }
  0x24   : > { %465 = vst.msk [vmem:[#allocation2 + $0xe9] sm:$0x1] %vm443_vm0, %v4172_v0 }
  0x25   : > { %466 = vst.msk [vmem:[#allocation2 + $0x101] sm:$0x1] %vm443_vm0, %v4172_v0 }
  0x26   : > { %467 = vst.msk [vmem:[#allocation2 + $0x119] sm:$0x1] %vm443_vm0, %v4172_v0 }
  0x27   : > { %486 = vst.msk [vmem:[#allocation2 + $0x31] sm:$0xff] %vm485_vm1, %v468_v1 }
  0x28   : > { %487 = vst.msk [vmem:[#allocation2 + $0x39] sm:$0xff] %vm485_vm1, %v469_v2 }
  0x29   : > { %488 = vst.msk [vmem:[#allocation2 + $0x49] sm:$0xff] %vm485_vm1, %v470_v3 }
  0x2a   : > { %489 = vst.msk [vmem:[#allocation2 + $0x51] sm:$0xff] %vm485_vm1, %v471_v4 }
  0x2b   : > { %490 = vst.msk [vmem:[#allocation2 + $0x61] sm:$0xff] %vm485_vm1, %v472_v5 }
  0x2c   : > { %491 = vst.msk [vmem:[#allocation2 + $0x69] sm:$0xff] %vm485_vm1, %v473_v6 }
  0x2d   : > { %492 = vst.msk [vmem:[#allocation2 + $0x79] sm:$0xff] %vm485_vm1, %v474_v7 }
  0x2e   : > { %493 = vst.msk [vmem:[#allocation2 + $0x81] sm:$0xff] %vm485_vm1, %v475_v8 }
  0x2f   : > { %494 = vst.msk [vmem:[#allocation2 + $0x91] sm:$0xff] %vm485_vm1, %v476_v9 }
  0x30   : > { %495 = vst.msk [vmem:[#allocation2 + $0x99] sm:$0xff] %vm485_vm1, %v477_v10 }
  0x31   : > { %496 = vst.msk [vmem:[#allocation2 + $0xa9] sm:$0xff] %vm485_vm1, %v478_v11 }
  0x32   : > { %497 = vst.msk [vmem:[#allocation2 + $0xb1] sm:$0xff] %vm485_vm1, %v479_v12  ;;  %505 = sbr.rel (%p3730_p11) target bundleno = 60 (0x3c), region = 52 }
  0x33   : > { %498 = vst.msk [vmem:[#allocation2 + $0xc1] sm:$0xff] %vm485_vm1, %v480_v13 }
  0x34   : > { %499 = vst.msk [vmem:[#allocation2 + $0xc9] sm:$0xff] %vm485_vm1, %v481_v14 }
  0x35   : > { %500 = vst.msk [vmem:[#allocation2 + $0xd9] sm:$0xff] %vm485_vm1, %v482_v15 }
  0x36   : > { %501 = vst.msk [vmem:[#allocation2 + $0xe1] sm:$0xff] %vm485_vm1, %v483_v16 }
  0x37   : > { %v3731_v17 = vld [vmem:[%s4289_s14 + $0x60] sm:$0xff]  ;;  %v3732_v18 = vld [vmem:[%s4289_s14 + $0x68] sm:$0xff]  ;;  %v3733_v19 = vld [vmem:[%s4289_s14 + $0x70] sm:$0xff] }
  0x38   : > { %511 = vst.msk [vmem:[#allocation2 + $0x1] sm:$0xff] %vm485_vm1, %v3731_v17  ;;  %v3734_v20 = vld [vmem:[%s4289_s14 + $0x78] sm:$0xff] }
  0x39   : > { %512 = vst.msk [vmem:[#allocation2 + $0x9] sm:$0xff] %vm485_vm1, %v3732_v18 }
  0x3a   : > { %513 = vst.msk [vmem:[#allocation2 + $0x19] sm:$0xff] %vm485_vm1, %v3733_v19 }
  0x3b   : > { %514 = vst.msk [vmem:[#allocation2 + $0x21] sm:$0xff] %vm485_vm1, %v3734_v20 }
  0x3c PF: > { %p3735_p12 = scmp.ne.s32.totalorder %s4154_s24, 0 }
  0x3e   : > { %518 = sbr.rel (%p3735_p12) target bundleno = 72 (0x48), region = 56 }
  0x43   : > { %v4173_v21 = vmov 0.0  }
  0x44   : > { %519 = vst.msk [vmem:[#allocation2 + $0x1] sm:$0xff] %vm485_vm1, %v4173_v21 }
  0x45   : > { %520 = vst.msk [vmem:[#allocation2 + $0x9] sm:$0xff] %vm485_vm1, %v4173_v21 }
  0x46   : > { %521 = vst.msk [vmem:[#allocation2 + $0x19] sm:$0xff] %vm485_vm1, %v4173_v21 }
  0x47   : > { %522 = vst.msk [vmem:[#allocation2 + $0x21] sm:$0xff] %vm485_vm1, %v4173_v21 }
  0x48 PF: > { %p3736_p13 = scmp.ge.s32.totalorder %s4154_s24, 1 }
  0x4a   : > { %526 = sbr.rel (%p3736_p13) target bundleno = 84 (0x54), region = 60 }
  0x4f   : > { %v527_v22 = vld [vmem:[%s4295_s19] sm:$0xff]  ;;  %v528_v23 = vld [vmem:[%s4295_s19 + $0x8] sm:$0xff]  ;;  %v529_v24 = vld [vmem:[%s4295_s19 + $0x10] sm:$0xff] }
  0x50   : > { %532 = vst.msk [vmem:[#allocation2 + $0xf1] sm:$0xff] %vm485_vm1, %v527_v22  ;;  %v530_v25 = vld [vmem:[%s4295_s19 + $0x18] sm:$0xff] }
  0x51   : > { %533 = vst.msk [vmem:[#allocation2 + $0xf9] sm:$0xff] %vm485_vm1, %v528_v23 }
  0x52   : > { %534 = vst.msk [vmem:[#allocation2 + $0x109] sm:$0xff] %vm485_vm1, %v529_v24 }
  0x53   : > { %535 = vst.msk [vmem:[#allocation2 + $0x111] sm:$0xff] %vm485_vm1, %v530_v25 }
  0x54 PF: > { %p3737_p0 = scmp.ne.s32.totalorder %s4154_s24, 1 }
  0x56   : > { %539 = sbr.rel (%p3737_p0) target bundleno = 96 (0x60), region = 64 }
  0x5b   : > { %v4174_v26 = vmov 0.0  }
  0x5c   : > { %541 = vst.msk [vmem:[#allocation2 + $0xf1] sm:$0xff] %vm485_vm1, %v4174_v26 }
  0x5d   : > { %542 = vst.msk [vmem:[#allocation2 + $0xf9] sm:$0xff] %vm485_vm1, %v4174_v26 }
  0x5e   : > { %543 = vst.msk [vmem:[#allocation2 + $0x109] sm:$0xff] %vm485_vm1, %v4174_v26 }
  0x5f   : > { %544 = vst.msk [vmem:[#allocation2 + $0x111] sm:$0xff] %vm485_vm1, %v4174_v26 }
  0x60 PF: > { %v3738_v27 = vld [vmem:[%s5746_s3 + $0x8] sm:$0xff]  ;;  %v565_v28 = vld [vmem:[%s5746_s3] sm:$0xff]  ;;  %v3779_v32 = vld [vmem:[%s5746_s3 + $0x10] sm:$0xff] }
  0x61   : > { %v566_v29 = vld [vmem:[#allocation2 + $0x1] sm:$0xff]  ;;  %663 = vmatpush.msra.mxu0 %v3738_v27  ;;  %4082 = vmatpush.msra.mxu3 %v3738_v27  ;;  %v4371_v30 = vld [vmem:[#allocation2 + $0xd9] sm:$0xff]  ;;  %v567_v34 = vld [vmem:[#allocation2 + $0x9] sm:$0xff] }
  0x62   : > { %v545_v31 = vld [vmem:[#allocation2] sm:$0xff]  ;;  %800 = vmatpush.msra.mxu1 %v565_v28  ;;  %3739 = vmatmul.msk.f32.vlgmr.msra.gmra.mxu0 %vm485_vm1, %v566_v29  ;;  %v4380_v33 = vld [vmem:[#allocation2 + $0x52] sm:$0xff]  ;;  %v546_v36 = vld [vmem:[#allocation2 + $0x8] sm:$0xff] }
  0x63   : > { %3757 = vmatmul.msk.f32.vlgmr.msra.gmra.mxu3 %vm485_vm1, %v4371_v30  ;;  %3759 = vmatmul.msk.f32.vlgmr.msra.gmra.mxu1 %vm485_vm1, %v545_v31  ;;  %v4384_v35 = vld [vmem:[#allocation2 + $0xe1] sm:$0xff]  ;;  %v4392_v38 = vld [vmem:[#allocation2 + $0x19] sm:$0xff]  ;;  %v4403_v41 = vld [vmem:[#allocation2 + $0x6a] sm:$0xff] }
  0x64   : > { %959 = vmatpush.msrb.mxu0 %v3779_v32  ;;  %4083 = vmatpush.msrb.mxu3 %v565_v28  ;;  %v4390_v37 = vld [vmem:[#allocation2 + $0x62] sm:$0xff]  ;;  %v547_v39 = vld [vmem:[#allocation2 + $0x18] sm:$0xff]  ;;  %v4422_v47 = vld [vmem:[#allocation2 + $0x30] sm:$0xff] }
  0x65   : > { %4084 = vmatpush.msra.mxu2 %v3779_v32  ;;  %v4396_v40 = vld [vmem:[#allocation2 + $0x98] sm:$0xff]  ;;  %v4405_v42 = vld [vmem:[#allocation2 + $0x21] sm:$0xff]  ;;  %v4424_v48 = vld [vmem:[#allocation2 + $0xb0] sm:$0xff] }
  0x66   : > { %3787 = vmatmul.msk.f32.vlgmr.msra.gmra.mxu2 %vm485_vm1, %v4380_v33  ;;  %v548_v43 = vld [vmem:[#allocation2 + $0x20] sm:$0xff]  ;;  %v4409_v44 = vld [vmem:[#allocation2 + $0xa8] sm:$0xff]  ;;  %v4418_v46 = vld [vmem:[#allocation2 + $0x31] sm:$0xff] }
  0x67   : > { %v4416_v45 = vld [vmem:[#allocation2 + $0x7a] sm:$0xff]  ;;  %v4435_v50 = vld [vmem:[#allocation2 + $0x82] sm:$0xff]  ;;  %v4451_v54 = vld [vmem:[#allocation2 + $0x92] sm:$0xff] }
  0x68   : > { %v3800_v49 = vld [vmem:[%s5746_s3 + $0x18] sm:$0xff]  ;;  %v4443_v53 = vld [vmem:[#allocation2 + $0xc0] sm:$0xff]  ;;  %v4453_v55 = vld [vmem:[#allocation2 + $0x49] sm:$0xff] }
  0x69   : > { %1139 = vmatpush.msra.mxu3 %v3800_v49  ;;  %v4437_v51 = vld [vmem:[#allocation2 + $0x39] sm:$0xff]  ;;  %v4457_v56 = vld [vmem:[#allocation2 + $0x48] sm:$0xff]  ;;  %v4469_v59 = vld [vmem:[#allocation2 + $0x51] sm:$0xff] }
  0x6a   : > { %3740 = vmatmul.msk.f32.gmra.mxu0 %vm485_vm1, %v567_v34  ;;  %v4441_v52 = vld [vmem:[#allocation2 + $0x38] sm:$0xff]  ;;  %v4459_v57 = vld [vmem:[#allocation2 + $0xc8] sm:$0xff]  ;;  %v4473_v60 = vld [vmem:[#allocation2 + $0x50] sm:$0xff] }
  0x6b   : > { %3758 = vmatmul.msk.f32.gmra.mxu3 %vm485_vm1, %v4384_v35  ;;  %3760 = vmatmul.msk.f32.gmra.mxu1 %vm485_vm1, %v546_v36  ;;  %v4467_v58 = vld [vmem:[#allocation2 + $0x9a] sm:$0xff]  ;;  %v4483_v62 = vld [vmem:[#allocation2 + $0xaa] sm:$0xff]  ;;  %v4499_v2 = vld [vmem:[#allocation2 + $0xb2] sm:$0xff] }
  0x6c   : > { %v4475_v61 = vld [vmem:[#allocation2 + $0xd8] sm:$0xff]  ;;  %v4485_v63 = vld [vmem:[#allocation2 + $0x61] sm:$0xff]  ;;  %v4501_v3 = vld [vmem:[#allocation2 + $0x69] sm:$0xff] }
  0x6d   : > { %v4489_v0 = vld [vmem:[#allocation2 + $0x60] sm:$0xff]  ;;  %v4505_v4 = vld [vmem:[#allocation2 + $0x68] sm:$0xff]  ;;  %v4518_v7 = vld [vmem:[#allocation2 + $0x78] sm:$0xff] }
  0x6e   : > { %3788 = vmatmul.msk.f32.gmra.mxu2 %vm485_vm1, %v4390_v37  ;;  %v4491_v1 = vld [vmem:[#allocation2 + $0xe0] sm:$0xff]  ;;  %v4525_v8 = vld [vmem:[#allocation2 + $0xca] sm:$0xff] }
  0x6f   : > { %v4512_v5 = vld [vmem:[#allocation2 + $0xc2] sm:$0xff]  ;;  %v4514_v6 = vld [vmem:[#allocation2 + $0x79] sm:$0xff]  ;;  %v4541_v12 = vld [vmem:[#allocation2 + $0x91] sm:$0xff] }
  0x70   : > { %v4527_v9 = vld [vmem:[#allocation2 + $0x81] sm:$0xff]  ;;  %v4545_v13 = vld [vmem:[#allocation2 + $0x90] sm:$0xff]  ;;  %v4555_v15 = vld [vmem:[#allocation2 + $0x99] sm:$0xff] }
  0x71   : > { %v4531_v10 = vld [vmem:[#allocation2 + $0x80] sm:$0xff]  ;;  %v4563_v16 = vld [vmem:[#allocation2 + $0xa9] sm:$0xff]  ;;  %v4572_v18 = vld [vmem:[#allocation2 + $0xb1] sm:$0xff] }
  0x72   : > { %3741 = vmatmul.msk.f32.gmra.mxu0 %vm485_vm1, %v4392_v38  ;;  %v4539_v11 = vld [vmem:[#allocation2 + $0xda] sm:$0xff]  ;;  %v4553_v14 = vld [vmem:[#allocation2 + $0xe2] sm:$0xff]  ;;  %v863_v32 = vld [vmem:[#allocation2 + $0xa] sm:$0xff] }
  0x73   : > { %3761 = vmatmul.msk.f32.gmra.mxu1 %vm485_vm1, %v547_v39  ;;  %3772 = vmatmul.msk.f32.vlgmr.msrb.gmra.mxu3 %vm485_vm1, %v4396_v40  ;;  %v3821_v17 = vld [vmem:[%s5746_s3 + $0x20] sm:$0xff]  ;;  %v4588_v23 = vld [vmem:[#allocation2 + $0xc9] sm:$0xff] }
  0x74   : > { %1318 = vmatpush.msra.mxu0 %v3821_v17  ;;  %v4580_v20 = vld [vmem:[#allocation2 + $0xc1] sm:$0xff]  ;;  %v3884_v17 = vld [vmem:[%s5746_s3 + $0x38] sm:$0xff] }
  0x75   : > { %v862_v27 = vld [vmem:[#allocation2 + $0x2] sm:$0xff]  ;;  %1855 = vmatpush.msrb.mxu3 %v3884_v17 }
  0x76   : > { %3789 = vmatmul.msk.f32.gmra.mxu2 %vm485_vm1, %v4403_v41  ;;  %v3905_v17 = vld [vmem:[%s5746_s3 + $0x40] sm:$0xff] }
  0x7a   : > { %3742 = vmatmul.msk.f32.gmra.mxu0 %vm485_vm1, %v4405_v42 }
  0x7b   : > { %3762 = vmatmul.msk.f32.gmra.mxu1 %vm485_vm1, %v548_v43  ;;  %3773 = vmatmul.msk.f32.gmra.mxu3 %vm485_vm1, %v4409_v44 }
  0x7e   : > { %3790 = vmatmul.msk.f32.gmra.mxu2 %vm485_vm1, %v4416_v45 }
  0x82   : > { %3743 = vmatmul.msk.f32.gmra.mxu0 %vm485_vm1, %v4418_v46 }
  0x83   : > { %3763 = vmatmul.msk.f32.gmra.mxu1 %vm485_vm1, %v4422_v47  ;;  %3774 = vmatmul.msk.f32.gmra.mxu3 %vm485_vm1, %v4424_v48 }
  0x86   : > { %3791 = vmatmul.msk.f32.gmra.mxu2 %vm485_vm1, %v4435_v50 }
  0x8a   : > { %3744 = vmatmul.msk.f32.gmra.mxu0 %vm485_vm1, %v4437_v51 }
  0x8b   : > { %3764 = vmatmul.msk.f32.gmra.mxu1 %vm485_vm1, %v4441_v52  ;;  %3775 = vmatmul.msk.f32.gmra.mxu3 %vm485_vm1, %v4443_v53 }
  0x8e   : > { %3792 = vmatmul.msk.f32.gmra.mxu2 %vm485_vm1, %v4451_v54 }
  0x92   : > { %3745 = vmatmul.msk.f32.gmra.mxu0 %vm485_vm1, %v4453_v55 }
  0x93   : > { %3765 = vmatmul.msk.f32.gmra.mxu1 %vm485_vm1, %v4457_v56  ;;  %3776 = vmatmul.msk.f32.gmra.mxu3 %vm485_vm1, %v4459_v57 }
  0x96   : > { %3793 = vmatmul.msk.f32.gmra.mxu2 %vm485_vm1, %v4467_v58 }
  0x9a   : > { %3746 = vmatmul.msk.f32.gmra.mxu0 %vm485_vm1, %v4469_v59 }
  0x9b   : > { %3766 = vmatmul.msk.f32.gmra.mxu1 %vm485_vm1, %v4473_v60  ;;  %3777 = vmatmul.msk.f32.gmra.mxu3 %vm485_vm1, %v4475_v61 }
  0x9e   : > { %3794 = vmatmul.msk.f32.gmra.mxu2 %vm485_vm1, %v4483_v62 }
  0xa2   : > { %3747 = vmatmul.msk.f32.gmra.mxu0 %vm485_vm1, %v4485_v63 }
  0xa3   : > { %3767 = vmatmul.msk.f32.gmra.mxu1 %vm485_vm1, %v4489_v0  ;;  %3778 = vmatmul.msk.f32.gmra.mxu3 %vm485_vm1, %v4491_v1 }
  0xa6   : > { %3795 = vmatmul.msk.f32.gmra.mxu2 %vm485_vm1, %v4499_v2 }
  0xaa   : > { %3748 = vmatmul.msk.f32.gmra.mxu0 %vm485_vm1, %v4501_v3 }
  0xab   : > { %3768 = vmatmul.msk.f32.gmra.mxu1 %vm485_vm1, %v4505_v4  ;;  %3801 = vmatmul.msk.f32.vlgmr.msra.gmra.mxu3 %vm485_vm1, %v547_v39 }
  0xae   : > { %3796 = vmatmul.msk.f32.gmra.mxu2 %vm485_vm1, %v4512_v5 }
  0xb2   : > { %3749 = vmatmul.msk.f32.gmra.mxu0 %vm485_vm1, %v4514_v6 }
  0xb3   : > { %3769 = vmatmul.msk.f32.gmra.mxu1 %vm485_vm1, %v4518_v7  ;;  %3802 = vmatmul.msk.f32.gmra.mxu3 %vm485_vm1, %v548_v43  ;;  %v864_v43 = vld [vmem:[#allocation2 + $0x1a] sm:$0xff] }
  0xb6   : > { %3797 = vmatmul.msk.f32.gmra.mxu2 %vm485_vm1, %v4525_v8 }
  0xba   : > { %3750 = vmatmul.msk.f32.gmra.mxu0 %vm485_vm1, %v4527_v9 }
  0xbb   : > { %3770 = vmatmul.msk.f32.gmra.mxu1 %vm485_vm1, %v4531_v10  ;;  %3803 = vmatmul.msk.f32.gmra.mxu3 %vm485_vm1, %v4422_v47 }
  0xbe   : > { %3798 = vmatmul.msk.f32.gmra.mxu2 %vm485_vm1, %v4539_v11 }
  0xc2   : > { %3751 = vmatmul.msk.f32.gmra.mxu0 %vm485_vm1, %v4541_v12 }
  0xc3   : > { %3771 = vmatmul.msk.f32.gmra.mxu1 %vm485_vm1, %v4545_v13  ;;  %3804 = vmatmul.msk.f32.gmra.mxu3 %vm485_vm1, %v4441_v52 }
  0xc6   : > { %3799 = vmatmul.msk.f32.gmra.mxu2 %vm485_vm1, %v4553_v14 }
  0xca   : > { %3752 = vmatmul.msk.f32.gmra.mxu0 %vm485_vm1, %v4555_v15 }
  0xcb   : > { %3805 = vmatmul.msk.f32.gmra.mxu3 %vm485_vm1, %v4457_v56 }
  0xd2   : > { %3753 = vmatmul.msk.f32.gmra.mxu0 %vm485_vm1, %v4563_v16 }
  0xd3   : > { %3806 = vmatmul.msk.f32.gmra.mxu3 %vm485_vm1, %v4473_v60 }
  0xda   : > { %3754 = vmatmul.msk.f32.gmra.mxu0 %vm485_vm1, %v4572_v18 }
  0xdb   : > { %3807 = vmatmul.msk.f32.gmra.mxu3 %vm485_vm1, %v4489_v0 }
  0xdf   : > { %v4578_v19 = vpop.f32.mrf.mxu0 }
  0xe2   : > { %3755 = vmatmul.msk.f32.gmra.mxu0 %vm485_vm1, %v4580_v20 }
  0xe3   : > { %3808 = vmatmul.msk.f32.gmra.mxu3 %vm485_vm1, %v4505_v4 }
  0xe6   : > { %v719_v21 = vpop.f32.mrf.mxu3 }
  0xe7   : > { %v4586_v22 = vpop.f32.mrf.mxu0 }
  0xe9   : > { %v4592_v24 = vpop.f32.mrf.mxu2 }
  0xea   : > { %3756 = vmatmul.msk.f32.gmra.mxu0 %vm485_vm1, %v4588_v23  ;;  %5751 = vst [vmem:[#allocation3_spill] sm:$0xff] %v4592_v24  ;;  %v4651_v24 = vld [vmem:[#allocation2 + $0x32] sm:$0xff] }
  0xeb   : > { %3809 = vmatmul.msk.f32.gmra.mxu3 %vm485_vm1, %v4518_v7 }
  0xee   : > { %v4596_v25 = vpop.f32.mrf.mxu3 }
  0xef   : > { %v4598_v26 = vpop.f32.mrf.mxu0 }
  0xf0   : > { %5752 = vst [vmem:[#allocation4_spill] sm:$0xff] %v4598_v26 }
  0xf1   : > { %v4601_v28 = vpop.f32.mrf.mxu2 }
  0xf2   : > { %3780 = vmatmul.msk.f32.vlgmr.msrb.gmra.mxu0 %vm485_vm1, %v862_v27  ;;  %5753 = vst [vmem:[#allocation5_spill] sm:$0xff] %v4601_v28 }
  0xf3   : > { %3810 = vmatmul.msk.f32.gmra.mxu3 %vm485_vm1, %v4531_v10  ;;  %2034 = vmatpush.msrb.mxu0 %v3905_v17  ;;  %v4668_v17 = vld [vmem:[#allocation2 + $0x3a] sm:$0xff] }
  0xf6   : > { %v4605_v29 = vpop.f32.mrf.mxu3 }
  0xf7   : > { %5754 = vst [vmem:[#allocation6_spill] sm:$0xff] %v4605_v29  ;;  %v4607_v31 = vpop.f32.mrf.mxu0  ;;  %v3863_v29 = vld [vmem:[%s5746_s3 + $0x30] sm:$0xff] }
  0xf8   : > { %5755 = vst [vmem:[#allocation7_spill] sm:$0xff] %v4607_v31  ;;  %1676 = vmatpush.msrb.mxu2 %v3863_v29  ;;  %v4684_v31 = vld [vmem:[#allocation2 + $0x4a] sm:$0xff] }
  0xf9   : > { %v4610_v34 = vpop.f32.mrf.mxu2  ;;  %3864 = vmatmul.msk.f32.vlgmr.msrb.gmra.mxu2 %vm485_vm1, %v4422_v47 }
  0xfa   : > { %3781 = vmatmul.msk.f32.gmra.mxu0 %vm485_vm1, %v863_v32 }
  0xfb   : > { %3811 = vmatmul.msk.f32.gmra.mxu3 %vm485_vm1, %v4545_v13 }
  0xfe   : > { %v4614_v36 = vpop.f32.mrf.mxu3 }
  0xff   : > { %5756 = vst [vmem:[#allocation8_spill] sm:$0xff] %v4614_v36  ;;  %v4616_v39 = vpop.f32.mrf.mxu0  ;;  %v865_v36 = vld [vmem:[#allocation2 + $0x22] sm:$0xff] }
 0x100   : > { %5757 = vst [vmem:[#allocation9_spill] sm:$0xff] %v4616_v39 }
 0x101   : > { %v4619_v49 = vpop.f32.mrf.mxu2  ;;  %3865 = vmatmul.msk.f32.gmra.mxu2 %vm485_vm1, %v4441_v52 }
 0x102   : > { %3782 = vmatmul.msk.f32.gmra.mxu0 %vm485_vm1, %v864_v43 }
 0x103   : > { %3812 = vmatmul.msk.f32.gmra.mxu3 %vm485_vm1, %v4396_v40 }
 0x106   : > { %v4626_v27 = vpop.f32.mrf.mxu3 }
 0x107   : > { %5758 = vst [vmem:[#allocation10_spill] sm:$0xff] %v4626_v27  ;;  %v4628_v32 = vpop.f32.mrf.mxu0  ;;  %v3842_v27 = vld [vmem:[%s5746_s3 + $0x28] sm:$0xff] }
 0x108   : > { %5759 = vst [vmem:[#allocation11_spill] sm:$0xff] %v4628_v32  ;;  %1497 = vmatpush.msrb.mxu1 %v3842_v27  ;;  %v4653_v32 = vpop.f32.mrf.mxu1 }
 0x109   : > { %v4636_v28 = vpop.f32.mrf.mxu2  ;;  %3843 = vmatmul.msk.f32.vlgmr.msrb.gmra.mxu1 %vm485_vm1, %v864_v43  ;;  %3866 = vmatmul.msk.f32.gmra.mxu2 %vm485_vm1, %v4457_v56 }
 0x10a   : > { %3783 = vmatmul.msk.f32.gmra.mxu0 %vm485_vm1, %v865_v36 }
 0x10b   : > { %3813 = vmatmul.msk.f32.gmra.mxu3 %vm485_vm1, %v4409_v44 }
 0x10e   : > { %v4647_v47 = vpop.f32.mrf.mxu3 }
 0x10f   : > { %v4649_v29 = vpop.f32.mrf.mxu0 }
 0x110   : > { %5760 = vst [vmem:[#allocation12_spill] sm:$0xff] %v4649_v29  ;;  %v4672_v52 = vpop.f32.mrf.mxu1 }
 0x111   : > { %v4659_v39 = vpop.f32.mrf.mxu2  ;;  %3844 = vmatmul.msk.f32.gmra.mxu1 %vm485_vm1, %v865_v36  ;;  %5763 = vst [vmem:[#allocation15_spill] sm:$0xff] %v4672_v52  ;;  %3867 = vmatmul.msk.f32.gmra.mxu2 %vm485_vm1, %v4473_v60 }
 0x112   : > { %3784 = vmatmul.msk.f32.gmra.mxu0 %vm485_vm1, %v4651_v24  ;;  %5761 = vst [vmem:[#allocation13_spill] sm:$0xff] %v4659_v39 }
 0x113   : > { %3814 = vmatmul.msk.f32.gmra.mxu3 %vm485_vm1, %v4424_v48 }
 0x116   : > { %v4664_v43 = vpop.f32.mrf.mxu3 }
 0x117   : > { %v4666_v27 = vpop.f32.mrf.mxu0 }
 0x118   : > { %5762 = vst [vmem:[#allocation14_spill] sm:$0xff] %v4666_v27 }
 0x119   : > { %v4676_v39 = vpop.f32.mrf.mxu2  ;;  %3845 = vmatmul.msk.f32.gmra.mxu1 %vm485_vm1, %v4651_v24  ;;  %3868 = vmatmul.msk.f32.gmra.mxu2 %vm485_vm1, %v4489_v0 }
 0x11a   : > { %3785 = vmatmul.msk.f32.gmra.mxu0 %vm485_vm1, %v4668_v17  ;;  %5764 = vst [vmem:[#allocation16_spill] sm:$0xff] %v4676_v39  ;;  %v4694_v39 = vpop.f32.mrf.mxu1 }
 0x11b   : > { %3815 = vmatmul.msk.f32.gmra.mxu3 %vm485_vm1, %v4443_v53  ;;  %5767 = vst [vmem:[#allocation19_spill] sm:$0xff] %v4694_v39  ;;  %v4735_v39 = vld [vmem:[#allocation2 + $0xf0] sm:$0xff] }
 0x11e   : > { %v856_v36 = vpop.f32.mrf.mxu3 }
 0x11f   : > { %v857_v27 = vadd.f32 %v856_v36, %v719_v21  ;;  %v4682_v29 = vpop.f32.mrf.mxu0 }
 0x120   : > { %5765 = vst [vmem:[#allocation17_spill] sm:$0xff] %v4682_v29 }
 0x121   : > { %v4690_v56 = vpop.f32.mrf.mxu2  ;;  %3846 = vmatmul.msk.f32.gmra.mxu1 %vm485_vm1, %v4668_v17  ;;  %3869 = vmatmul.msk.f32.gmra.mxu2 %vm485_vm1, %v4505_v4 }
 0x122   : > { %3786 = vmatmul.msk.f32.gmra.mxu0 %vm485_vm1, %v4684_v31  ;;  %5766 = vst [vmem:[#allocation18_spill] sm:$0xff] %v4690_v56  ;;  %v4713_v56 = vpop.f32.mrf.mxu1 }
 0x123   : > { %3816 = vmatmul.msk.f32.gmra.mxu3 %vm485_vm1, %v4459_v57  ;;  %5769 = vst [vmem:[#allocation21_spill] sm:$0xff] %v4713_v56 }
 0x126   : > { %v859_v21 = vpop.f32.mrf.mxu3 }
 0x127   : > { %v4699_v36 = vadd.f32 %v859_v21, %v4596_v25  ;;  %v4701_v29 = vpop.f32.mrf.mxu0 }
 0x129   : > { %v4707_v60 = vpop.f32.mrf.mxu2  ;;  %3847 = vmatmul.msk.f32.gmra.mxu1 %vm485_vm1, %v4684_v31  ;;  %3870 = vmatmul.msk.f32.gmra.mxu2 %vm485_vm1, %v4518_v7 }
 0x12a   : > { %3822 = vmatmul.msk.f32.vlgmr.msra.gmra.mxu0 %vm485_vm1, %v4392_v38  ;;  %5768 = vst [vmem:[#allocation20_spill] sm:$0xff] %v4707_v60  ;;  %v4733_v56 = vpop.f32.mrf.mxu1 }
 0x12b   : > { %3817 = vmatmul.msk.f32.gmra.mxu3 %vm485_vm1, %v4475_v61  ;;  %5771 = vst [vmem:[#allocation23_spill] sm:$0xff] %v4733_v56  ;;  %v4751_v56 = vld [vmem:[#allocation2 + $0xf8] sm:$0xff] }
 0x12e   : > { %v4715_v25 = vpop.f32.mrf.mxu3 }
 0x12f   : > { %v4717_v21 = vpop.f32.mrf.mxu0 }
 0x131   : > { %v4723_v38 = vpop.f32.mrf.mxu2  ;;  %3848 = vmatmul.msk.f32.gmra.mxu1 %vm485_vm1, %v4380_v33  ;;  %3871 = vmatmul.msk.f32.gmra.mxu2 %vm485_vm1, %v4531_v10 }
 0x132   : > { %3823 = vmatmul.msk.f32.gmra.mxu0 %vm485_vm1, %v4405_v42  ;;  %v4755_v7 = vpop.f32.mrf.mxu1 }
 0x133   : > { %3818 = vmatmul.msk.f32.gmra.mxu3 %vm485_vm1, %v4491_v1 }
 0x136   : > { %v4729_v0 = vpop.f32.mrf.mxu3 }
 0x137   : > { %5770 = vst [vmem:[#allocation22_spill] sm:$0xff] %v4729_v0  ;;  %v4731_v60 = vpop.f32.mrf.mxu0 }
 0x139   : > { %v4741_v42 = vpop.f32.mrf.mxu2  ;;  %3849 = vmatmul.msk.f32.gmra.mxu1 %vm485_vm1, %v4390_v37  ;;  %3872 = vmatmul.msk.f32.gmra.mxu2 %vm485_vm1, %v4545_v13 }
 0x13a   : > { %3824 = vmatmul.msk.f32.gmra.mxu0 %vm485_vm1, %v4418_v46  ;;  %v4775_v10 = vpop.f32.mrf.mxu1 }
 0x13b   : > { %3819 = vmatmul.msk.f32.gmra.mxu3 %vm485_vm1, %v4735_v39 }
 0x13e   : > { %v4747_v4 = vpop.f32.mrf.mxu3 }
 0x13f   : > { %5772 = vst [vmem:[#allocation24_spill] sm:$0xff] %v4747_v4  ;;  %v4749_v26 = vpop.f32.mrf.mxu0 }
 0x140   : > { %5773 = vst [vmem:[#allocation25_spill] sm:$0xff] %v4749_v26 }
 0x141   : > { %v1015_v0 = vpop.f32.mrf.mxu2  ;;  %3850 = vmatmul.msk.f32.gmra.mxu1 %vm485_vm1, %v4403_v41  ;;  %3873 = vmatmul.msk.f32.gmra.mxu2 %vm485_vm1, %v4396_v40 }
 0x142   : > { %3825 = vmatmul.msk.f32.gmra.mxu0 %vm485_vm1, %v4437_v51  ;;  %v4761_v52 = vadd.f32 %v1015_v0, %v857_v27 }
 0x143   : > { %3820 = vmatmul.msk.f32.gmra.mxu3 %vm485_vm1, %v4751_v56 }
 0x146   : > { %v4765_v26 = vpop.f32.mrf.mxu3 }
 0x147   : > { %v4767_v4 = vpop.f32.mrf.mxu0 }
 0x148   : > { %5774 = vst [vmem:[#allocation26_spill] sm:$0xff] %v4767_v4 }
 0x149   : > { %3851 = vmatmul.msk.f32.gmra.mxu1 %vm485_vm1, %v4416_v45  ;;  %3874 = vmatmul.msk.f32.gmra.mxu2 %vm485_vm1, %v4409_v44 }
 0x14a   : > { %3826 = vmatmul.msk.f32.gmra.mxu0 %vm485_vm1, %v4453_v55 }
 0x14b   : > { %3885 = vmatmul.msk.f32.vlgmr.msrb.gmra.mxu3 %vm485_vm1, %v4418_v46  ;;  %v4791_v46 = vpop.f32.mrf.mxu1 }
 0x14c   : > { %5776 = vst [vmem:[#allocation28_spill] sm:$0xff] %v4791_v46 }
 0x14e   : > { %v4779_v27 = vpop.f32.mrf.mxu3 }
 0x14f   : > { %v4781_v0 = vpop.f32.mrf.mxu0 }
 0x150   : > { %5775 = vst [vmem:[#allocation27_spill] sm:$0xff] %v4781_v0 }
 0x151   : > { %3852 = vmatmul.msk.f32.gmra.mxu1 %vm485_vm1, %v4435_v50  ;;  %3875 = vmatmul.msk.f32.gmra.mxu2 %vm485_vm1, %v4424_v48 }
 0x152   : > { %3827 = vmatmul.msk.f32.gmra.mxu0 %vm485_vm1, %v4469_v59 }
 0x153   : > { %3886 = vmatmul.msk.f32.gmra.mxu3 %vm485_vm1, %v4437_v51  ;;  %v4809_v0 = vpop.f32.mrf.mxu1 }
 0x154   : > { %5778 = vst [vmem:[#allocation30_spill] sm:$0xff] %v4809_v0 }
 0x156   : > { %v4793_v13 = vpop.f32.mrf.mxu3 }
 0x157   : > { %v4795_v4 = vpop.f32.mrf.mxu0 }
 0x158   : > { %5777 = vst [vmem:[#allocation29_spill] sm:$0xff] %v4795_v4 }
 0x159   : > { %3853 = vmatmul.msk.f32.gmra.mxu1 %vm485_vm1, %v4451_v54  ;;  %3876 = vmatmul.msk.f32.gmra.mxu2 %vm485_vm1, %v4443_v53 }
 0x15a   : > { %3828 = vmatmul.msk.f32.gmra.mxu0 %vm485_vm1, %v4485_v63 }
 0x15b   : > { %3887 = vmatmul.msk.f32.gmra.mxu3 %vm485_vm1, %v4453_v55  ;;  %v829_v4 = vpop.f32.mrf.mxu1 }
 0x15c   : > { %v830_v0 = vadd.f32 %v829_v4, %v4701_v29 }
 0x15e   : > { %v4805_v40 = vpop.f32.mrf.mxu3 }
 0x15f   : > { %v4807_v51 = vpop.f32.mrf.mxu0 }
 0x161   : > { %3854 = vmatmul.msk.f32.gmra.mxu1 %vm485_vm1, %v4467_v58  ;;  %3877 = vmatmul.msk.f32.gmra.mxu2 %vm485_vm1, %v4459_v57 }
 0x162   : > { %3829 = vmatmul.msk.f32.gmra.mxu0 %vm485_vm1, %v4501_v3 }
 0x163   : > { %3888 = vmatmul.msk.f32.gmra.mxu3 %vm485_vm1, %v4469_v59  ;;  %v832_v53 = vpop.f32.mrf.mxu1 }
 0x164   : > { %v833_v29 = vadd.f32 %v832_v53, %v4717_v21 }
 0x166   : > { %v4819_v44 = vpop.f32.mrf.mxu3  ;;  %v1031_v57 = vadd.f32 %v4619_v49, %v833_v29 }
 0x167   : > { %5779 = vst [vmem:[#allocation31_spill] sm:$0xff] %v4819_v44  ;;  %v4821_v55 = vpop.f32.mrf.mxu0 }
 0x168   : > { %v854_v29 = vadd.f32 %v4664_v43, %v4821_v55 }
 0x169   : > { %3855 = vmatmul.msk.f32.gmra.mxu1 %vm485_vm1, %v4483_v62  ;;  %3878 = vmatmul.msk.f32.gmra.mxu2 %vm485_vm1, %v4475_v61 }
 0x16a   : > { %3830 = vmatmul.msk.f32.gmra.mxu0 %vm485_vm1, %v4514_v6 }
 0x16b   : > { %3889 = vmatmul.msk.f32.gmra.mxu3 %vm485_vm1, %v4485_v63  ;;  %v1030_v63 = vadd.f32 %v4610_v34, %v830_v0  ;;  %v851_v0 = vadd.f32 %v4647_v47, %v4807_v51  ;;  %v1038_v47 = vadd.f32 %v4741_v42, %v854_v29  ;;  %v1948_v29 = vld [vmem:[#allocation2 + $0xb2] sm:$0xff] }
 0x16e   : > { %v4831_v48 = vpop.f32.mrf.mxu3 }
 0x16f   : > { %5780 = vst [vmem:[#allocation32_spill] sm:$0xff] %v4831_v48  ;;  %v4833_v59 = vpop.f32.mrf.mxu0 }
 0x171   : > { %3856 = vmatmul.msk.f32.gmra.mxu1 %vm485_vm1, %v4499_v2  ;;  %v835_v2 = vpop.f32.mrf.mxu1  ;;  %3879 = vmatmul.msk.f32.gmra.mxu2 %vm485_vm1, %v4491_v1 }
 0x172   : > { %3831 = vmatmul.msk.f32.gmra.mxu0 %vm485_vm1, %v4527_v9  ;;  %v836_v21 = vadd.f32 %v835_v2, %v4731_v60 }
 0x173   : > { %3890 = vmatmul.msk.f32.gmra.mxu3 %vm485_vm1, %v4501_v3 }
 0x174   : > { %v1032_v61 = vadd.f32 %v4636_v28, %v836_v21  ;;  %v4906_v28 = vld [vmem:[#allocation2 + $0xf2] sm:$0xff] }
 0x176   : > { %v1168_v48 = vpop.f32.mrf.mxu3 }
 0x177   : > { %v4845_v44 = vadd.f32 %v1168_v48, %v1030_v63  ;;  %v4847_v46 = vpop.f32.mrf.mxu0 }
 0x179   : > { %3857 = vmatmul.msk.f32.gmra.mxu1 %vm485_vm1, %v4512_v5  ;;  %3880 = vmatmul.msk.f32.gmra.mxu2 %vm485_vm1, %v4735_v39  ;;  %v1598_v39 = vld [vmem:[#allocation2 + $0x110] sm:$0xff] }
 0x17a   : > { %3832 = vmatmul.msk.f32.gmra.mxu0 %vm485_vm1, %v4541_v12 }
 0x17b   : > { %3891 = vmatmul.msk.f32.gmra.mxu3 %vm485_vm1, %v4514_v6 }
 0x17e   : > { %v1171_v3 = vpop.f32.mrf.mxu3 }
 0x17f   : > { %v4859_v34 = vadd.f32 %v1171_v3, %v1031_v57  ;;  %v4861_v4 = vpop.f32.mrf.mxu0  ;;  %v1240_v3 = vld [vmem:[#allocation2 + $0xf9] sm:$0xff] }
 0x181   : > { %3858 = vmatmul.msk.f32.gmra.mxu1 %vm485_vm1, %v4525_v8  ;;  %3881 = vmatmul.msk.f32.gmra.mxu2 %vm485_vm1, %v4751_v56  ;;  %v4919_v56 = vld [vmem:[#allocation2 + $0xfa] sm:$0xff] }
 0x182   : > { %3833 = vmatmul.msk.f32.gmra.mxu0 %vm485_vm1, %v4555_v15 }
 0x183   : > { %3892 = vmatmul.msk.f32.gmra.mxu3 %vm485_vm1, %v4527_v9 }
 0x186   : > { %v1174_v5 = vpop.f32.mrf.mxu3 }
 0x187   : > { %v4873_v6 = vadd.f32 %v1174_v5, %v1032_v61  ;;  %v4875_v49 = vpop.f32.mrf.mxu0 }
 0x189   : > { %3859 = vmatmul.msk.f32.gmra.mxu1 %vm485_vm1, %v4539_v11  ;;  %v1597_v11 = vld [vmem:[#allocation2 + $0x108] sm:$0xff] }
 0x18a   : > { %3834 = vmatmul.msk.f32.gmra.mxu0 %vm485_vm1, %v4563_v16  ;;  %3882 = vmatmul.msk.f32.gmra.mxu2 %vm485_vm1, %v1597_v11 }
 0x18b   : > { %3893 = vmatmul.msk.f32.gmra.mxu3 %vm485_vm1, %v4541_v12 }
 0x18e   : > { %v4885_v1 = vpop.f32.mrf.mxu3 }
 0x18f   : > { %v4887_v8 = vpop.f32.mrf.mxu0 }
 0x191   : > { %3860 = vmatmul.msk.f32.gmra.mxu1 %vm485_vm1, %v4553_v14 }
 0x192   : > { %3835 = vmatmul.msk.f32.gmra.mxu0 %vm485_vm1, %v4572_v18  ;;  %3883 = vmatmul.msk.f32.gmra.mxu2 %vm485_vm1, %v1598_v39 }
 0x193   : > { %3894 = vmatmul.msk.f32.gmra.mxu3 %vm485_vm1, %v4555_v15 }
 0x196   : > { %v4897_v9 = vpop.f32.mrf.mxu3 }
 0x197   : > { %v4899_v12 = vpop.f32.mrf.mxu0 }
 0x199   : > { %3861 = vmatmul.msk.f32.gmra.mxu1 %vm485_vm1, %v4906_v28 }
 0x19a   : > { %3836 = vmatmul.msk.f32.gmra.mxu0 %vm485_vm1, %v4580_v20 }
 0x19b   : > { %3895 = vmatmul.msk.f32.gmra.mxu3 %vm485_vm1, %v4563_v16 }
 0x19e   : > { %v4910_v15 = vpop.f32.mrf.mxu3 }
 0x19f   : > { %v4912_v14 = vpop.f32.mrf.mxu0 }
 0x1a1   : > { %3862 = vmatmul.msk.f32.gmra.mxu1 %vm485_vm1, %v4919_v56 }
 0x1a2   : > { %3837 = vmatmul.msk.f32.gmra.mxu0 %vm485_vm1, %v4588_v23 }
 0x1a3   : > { %3896 = vmatmul.msk.f32.gmra.mxu3 %vm485_vm1, %v4572_v18  ;;  %v1037_v18 = vadd.f32 %v4723_v38, %v851_v0  ;;  %v1239_v38 = vld [vmem:[#allocation2 + $0xf1] sm:$0xff] }
 0x1a6   : > { %v4923_v16 = vpop.f32.mrf.mxu3 }
 0x1a7   : > { %5781 = vst [vmem:[#allocation33_spill] sm:$0xff] %v4923_v16  ;;  %v4925_v60 = vpop.f32.mrf.mxu0 }
 0x1aa   : > { %3838 = vmatmul.msk.f32.gmra.mxu0 %vm485_vm1, %v4371_v30 }
 0x1ab   : > { %3897 = vmatmul.msk.f32.gmra.mxu3 %vm485_vm1, %v4580_v20 }
 0x1ae   : > { %v1189_v48 = vpop.f32.mrf.mxu3 }
 0x1af   : > { %v1217_v53 = vadd.f32 %v1189_v48, %v1037_v18  ;;  %v4934_v63 = vpop.f32.mrf.mxu0 }
 0x1b2   : > { %3839 = vmatmul.msk.f32.gmra.mxu0 %vm485_vm1, %v4384_v35 }
 0x1b3   : > { %3898 = vmatmul.msk.f32.gmra.mxu3 %vm485_vm1, %v4588_v23  ;;  %v1018_v23 = vpop.f32.mrf.mxu2 }
 0x1b4   : > { %v1040_v42 = vadd.f32 %v1018_v23, %v4699_v36 }
 0x1b6   : > { %v1192_v51 = vpop.f32.mrf.mxu3 }
 0x1b7   : > { %v1218_v57 = vadd.f32 %v1192_v51, %v1038_v47  ;;  %v4943_v20 = vpop.f32.mrf.mxu0 }
 0x1ba   : > { %3840 = vmatmul.msk.f32.gmra.mxu0 %vm485_vm1, %v1239_v38 }
 0x1bb   : > { %3899 = vmatmul.msk.f32.gmra.mxu3 %vm485_vm1, %v4371_v30 }
 0x1be   : > { %v1195_v2 = vpop.f32.mrf.mxu3 }
 0x1bf   : > { %v4949_v43 = vadd.f32 %v1195_v2, %v4761_v52  ;;  %v4951_v55 = vpop.f32.mrf.mxu0  ;;  %v1776_v52 = vld [vmem:[#allocation2 + $0x109] sm:$0xff] }
 0x1c0   : > { %v1949_v2 = vld [vmem:[#allocation2 + $0xc2] sm:$0xff] }
 0x1c2   : > { %3841 = vmatmul.msk.f32.gmra.mxu0 %vm485_vm1, %v1240_v3 }
 0x1c3   : > { %3900 = vmatmul.msk.f32.gmra.mxu3 %vm485_vm1, %v4384_v35 }
 0x1c6   : > { %v1198_v21 = vpop.f32.mrf.mxu3 }
 0x1c7   : > { %v4957_v61 = vadd.f32 %v1198_v21, %v1040_v42  ;;  %v4959_v5 = vpop.f32.mrf.mxu0 }
 0x1ca   : > { %3906 = vmatmul.msk.f32.vlgmr.msrb.gmra.mxu0 %vm485_vm1, %v4651_v24  ;;  %v1777_v24 = vld [vmem:[#allocation2 + $0x111] sm:$0xff] }
 0x1cb   : > { %3901 = vmatmul.msk.f32.gmra.mxu3 %vm485_vm1, %v1239_v38 }
 0x1cf   : > { %v4964_v30 = vpop.f32.mrf.mxu0 }
 0x1d2   : > { %3907 = vmatmul.msk.f32.gmra.mxu0 %vm485_vm1, %v4668_v17 }
 0x1d3   : > { %3902 = vmatmul.msk.f32.gmra.mxu3 %vm485_vm1, %v1240_v3 }
 0x1d7   : > { %v4969_v35 = vpop.f32.mrf.mxu0 }
 0x1da   : > { %3908 = vmatmul.msk.f32.gmra.mxu0 %vm485_vm1, %v4684_v31 }
 0x1db   : > { %3903 = vmatmul.msk.f32.gmra.mxu3 %vm485_vm1, %v1776_v52 }
 0x1df   : > { %v4974_v36 = vpop.f32.mrf.mxu0 }
 0x1e2   : > { %3909 = vmatmul.msk.f32.gmra.mxu0 %vm485_vm1, %v4380_v33 }
 0x1e3   : > { %3904 = vmatmul.msk.f32.gmra.mxu3 %vm485_vm1, %v1777_v24  ;;  %v803_v24 = vadd.f32 %v4653_v32, %v4578_v19 }
 0x1e7   : > { %v4979_v11 = vpop.f32.mrf.mxu0 }
 0x1ea   : > { %3910 = vmatmul.msk.f32.gmra.mxu0 %vm485_vm1, %v4390_v37  ;;  %v4999_v37 = vpop.f32.mrf.mxu1 }
 0x1ef   : > { %v4983_v17 = vpop.f32.mrf.mxu0 }
 0x1f2   : > { %3911 = vmatmul.msk.f32.gmra.mxu0 %vm485_vm1, %v4403_v41  ;;  %v1499_v41 = vpop.f32.mrf.mxu1 }
 0x1f7   : > { %v4987_v31 = vpop.f32.mrf.mxu0 }
 0x1fa   : > { %3912 = vmatmul.msk.f32.gmra.mxu0 %vm485_vm1, %v4416_v45  ;;  %v1678_v45 = vpop.f32.mrf.mxu2  ;;  %v1502_v47 = vpop.f32.mrf.mxu1 }
 0x1ff   : > { %v4991_v39 = vpop.f32.mrf.mxu0 }
 0x202   : > { %3913 = vmatmul.msk.f32.gmra.mxu0 %vm485_vm1, %v4435_v50  ;;  %v1857_v50 = vpop.f32.mrf.mxu3 }
 0x207   : > { %v4995_v33 = vpop.f32.mrf.mxu0 }
 0x20a   : > { %3914 = vmatmul.msk.f32.gmra.mxu0 %vm485_vm1, %v4451_v54  ;;  %v1681_v54 = vpop.f32.mrf.mxu2  ;;  %v1860_v51 = vpop.f32.mrf.mxu3 }
 0x20f   : > { %v5001_v0 = vpop.f32.mrf.mxu0 }
 0x212   : > { %3915 = vmatmul.msk.f32.gmra.mxu0 %vm485_vm1, %v4467_v58  ;;  %v1505_v58 = vpop.f32.mrf.mxu1  ;;  %v1684_v23 = vpop.f32.mrf.mxu2 }
 0x213   : > { %v1863_v52 = vpop.f32.mrf.mxu3 }
 0x217   : > { %v5005_v18 = vpop.f32.mrf.mxu0 }
 0x21a   : > { %3916 = vmatmul.msk.f32.gmra.mxu0 %vm485_vm1, %v4483_v62  ;;  %v1950_v62 = vld [vmem:[#allocation2 + $0xca] sm:$0xff] }
 0x21f   : > { %v5009_v48 = vpop.f32.mrf.mxu0 }
 0x220   : > { %5782 = vst [vmem:[#allocation34_spill] sm:$0xff] %v5009_v48  ;;  %v1021_v48 = vadd.f32 %v4833_v59, %v803_v24 }
 0x222   : > { %3917 = vmatmul.msk.f32.gmra.mxu0 %vm485_vm1, %v1948_v29  ;;  %v1508_v29 = vpop.f32.mrf.mxu1 }
 0x227   : > { %v1368_v38 = vpop.f32.mrf.mxu0 }
 0x228   : > { %v5012_v3 = vadd.f32 %v1368_v38, %v1217_v53  ;;  %v1951_v53 = vld [vmem:[#allocation2 + $0xda] sm:$0xff] }
 0x22a   : > { %5783 = vst [vmem:[#allocation35_spill] sm:$0xff] %v5012_v3  ;;  %3918 = vmatmul.msk.f32.gmra.mxu0 %vm485_vm1, %v1949_v2  ;;  %v1687_v2 = vpop.f32.mrf.mxu2  ;;  %v1201_v3 = vadd.f32 %v4715_v25, %v1021_v48  ;;  %v5032_v59 = vpop.f32.mrf.mxu1  ;;  %v5788_v25 = vld [vmem:[#allocation22_spill] sm:$0xff] }
 0x22c   : > { %v1380_v19 = vadd.f32 %v4925_v60, %v1201_v3 }
 0x22f   : > { %v1371_v42 = vpop.f32.mrf.mxu0 }
 0x230   : > { %v5015_v21 = vadd.f32 %v1371_v42, %v1218_v57  ;;  %v5026_v57 = vpop.f32.mrf.mxu3  ;;  %v5786_v42 = vld [vmem:[#allocation15_spill] sm:$0xff] }
 0x232   : > { %5784 = vst [vmem:[#allocation36_spill] sm:$0xff] %v5015_v21  ;;  %3919 = vmatmul.msk.f32.gmra.mxu0 %vm485_vm1, %v1950_v62  ;;  %v806_v62 = vadd.f32 %v5786_v42, %v4586_v22  ;;  %v1952_v21 = vld [vmem:[#allocation2 + $0xe2] sm:$0xff] }
 0x233   : > { %v5790_v22 = vld [vmem:[#allocation19_spill] sm:$0xff] }
 0x234   : > { %v1022_v32 = vadd.f32 %v4847_v46, %v806_v62 }
 0x236   : > { %v1202_v48 = vadd.f32 %v5788_v25, %v1022_v32  ;;  %v5791_v25 = vld [vmem:[#allocation24_spill] sm:$0xff] }
 0x237   : > { %v1374_v16 = vpop.f32.mrf.mxu0 }
 0x238   : > { %v5022_v38 = vadd.f32 %v1374_v16, %v4949_v43  ;;  %v1559_v16 = vadd.f32 %v1499_v41, %v1380_v19  ;;  %v1381_v46 = vadd.f32 %v4934_v63, %v1202_v48  ;;  %v5044_v3 = vpop.f32.mrf.mxu3  ;;  %v5792_v63 = vld [vmem:[#allocation7_spill] sm:$0xff] }
 0x23a   : > { %5785 = vst [vmem:[#allocation37_spill] sm:$0xff] %v5022_v38  ;;  %3920 = vmatmul.msk.f32.gmra.mxu0 %vm485_vm1, %v1951_v53  ;;  %v5039_v53 = vpop.f32.mrf.mxu2  ;;  %v5789_v38 = vld [vmem:[#allocation4_spill] sm:$0xff]  ;;  %v1738_v60 = vadd.f32 %v1678_v45, %v1559_v16 }
 0x23b   : > { %v809_v42 = vadd.f32 %v5790_v22, %v5789_v38  ;;  %v5793_v38 = vld [vmem:[#allocation21_spill] sm:$0xff] }
 0x23c   : > { %v1917_v41 = vadd.f32 %v1857_v50, %v1738_v60 }
 0x23d   : > { %v1023_v62 = vadd.f32 %v4861_v4, %v809_v42  ;;  %v812_v4 = vadd.f32 %v5793_v38, %v5792_v63  ;;  %v1955_v63 = vld [vmem:[#allocation2 + $0x10a] sm:$0xff] }
 0x23f   : > { %v1377_v24 = vpop.f32.mrf.mxu0  ;;  %v1024_v42 = vadd.f32 %v4875_v49, %v812_v4 }
 0x240   : > { %v5035_v43 = vadd.f32 %v1377_v24, %v4957_v61  ;;  %v5050_v61 = vld [vmem:[%s5747_s4] ss:$0 sm:$0xff]  ;;  %v1514_v24 = vpop.f32.mrf.mxu1  ;;  %v1872_v60 = vpop.f32.mrf.mxu3 }
 0x242   : > { %5787 = vst [vmem:[#allocation15_spill] sm:$0xff] %v5035_v43  ;;  %3921 = vmatmul.msk.f32.gmra.mxu0 %vm485_vm1, %v1952_v21  ;;  %v1560_v21 = vadd.f32 %v1502_v47, %v1381_v46  ;;  %v1203_v43 = vadd.f32 %v5791_v25, %v1023_v62  ;;  %v1693_v22 = vpop.f32.mrf.mxu2 }
 0x244   : > { %v1739_v50 = vadd.f32 %v1681_v54, %v1560_v21  ;;  %v1382_v16 = vadd.f32 %v4943_v20, %v1203_v43  ;;  %v5794_v20 = vld [vmem:[#allocation9_spill] sm:$0xff]  ;;  %v5795_v43 = vld [vmem:[#allocation23_spill] sm:$0xff] }
 0x245   : > { %v815_v21 = vadd.f32 %v5795_v43, %v5794_v20 }
 0x246   : > { %v1918_v47 = vadd.f32 %v1860_v51, %v1739_v50  ;;  %v1561_v62 = vadd.f32 %v1505_v58, %v1382_v16 }
 0x247   : > { %v2036_v19 = vpop.f32.mrf.mxu0  ;;  %v1025_v25 = vadd.f32 %v4887_v8, %v815_v21 }
 0x248   : > { %v2096_v32 = vadd.f32 %v2036_v19, %v1917_v41  ;;  %v1204_v19 = vadd.f32 %v4765_v26, %v1024_v42  ;;  %v1517_v54 = vpop.f32.mrf.mxu1  ;;  %v1875_v50 = vpop.f32.mrf.mxu3 }
 0x24a   : > { %v2120_v45 = vadd.f32 %v5050_v61, %v2096_v32  ;;  %3922 = vmatmul.msk.f32.gmra.mxu0 %vm485_vm1, %v4906_v28  ;;  %v1740_v32 = vadd.f32 %v1684_v23, %v1561_v62  ;;  %v1383_v49 = vadd.f32 %v4951_v55, %v1204_v19  ;;  %v1696_v58 = vpop.f32.mrf.mxu2  ;;  %v5796_v23 = vld [vmem:[#allocation11_spill] sm:$0xff] }
 0x24b   : > { %v818_v55 = vadd.f32 %v4755_v7, %v5796_v23 }
 0x24c   : > { %v2140_v48 = vmax.f32 %v2120_v45, 0.0  ;;  %v1919_v45 = vadd.f32 %v1863_v52, %v1740_v32  ;;  %v1562_v38 = vadd.f32 %v1508_v29, %v1383_v49 }
 0x24e   : > { %2160 = vst.msk [vmem:[#allocation2 + $0x1] sm:$0xff] %vm485_vm1, %v2140_v48  ;;  %v1741_v48 = vadd.f32 %v1687_v2, %v1562_v38  ;;  %v5797_v2 = vld [vmem:[#allocation12_spill] sm:$0xff] }
 0x24f   : > { %v2039_v46 = vpop.f32.mrf.mxu0 }
 0x250   : > { %v2097_v41 = vadd.f32 %v2039_v46, %v1918_v47  ;;  %v1520_v42 = vpop.f32.mrf.mxu1  ;;  %v1026_v47 = vadd.f32 %v4899_v12, %v818_v55  ;;  %v1920_v29 = vadd.f32 %v5026_v57, %v1741_v48  ;;  %v821_v12 = vadd.f32 %v4775_v10, %v5797_v2  ;;  %v5801_v48 = vld [vmem:[#allocation31_spill] sm:$0xff] }
 0x252   : > { %v2121_v28 = vadd.f32 %v5050_v61, %v2097_v41  ;;  %3923 = vmatmul.msk.f32.gmra.mxu0 %vm485_vm1, %v4919_v56  ;;  %v1205_v56 = vadd.f32 %v4779_v27, %v1025_v25  ;;  %v1956_v27 = vld [vmem:[#allocation2 + $0x112] sm:$0xff]  ;;  %v1699_v19 = vpop.f32.mrf.mxu2  ;;  %v1027_v21 = vadd.f32 %v4912_v14, %v821_v12 }
 0x254   : > { %v2141_v51 = vmax.f32 %v2121_v28, 0.0  ;;  %v1384_v8 = vadd.f32 %v4959_v5, %v1205_v56  ;;  %v1206_v28 = vadd.f32 %v4793_v13, %v1026_v47  ;;  %v1878_v5 = vpop.f32.mrf.mxu3  ;;  %v1207_v25 = vadd.f32 %v4805_v40, %v1027_v21  ;;  %v5802_v47 = vld [vmem:[#allocation17_spill] sm:$0xff] }
 0x256   : > { %2161 = vst.msk [vmem:[#allocation2 + $0x9] sm:$0xff] %vm485_vm1, %v2141_v51  ;;  %v1563_v62 = vadd.f32 %v5032_v59, %v1384_v8  ;;  %v1385_v20 = vadd.f32 %v4964_v30, %v1206_v28  ;;  %v1386_v38 = vadd.f32 %v4969_v35, %v1207_v25 }
 0x257   : > { %v2042_v26 = vpop.f32.mrf.mxu0 }
 0x258   : > { %v2098_v4 = vadd.f32 %v2042_v26, %v1919_v45  ;;  %v1742_v57 = vadd.f32 %v5039_v53, %v1563_v62  ;;  %v1523_v13 = vpop.f32.mrf.mxu1  ;;  %v1564_v49 = vadd.f32 %v1514_v24, %v1385_v20  ;;  %v5798_v26 = vld [vmem:[#allocation14_spill] sm:$0xff]  ;;  %v5799_v53 = vld [vmem:[#allocation28_spill] sm:$0xff]  ;;  %v1565_v23 = vadd.f32 %v1517_v54, %v1386_v38  ;;  %v5804_v54 = vld [vmem:[#allocation5_spill] sm:$0xff] }
 0x25a   : > { %v2122_v16 = vadd.f32 %v5050_v61, %v2098_v4  ;;  %3924 = vmatmul.msk.f32.gmra.mxu0 %vm485_vm1, %v1955_v63  ;;  %v1921_v59 = vadd.f32 %v5044_v3, %v1742_v57  ;;  %v1702_v10 = vpop.f32.mrf.mxu2  ;;  %v824_v63 = vadd.f32 %v5799_v53, %v5798_v26  ;;  %v1743_v30 = vadd.f32 %v1693_v22, %v1564_v49  ;;  %v5805_v57 = vld [vmem:[#allocation32_spill] sm:$0xff] }
 0x25b   : > { %v1389_v53 = vadd.f32 %v4983_v17, %v4845_v44 }
 0x25c   : > { %v2142_v52 = vmax.f32 %v2122_v16, 0.0  ;;  %v1881_v4 = vpop.f32.mrf.mxu3  ;;  %v1922_v3 = vadd.f32 %v1872_v60, %v1743_v30  ;;  %v5800_v16 = vld [vmem:[#allocation3_spill] sm:$0xff] }
 0x25d   : > { %v1028_v24 = vadd.f32 %v5800_v16, %v824_v63  ;;  %v1390_v16 = vadd.f32 %v4987_v31, %v4859_v34 }
 0x25e   : > { %2162 = vst.msk [vmem:[#allocation2 + $0x19] sm:$0xff] %vm485_vm1, %v2142_v52 }
 0x25f   : > { %v2045_v46 = vpop.f32.mrf.mxu0  ;;  %v1208_v8 = vadd.f32 %v5801_v48, %v1028_v24  ;;  %v5806_v48 = vld [vmem:[#allocation25_spill] sm:$0xff] }
 0x260   : > { %v2099_v41 = vadd.f32 %v2045_v46, %v1920_v29  ;;  %v1526_v40 = vpop.f32.mrf.mxu1  ;;  %v5803_v29 = vld [vmem:[#allocation30_spill] sm:$0xff]  ;;  %v1744_v46 = vadd.f32 %v1696_v58, %v1565_v23 }
 0x261   : > { %v827_v22 = vadd.f32 %v5803_v29, %v5802_v47  ;;  %v1387_v35 = vadd.f32 %v4974_v36, %v1208_v8  ;;  %v839_v8 = vadd.f32 %v4999_v37, %v5806_v48  ;;  %v1391_v47 = vadd.f32 %v4991_v39, %v4873_v6  ;;  %v5808_v37 = vld [vmem:[#allocation26_spill] sm:$0xff] }
 0x262   : > { %v2123_v7 = vadd.f32 %v5050_v61, %v2099_v41  ;;  %3925 = vmatmul.msk.f32.gmra.mxu0 %vm485_vm1, %v1956_v27  ;;  %v1705_v60 = vpop.f32.mrf.mxu2  ;;  %v1923_v62 = vadd.f32 %v1875_v50, %v1744_v46  ;;  %v5807_v46 = vld [vmem:[#allocation13_spill] sm:$0xff] }
 0x263   : > { %v1566_v2 = vadd.f32 %v1520_v42, %v1387_v35  ;;  %v1033_v35 = vadd.f32 %v5807_v46, %v839_v8 }
 0x264   : > { %v2143_v43 = vmax.f32 %v2123_v7, 0.0  ;;  %v1884_v41 = vpop.f32.mrf.mxu3  ;;  %v1029_v7 = vadd.f32 %v5804_v54, %v827_v22  ;;  %v5809_v54 = vld [vmem:[#allocation6_spill] sm:$0xff] }
 0x266   : > { %2163 = vst.msk [vmem:[#allocation2 + $0x21] sm:$0xff] %vm485_vm1, %v2143_v43  ;;  %v1209_v20 = vadd.f32 %v5805_v57, %v1029_v7  ;;  %v842_v7 = vadd.f32 %v5809_v54, %v5808_v37 }
 0x267   : > { %v2048_v32 = vpop.f32.mrf.mxu0 }
 0x268   : > { %v2100_v51 = vadd.f32 %v2048_v32, %v1921_v59  ;;  %v1529_v21 = vpop.f32.mrf.mxu1  ;;  %v1745_v59 = vadd.f32 %v1699_v19, %v1566_v2  ;;  %v1388_v58 = vadd.f32 %v4979_v11, %v1209_v20 }
 0x26a   : > { %v2124_v45 = vadd.f32 %v5050_v61, %v2100_v51  ;;  %v1924_v32 = vadd.f32 %v1878_v5, %v1745_v59  ;;  %v1708_v50 = vpop.f32.mrf.mxu2  ;;  %v1567_v51 = vadd.f32 %v1523_v13, %v1388_v58  ;;  %v1568_v5 = vadd.f32 %v1526_v40, %v1389_v53 }
 0x26c   : > { %v2144_v14 = vmax.f32 %v2124_v45, 0.0  ;;  %v1887_v45 = vpop.f32.mrf.mxu3  ;;  %v1746_v26 = vadd.f32 %v1702_v10, %v1567_v51  ;;  %v5812_v51 = vld [vmem:[#allocation8_spill] sm:$0xff] }
 0x26e   : > { %2164 = vst.msk [vmem:[#allocation2 + $0x31] sm:$0xff] %vm485_vm1, %v2144_v14  ;;  %v1925_v19 = vadd.f32 %v1881_v4, %v1746_v26  ;;  %v1569_v4 = vadd.f32 %v1529_v21, %v1390_v16  ;;  %v5810_v21 = vld [vmem:[#allocation16_spill] sm:$0xff] }
 0x26f   : > { %v2051_v56 = vpop.f32.mrf.mxu0  ;;  %v1034_v59 = vadd.f32 %v5810_v21, %v842_v7 }
 0x270   : > { %v2101_v55 = vadd.f32 %v2051_v56, %v1922_v3  ;;  %v1532_v30 = vpop.f32.mrf.mxu1  ;;  %v1747_v56 = vadd.f32 %v1705_v60, %v1568_v5 }
 0x272   : > { %v2125_v52 = vadd.f32 %v5050_v61, %v2101_v55  ;;  %v1711_v14 = vpop.f32.mrf.mxu2  ;;  %v1926_v24 = vadd.f32 %v1884_v41, %v1747_v56  ;;  %v1213_v41 = vadd.f32 %v4885_v1, %v1033_v35  ;;  %v1214_v1 = vadd.f32 %v4897_v9, %v1034_v59 }
 0x274   : > { %v2145_v27 = vmax.f32 %v2125_v52, 0.0  ;;  %v1890_v13 = vpop.f32.mrf.mxu3  ;;  %v1748_v52 = vadd.f32 %v1708_v50, %v1569_v4  ;;  %v1392_v6 = vadd.f32 %v4995_v33, %v1213_v41  ;;  %v5816_v4 = vld [vmem:[#allocation20_spill] sm:$0xff] }
 0x276   : > { %2165 = vst.msk [vmem:[#allocation2 + $0x39] sm:$0xff] %vm485_vm1, %v2145_v27  ;;  %v1927_v31 = vadd.f32 %v1887_v45, %v1748_v52  ;;  %v1570_v27 = vadd.f32 %v1532_v30, %v1391_v47  ;;  %v1393_v45 = vadd.f32 %v5001_v0, %v1214_v1  ;;  %v5813_v30 = vld [vmem:[#allocation18_spill] sm:$0xff] }
 0x277   : > { %v2054_v28 = vpop.f32.mrf.mxu0 }
 0x278   : > { %v2102_v12 = vadd.f32 %v2054_v28, %v1923_v62  ;;  %v1535_v44 = vpop.f32.mrf.mxu1  ;;  %v1749_v2 = vadd.f32 %v1711_v14, %v1570_v27 }
 0x279   : > { %v1571_v58 = vadd.f32 %v1535_v44, %v1392_v6  ;;  %v5819_v6 = vld [vmem:[#allocation35_spill] sm:$0xff] }
 0x27a   : > { %v2126_v43 = vadd.f32 %v5050_v61, %v2102_v12  ;;  %v1714_v40 = vpop.f32.mrf.mxu2  ;;  %v1928_v57 = vadd.f32 %v1890_v13, %v1749_v2  ;;  %v5815_v13 = vld [vmem:[#allocation10_spill] sm:$0xff] }
 0x27b   : > { %v1750_v33 = vadd.f32 %v1714_v40, %v1571_v58 }
 0x27c   : > { %v2146_v36 = vmax.f32 %v2126_v43, 0.0  ;;  %v1893_v34 = vpop.f32.mrf.mxu3 }
 0x27d   : > { %v1929_v26 = vadd.f32 %v1893_v34, %v1750_v33  ;;  %v5818_v34 = vld [vmem:[#allocation34_spill] sm:$0xff] }
 0x27e   : > { %2166 = vst.msk [vmem:[#allocation2 + $0x49] sm:$0xff] %vm485_vm1, %v2146_v36 }
 0x27f   : > { %v2057_v49 = vpop.f32.mrf.mxu0 }
 0x280   : > { %v2103_v25 = vadd.f32 %v2057_v49, %v1924_v32  ;;  %v1538_v62 = vpop.f32.mrf.mxu1  ;;  %v5811_v49 = vld [vmem:[#allocation27_spill] sm:$0xff] }
 0x282   : > { %v2127_v42 = vadd.f32 %v5050_v61, %v2103_v25  ;;  %v1717_v12 = vpop.f32.mrf.mxu2  ;;  %v845_v25 = vadd.f32 %v5812_v51, %v5811_v49 }
 0x284   : > { %v2147_v63 = vmax.f32 %v2127_v42, 0.0  ;;  %v1896_v20 = vpop.f32.mrf.mxu3 }
 0x286   : > { %2167 = vst.msk [vmem:[#allocation2 + $0x51] sm:$0xff] %vm485_vm1, %v2147_v63 }
 0x287   : > { %v2060_v11 = vpop.f32.mrf.mxu0 }
 0x288   : > { %v2104_v38 = vadd.f32 %v2060_v11, %v1925_v19  ;;  %v1541_v50 = vpop.f32.mrf.mxu1  ;;  %v1035_v19 = vadd.f32 %v5813_v30, %v845_v25  ;;  %v1572_v11 = vadd.f32 %v1538_v62, %v1393_v45 }
 0x28a   : > { %v2128_v3 = vadd.f32 %v5050_v61, %v2104_v38  ;;  %v1720_v53 = vpop.f32.mrf.mxu2  ;;  %v1215_v38 = vadd.f32 %v4910_v15, %v1035_v19  ;;  %v1751_v16 = vadd.f32 %v1717_v12, %v1572_v11  ;;  %v5817_v15 = vld [vmem:[#allocation33_spill] sm:$0xff] }
 0x28c   : > { %v2148_v10 = vmax.f32 %v2128_v3, 0.0  ;;  %v1899_v9 = vpop.f32.mrf.mxu3  ;;  %v5814_v3 = vld [vmem:[#allocation29_spill] sm:$0xff]  ;;  %v1394_v0 = vadd.f32 %v5005_v18, %v1215_v38  ;;  %v1930_v44 = vadd.f32 %v1896_v20, %v1751_v16 }
 0x28d   : > { %v848_v56 = vadd.f32 %v5815_v13, %v5814_v3 }
 0x28e   : > { %2168 = vst.msk [vmem:[#allocation2 + $0x61] sm:$0xff] %vm485_vm1, %v2148_v10 }
 0x28f   : > { %v2063_v17 = vpop.f32.mrf.mxu0 }
 0x290   : > { %v2105_v23 = vadd.f32 %v2063_v17, %v1926_v24  ;;  %v1544_v24 = vpop.f32.mrf.mxu1 }
 0x292   : > { %v2129_v55 = vadd.f32 %v5050_v61, %v2105_v23  ;;  %v1036_v23 = vadd.f32 %v5816_v4, %v848_v56  ;;  %v1723_v48 = vpop.f32.mrf.mxu2  ;;  %v5822_v56 = vld [vmem:[#allocation15_spill] sm:$0xff] }
 0x294   : > { %v2149_v29 = vmax.f32 %v2129_v55, 0.0  ;;  %v1573_v55 = vadd.f32 %v1541_v50, %v1394_v0  ;;  %v1216_v8 = vadd.f32 %v5817_v15, %v1036_v23  ;;  %v1902_v47 = vpop.f32.mrf.mxu3 }
 0x296   : > { %2169 = vst.msk [vmem:[#allocation2 + $0x69] sm:$0xff] %vm485_vm1, %v2149_v29  ;;  %v1752_v29 = vadd.f32 %v1720_v53, %v1573_v55 }
 0x297   : > { %v2066_v22 = vpop.f32.mrf.mxu0 }
 0x298   : > { %v2106_v60 = vadd.f32 %v2066_v22, %v1927_v31  ;;  %v1395_v31 = vadd.f32 %v5818_v34, %v1216_v8  ;;  %v1931_v22 = vadd.f32 %v1899_v9, %v1752_v29  ;;  %v1547_v46 = vpop.f32.mrf.mxu1 }
 0x29a   : > { %v2130_v28 = vadd.f32 %v5050_v61, %v2106_v60  ;;  %v1574_v27 = vadd.f32 %v1544_v24, %v1395_v31  ;;  %v1726_v41 = vpop.f32.mrf.mxu2 }
 0x29c   : > { %v2150_v39 = vmax.f32 %v2130_v28, 0.0  ;;  %v1753_v28 = vadd.f32 %v1723_v48, %v1574_v27  ;;  %v1905_v54 = vpop.f32.mrf.mxu3 }
 0x29e   : > { %2170 = vst.msk [vmem:[#allocation2 + $0x79] sm:$0xff] %vm485_vm1, %v2150_v39  ;;  %v1932_v7 = vadd.f32 %v1902_v47, %v1753_v28  ;;  %v1575_v39 = vadd.f32 %v1547_v46, %v5819_v6 }
 0x29f   : > { %v2069_v43 = vpop.f32.mrf.mxu0 }
 0x2a0   : > { %v2107_v36 = vadd.f32 %v2069_v43, %v1928_v57  ;;  %v1550_v57 = vpop.f32.mrf.mxu1  ;;  %v1754_v43 = vadd.f32 %v1726_v41, %v1575_v39 }
 0x2a2   : > { %v2131_v32 = vadd.f32 %v5050_v61, %v2107_v36  ;;  %v1729_v59 = vpop.f32.mrf.mxu2  ;;  %v1933_v58 = vadd.f32 %v1905_v54, %v1754_v43 }
 0x2a4   : > { %v2151_v42 = vmax.f32 %v2131_v32, 0.0  ;;  %v1908_v36 = vpop.f32.mrf.mxu3  ;;  %v5820_v32 = vld [vmem:[#allocation36_spill] sm:$0xff] }
 0x2a5   : > { %v1576_v50 = vadd.f32 %v1550_v57, %v5820_v32 }
 0x2a6   : > { %2171 = vst.msk [vmem:[#allocation2 + $0x81] sm:$0xff] %vm485_vm1, %v2151_v42 }
 0x2a7   : > { %v2072_v63 = vpop.f32.mrf.mxu0  ;;  %v1755_v33 = vadd.f32 %v1729_v59, %v1576_v50 }
 0x2a8   : > { %v2108_v5 = vadd.f32 %v2072_v63, %v1929_v26  ;;  %v1553_v25 = vpop.f32.mrf.mxu1  ;;  %v5821_v63 = vld [vmem:[#allocation37_spill] sm:$0xff] }
 0x2a9   : > { %v1934_v42 = vadd.f32 %v1908_v36, %v1755_v33  ;;  %v1577_v30 = vadd.f32 %v1553_v25, %v5821_v63 }
 0x2aa   : > { %v2132_v14 = vadd.f32 %v5050_v61, %v2108_v5  ;;  %v1732_v26 = vpop.f32.mrf.mxu2 }
 0x2ab   : > { %v1756_v9 = vadd.f32 %v1732_v26, %v1577_v30 }
 0x2ac   : > { %v2152_v10 = vmax.f32 %v2132_v14, 0.0  ;;  %v1911_v11 = vpop.f32.mrf.mxu3 }
 0x2ad   : > { %v1935_v3 = vadd.f32 %v1911_v11, %v1756_v9 }
 0x2ae   : > { %2172 = vst.msk [vmem:[#allocation2 + $0x91] sm:$0xff] %vm485_vm1, %v2152_v10 }
 0x2af   : > { %v2075_v17 = vpop.f32.mrf.mxu0 }
 0x2b0   : > { %v2109_v40 = vadd.f32 %v2075_v17, %v1930_v44  ;;  %v1556_v14 = vpop.f32.mrf.mxu1 }
 0x2b1   : > { %v1578_v16 = vadd.f32 %v1556_v14, %v5822_v56 }
 0x2b2   : > { %v2133_v52 = vadd.f32 %v5050_v61, %v2109_v40  ;;  %v1735_v10 = vpop.f32.mrf.mxu2 }
 0x2b3   : > { %v1757_v17 = vadd.f32 %v1735_v10, %v1578_v16 }
 0x2b4   : > { %v2153_v18 = vmax.f32 %v2133_v52, 0.0  ;;  %v1914_v44 = vpop.f32.mrf.mxu3 }
 0x2b5   : > { %v1936_v23 = vadd.f32 %v1914_v44, %v1757_v17 }
 0x2b6   : > { %2173 = vst.msk [vmem:[#allocation2 + $0x99] sm:$0xff] %vm485_vm1, %v2153_v18 }
 0x2b7   : > { %v2078_v35 = vpop.f32.mrf.mxu0 }
 0x2b8   : > { %v2110_v60 = vadd.f32 %v2078_v35, %v1931_v22 }
 0x2ba   : > { %v2134_v62 = vadd.f32 %v5050_v61, %v2110_v60 }
 0x2bc   : > { %v2154_v37 = vmax.f32 %v2134_v62, 0.0 }
 0x2be   : > { %2174 = vst.msk [vmem:[#allocation2 + $0xa9] sm:$0xff] %vm485_vm1, %v2154_v37 }
 0x2bf   : > { %v2081_v2 = vpop.f32.mrf.mxu0 }
 0x2c0   : > { %v2111_v12 = vadd.f32 %v2081_v2, %v1932_v7 }
 0x2c2   : > { %v2135_v20 = vadd.f32 %v5050_v61, %v2111_v12 }
 0x2c4   : > { %v2155_v21 = vmax.f32 %v2135_v20, 0.0 }
 0x2c6   : > { %2175 = vst.msk [vmem:[#allocation2 + $0xb1] sm:$0xff] %vm485_vm1, %v2155_v21 }
 0x2c7   : > { %v2084_v1 = vpop.f32.mrf.mxu0 }
 0x2c8   : > { %v2112_v49 = vadd.f32 %v2084_v1, %v1933_v58 }
 0x2ca   : > { %v2136_v51 = vadd.f32 %v5050_v61, %v2112_v49 }
 0x2cc   : > { %v2156_v45 = vmax.f32 %v2136_v51, 0.0 }
 0x2ce   : > { %2176 = vst.msk [vmem:[#allocation2 + $0xc1] sm:$0xff] %vm485_vm1, %v2156_v45 }
 0x2cf   : > { %v2087_v53 = vpop.f32.mrf.mxu0 }
 0x2d0   : > { %v2113_v19 = vadd.f32 %v2087_v53, %v1934_v42 }
 0x2d2   : > { %v2137_v5 = vadd.f32 %v5050_v61, %v2113_v19 }
 0x2d4   : > { %v2157_v38 = vmax.f32 %v2137_v5, 0.0 }
 0x2d6   : > { %2177 = vst.msk [vmem:[#allocation2 + $0xc9] sm:$0xff] %vm485_vm1, %v2157_v38 }
 0x2d7   : > { %v2090_v13 = vpop.f32.mrf.mxu0 }
 0x2d8   : > { %v2114_v0 = vadd.f32 %v2090_v13, %v1935_v3 }
 0x2da   : > { %v2138_v24 = vadd.f32 %v5050_v61, %v2114_v0 }
 0x2dc   : > { %v2158_v4 = vmax.f32 %v2138_v24, 0.0 }
 0x2de   : > { %2178 = vst.msk [vmem:[#allocation2 + $0xd9] sm:$0xff] %vm485_vm1, %v2158_v4 }
 0x2df   : > { %v2093_v55 = vpop.f32.mrf.mxu0 }
 0x2e0   : > { %v2115_v40 = vadd.f32 %v2093_v55, %v1936_v23 }
 0x2e2   : > { %v2139_v48 = vadd.f32 %v5050_v61, %v2115_v40  ;;  %2182 = sbr.rel (%p3735_p12) target bundleno = 746 (0x2ea), region = 68 }
 0x2e4   : > { %v2159_v15 = vmax.f32 %v2139_v48, 0.0 }
 0x2e6   : > { %2179 = vst.msk [vmem:[#allocation2 + $0xe1] sm:$0xff] %vm485_vm1, %v2159_v15 }
 0x2e7   : > { %v4175_v8 = vmov 0.0  }
 0x2e8   : > { %2183 = vst.msk [vmem:[#allocation2 + $0x1] sm:$0xff] %vm485_vm1, %v4175_v8 }
 0x2e9   : > { %2184 = vst.msk [vmem:[#allocation2 + $0x9] sm:$0xff] %vm485_vm1, %v4175_v8 }
 0x2ea PF: > { %2187 = sbr.rel (%p3737_p0) target bundleno = 754 (0x2f2), region = 72 }
 0x2ef   : > { %v4176_v52 = vmov 0.0  }
 0x2f0   : > { %2189 = vst.msk [vmem:[#allocation2 + $0xd9] sm:$0xff] %vm485_vm1, %v4176_v52 }
 0x2f1   : > { %2190 = vst.msk [vmem:[#allocation2 + $0xe1] sm:$0xff] %vm485_vm1, %v4176_v52 }
 0x2f2 PF: > { %v3928_v61 = vld [vmem:[%s5748_s5 + $0x8] sm:$0xff]  ;;  %v2207_v47 = vld [vmem:[%s5748_s5] sm:$0xff]  ;;  %v3961_v18 = vld [vmem:[%s5748_s5 + $0x10] sm:$0xff] }
 0x2f3   : > { %v2208_v29 = vld [vmem:[#allocation2 + $0x1] sm:$0xff]  ;;  %2289 = vmatpush.msra.mxu1 %v3928_v61  ;;  %2402 = vmatpush.msra.mxu2 %v2207_v47  ;;  %v3978_v46 = vld [vmem:[%s5748_s5 + $0x18] sm:$0xff]  ;;  %v2209_v35 = vld [vmem:[#allocation2 + $0x9] sm:$0xff] }
 0x2f4   : > { %v2191_v34 = vld [vmem:[#allocation2] sm:$0xff]  ;;  %3929 = vmatmul.msk.f32.vlgmr.msra.gmra.mxu1 %vm485_vm1, %v2208_v29  ;;  %2533 = vmatpush.msra.mxu3 %v3961_v18  ;;  %v2192_v27 = vld [vmem:[#allocation2 + $0x8] sm:$0xff]  ;;  %v5195_v41 = vld [vmem:[#allocation2 + $0x18] sm:$0xff] }
 0x2f5   : > { %v3995_v31 = vld [vmem:[%s5748_s5 + $0x20] sm:$0xff]  ;;  %3945 = vmatmul.msk.f32.vlgmr.msra.gmra.mxu2 %vm485_vm1, %v2191_v34  ;;  %2680 = vmatpush.msrb.mxu1 %v3978_v46  ;;  %v2453_v60 = vld [vmem:[#allocation2 + $0xa] sm:$0xff]  ;;  %v5221_v39 = vld [vmem:[#allocation2 + $0x32] sm:$0xff] }
 0x2f6   : > { %v2452_v22 = vld [vmem:[#allocation2 + $0x2] sm:$0xff]  ;;  %2827 = vmatpush.msrb.mxu2 %v3995_v31  ;;  %v5193_v62 = vld [vmem:[#allocation2 + $0x19] sm:$0xff]  ;;  %v5217_v2 = vld [vmem:[#allocation2 + $0x31] sm:$0xff] }
 0x2f7   : > { %3962 = vmatmul.msk.f32.vlgmr.msra.gmra.mxu3 %vm485_vm1, %v2452_v22  ;;  %v5197_v28 = vld [vmem:[#allocation2 + $0x1a] sm:$0xff]  ;;  %v5209_v7 = vld [vmem:[#allocation2 + $0x22] sm:$0xff]  ;;  %v5219_v6 = vld [vmem:[#allocation2 + $0x30] sm:$0xff] }
 0x2f8   : > { %v5205_v37 = vld [vmem:[#allocation2 + $0x21] sm:$0xff]  ;;  %v5229_v12 = vld [vmem:[#allocation2 + $0x39] sm:$0xff]  ;;  %v5241_v43 = vld [vmem:[#allocation2 + $0x49] sm:$0xff] }
 0x2f9   : > { %v5207_v54 = vld [vmem:[#allocation2 + $0x20] sm:$0xff]  ;;  %v5231_v57 = vld [vmem:[#allocation2 + $0x38] sm:$0xff]  ;;  %v5243_v21 = vld [vmem:[#allocation2 + $0x48] sm:$0xff] }
 0x2fa   : > { %v5233_v20 = vld [vmem:[#allocation2 + $0x3a] sm:$0xff]  ;;  %v5245_v59 = vld [vmem:[#allocation2 + $0x4a] sm:$0xff]  ;;  %v5257_v1 = vld [vmem:[#allocation2 + $0x52] sm:$0xff] }
 0x2fb   : > { %v5253_v58 = vld [vmem:[#allocation2 + $0x51] sm:$0xff]  ;;  %v5265_v32 = vld [vmem:[#allocation2 + $0x61] sm:$0xff]  ;;  %v5277_v51 = vld [vmem:[#allocation2 + $0x69] sm:$0xff] }
 0x2fc   : > { %3930 = vmatmul.msk.f32.gmra.mxu1 %vm485_vm1, %v2209_v35  ;;  %v5255_v36 = vld [vmem:[#allocation2 + $0x50] sm:$0xff]  ;;  %v5267_v50 = vld [vmem:[#allocation2 + $0x60] sm:$0xff]  ;;  %v5279_v25 = vld [vmem:[#allocation2 + $0x68] sm:$0xff] }
 0x2fd   : > { %3946 = vmatmul.msk.f32.gmra.mxu2 %vm485_vm1, %v2192_v27  ;;  %v5269_v49 = vld [vmem:[#allocation2 + $0x62] sm:$0xff]  ;;  %v5281_v33 = vld [vmem:[#allocation2 + $0x6a] sm:$0xff]  ;;  %v5289_v45 = vld [vmem:[#allocation2 + $0x79] sm:$0xff] }
 0x2fe   : > { %v5291_v42 = vld [vmem:[#allocation2 + $0x78] sm:$0xff]  ;;  %v5301_v53 = vld [vmem:[#allocation2 + $0x81] sm:$0xff]  ;;  %v5318_v5 = vld [vmem:[#allocation2 + $0x90] sm:$0xff] }
 0x2ff   : > { %3963 = vmatmul.msk.f32.gmra.mxu3 %vm485_vm1, %v2453_v60  ;;  %v5293_v26 = vld [vmem:[#allocation2 + $0x7a] sm:$0xff]  ;;  %v5305_v30 = vld [vmem:[#allocation2 + $0x82] sm:$0xff]  ;;  %v5316_v11 = vld [vmem:[#allocation2 + $0x91] sm:$0xff] }
 0x300   : > { %v5303_v63 = vld [vmem:[#allocation2 + $0x80] sm:$0xff]  ;;  %v4012_v19 = vld [vmem:[%s5748_s5 + $0x28] sm:$0xff]  ;;  %v5320_v9 = vld [vmem:[#allocation2 + $0x92] sm:$0xff] }
 0x301   : > { %2974 = vmatpush.msrb.mxu3 %v4012_v19  ;;  %v4063_v38 = vld [vmem:[%s5748_s5 + $0x40] sm:$0xff]  ;;  %v4046_v14 = vld [vmem:[%s5748_s5 + $0x38] sm:$0xff]  ;;  %v4029_v16 = vld [vmem:[%s5748_s5 + $0x30] sm:$0xff] }
 0x302   : > { %3415 = vmatpush.msra.mxu2 %v4063_v38  ;;  %v5334_v3 = vld [vmem:[#allocation2 + $0x99] sm:$0xff]  ;;  %3268 = vmatpush.msra.mxu1 %v4046_v14  ;;  %v5351_v0 = vld [vmem:[#allocation2 + $0xa9] sm:$0xff]  ;;  %v5365_v44 = vld [vmem:[#allocation2 + $0xb1] sm:$0xff] }
 0x303   : > { %v5336_v13 = vld [vmem:[#allocation2 + $0x98] sm:$0xff]  ;;  %3121 = vmatpush.msra.mxu0 %v4029_v16  ;;  %v5353_v10 = vld [vmem:[#allocation2 + $0xa8] sm:$0xff]  ;;  %v5367_v17 = vld [vmem:[#allocation2 + $0xb0] sm:$0xff] }
 0x304   : > { %3931 = vmatmul.msk.f32.gmra.mxu1 %vm485_vm1, %v5193_v62  ;;  %v5338_v56 = vld [vmem:[#allocation2 + $0x9a] sm:$0xff]  ;;  %4030 = vmatmul.msk.f32.vlgmr.msra.gmra.mxu0 %vm485_vm1, %v5219_v6  ;;  %v5355_v24 = vld [vmem:[#allocation2 + $0xaa] sm:$0xff]  ;;  %v5369_v4 = vld [vmem:[#allocation2 + $0xb2] sm:$0xff] }
 0x305   : > { %3947 = vmatmul.msk.f32.gmra.mxu2 %vm485_vm1, %v5195_v41 }
 0x307   : > { %3964 = vmatmul.msk.f32.gmra.mxu3 %vm485_vm1, %v5197_v28 }
 0x30c   : > { %3932 = vmatmul.msk.f32.gmra.mxu1 %vm485_vm1, %v5205_v37  ;;  %4031 = vmatmul.msk.f32.gmra.mxu0 %vm485_vm1, %v5231_v57 }
 0x30d   : > { %3948 = vmatmul.msk.f32.gmra.mxu2 %vm485_vm1, %v5207_v54 }
 0x30f   : > { %3965 = vmatmul.msk.f32.gmra.mxu3 %vm485_vm1, %v5209_v7 }
 0x314   : > { %3933 = vmatmul.msk.f32.gmra.mxu1 %vm485_vm1, %v5217_v2  ;;  %4032 = vmatmul.msk.f32.gmra.mxu0 %vm485_vm1, %v5243_v21 }
 0x315   : > { %3949 = vmatmul.msk.f32.gmra.mxu2 %vm485_vm1, %v5219_v6 }
 0x317   : > { %3966 = vmatmul.msk.f32.gmra.mxu3 %vm485_vm1, %v5221_v39 }
 0x31c   : > { %3934 = vmatmul.msk.f32.gmra.mxu1 %vm485_vm1, %v5229_v12  ;;  %4033 = vmatmul.msk.f32.gmra.mxu0 %vm485_vm1, %v5255_v36 }
 0x31d   : > { %3950 = vmatmul.msk.f32.gmra.mxu2 %vm485_vm1, %v5231_v57 }
 0x31f   : > { %3967 = vmatmul.msk.f32.gmra.mxu3 %vm485_vm1, %v5233_v20 }
 0x324   : > { %3935 = vmatmul.msk.f32.gmra.mxu1 %vm485_vm1, %v5241_v43  ;;  %4034 = vmatmul.msk.f32.gmra.mxu0 %vm485_vm1, %v5267_v50 }
 0x325   : > { %3951 = vmatmul.msk.f32.gmra.mxu2 %vm485_vm1, %v5243_v21 }
 0x327   : > { %3968 = vmatmul.msk.f32.gmra.mxu3 %vm485_vm1, %v5245_v59 }
 0x32c   : > { %3936 = vmatmul.msk.f32.gmra.mxu1 %vm485_vm1, %v5253_v58  ;;  %4035 = vmatmul.msk.f32.gmra.mxu0 %vm485_vm1, %v5279_v25 }
 0x32d   : > { %3952 = vmatmul.msk.f32.gmra.mxu2 %vm485_vm1, %v5255_v36 }
 0x32f   : > { %3969 = vmatmul.msk.f32.gmra.mxu3 %vm485_vm1, %v5257_v1 }
 0x334   : > { %3937 = vmatmul.msk.f32.gmra.mxu1 %vm485_vm1, %v5265_v32  ;;  %4036 = vmatmul.msk.f32.gmra.mxu0 %vm485_vm1, %v5291_v42 }
 0x335   : > { %3953 = vmatmul.msk.f32.gmra.mxu2 %vm485_vm1, %v5267_v50 }
 0x337   : > { %3970 = vmatmul.msk.f32.gmra.mxu3 %vm485_vm1, %v5269_v49 }
 0x33c   : > { %3938 = vmatmul.msk.f32.gmra.mxu1 %vm485_vm1, %v5277_v51  ;;  %4037 = vmatmul.msk.f32.gmra.mxu0 %vm485_vm1, %v5303_v63 }
 0x33d   : > { %3954 = vmatmul.msk.f32.gmra.mxu2 %vm485_vm1, %v5279_v25 }
 0x33f   : > { %3971 = vmatmul.msk.f32.gmra.mxu3 %vm485_vm1, %v5281_v33 }
 0x344   : > { %3939 = vmatmul.msk.f32.gmra.mxu1 %vm485_vm1, %v5289_v45  ;;  %4038 = vmatmul.msk.f32.gmra.mxu0 %vm485_vm1, %v5318_v5 }
 0x345   : > { %3955 = vmatmul.msk.f32.gmra.mxu2 %vm485_vm1, %v5291_v42 }
 0x347   : > { %3972 = vmatmul.msk.f32.gmra.mxu3 %vm485_vm1, %v5293_v26 }
 0x34c   : > { %3940 = vmatmul.msk.f32.gmra.mxu1 %vm485_vm1, %v5301_v53  ;;  %4039 = vmatmul.msk.f32.gmra.mxu0 %vm485_vm1, %v5336_v13 }
 0x34d   : > { %3956 = vmatmul.msk.f32.gmra.mxu2 %vm485_vm1, %v5303_v63 }
 0x34f   : > { %3973 = vmatmul.msk.f32.gmra.mxu3 %vm485_vm1, %v5305_v30 }
 0x354   : > { %3941 = vmatmul.msk.f32.gmra.mxu1 %vm485_vm1, %v5316_v11  ;;  %4040 = vmatmul.msk.f32.gmra.mxu0 %vm485_vm1, %v5353_v10 }
 0x355   : > { %3957 = vmatmul.msk.f32.gmra.mxu2 %vm485_vm1, %v5318_v5 }
 0x357   : > { %3974 = vmatmul.msk.f32.gmra.mxu3 %vm485_vm1, %v5320_v9 }
 0x35c   : > { %3942 = vmatmul.msk.f32.gmra.mxu1 %vm485_vm1, %v5334_v3  ;;  %4041 = vmatmul.msk.f32.gmra.mxu0 %vm485_vm1, %v5367_v17 }
 0x35d   : > { %3958 = vmatmul.msk.f32.gmra.mxu2 %vm485_vm1, %v5336_v13 }
 0x35f   : > { %3975 = vmatmul.msk.f32.gmra.mxu3 %vm485_vm1, %v5338_v56 }
 0x364   : > { %3943 = vmatmul.msk.f32.gmra.mxu1 %vm485_vm1, %v5351_v0 }
 0x365   : > { %3959 = vmatmul.msk.f32.gmra.mxu2 %vm485_vm1, %v5353_v10 }
 0x367   : > { %3976 = vmatmul.msk.f32.gmra.mxu3 %vm485_vm1, %v5355_v24 }
 0x36c   : > { %3944 = vmatmul.msk.f32.gmra.mxu1 %vm485_vm1, %v5365_v44 }
 0x36d   : > { %3960 = vmatmul.msk.f32.gmra.mxu2 %vm485_vm1, %v5367_v17 }
 0x36f   : > { %3977 = vmatmul.msk.f32.gmra.mxu3 %vm485_vm1, %v5369_v4 }
 0x371   : > { %v2291_v23 = vpop.f32.mrf.mxu1 }
 0x374   : > { %3979 = vmatmul.msk.f32.vlgmr.msrb.gmra.mxu1 %vm485_vm1, %v5195_v41 }
 0x375   : > { %3996 = vmatmul.msk.f32.vlgmr.msrb.gmra.mxu2 %vm485_vm1, %v5193_v62 }
 0x377   : > { %4013 = vmatmul.msk.f32.vlgmr.msrb.gmra.mxu3 %vm485_vm1, %v5197_v28 }
 0x378   : > { %v2404_v55 = vpop.f32.mrf.mxu2 }
 0x379   : > { %v2405_v40 = vadd.f32 %v2404_v55, %v2291_v23  ;;  %v2294_v48 = vpop.f32.mrf.mxu1 }
 0x37a   : > { %v2535_v15 = vpop.f32.mrf.mxu3 }
 0x37b   : > { %v5387_v8 = vadd.f32 %v2535_v15, %v2405_v40 }
 0x37c   : > { %3980 = vmatmul.msk.f32.gmra.mxu1 %vm485_vm1, %v5207_v54 }
 0x37d   : > { %3997 = vmatmul.msk.f32.gmra.mxu2 %vm485_vm1, %v5205_v37 }
 0x37f   : > { %4014 = vmatmul.msk.f32.gmra.mxu3 %vm485_vm1, %v5209_v7 }
 0x380   : > { %v2407_v52 = vpop.f32.mrf.mxu2 }
 0x381   : > { %v2408_v61 = vadd.f32 %v2407_v52, %v2294_v48  ;;  %v2297_v47 = vpop.f32.mrf.mxu1 }
 0x382   : > { %v2538_v29 = vpop.f32.mrf.mxu3 }
 0x383   : > { %v5397_v34 = vadd.f32 %v2538_v29, %v2408_v61 }
 0x384   : > { %3981 = vmatmul.msk.f32.gmra.mxu1 %vm485_vm1, %v5219_v6 }
 0x385   : > { %3998 = vmatmul.msk.f32.gmra.mxu2 %vm485_vm1, %v5217_v2 }
 0x387   : > { %4015 = vmatmul.msk.f32.gmra.mxu3 %vm485_vm1, %v5221_v39 }
 0x388   : > { %v2410_v31 = vpop.f32.mrf.mxu2 }
 0x389   : > { %v2411_v18 = vadd.f32 %v2410_v31, %v2297_v47  ;;  %v2300_v22 = vpop.f32.mrf.mxu1 }
 0x38a   : > { %v2541_v46 = vpop.f32.mrf.mxu3 }
 0x38b   : > { %v5407_v35 = vadd.f32 %v2541_v46, %v2411_v18 }
 0x38c   : > { %3982 = vmatmul.msk.f32.gmra.mxu1 %vm485_vm1, %v5231_v57 }
 0x38d   : > { %3999 = vmatmul.msk.f32.gmra.mxu2 %vm485_vm1, %v5229_v12 }
 0x38f   : > { %4016 = vmatmul.msk.f32.gmra.mxu3 %vm485_vm1, %v5233_v20 }
 0x390   : > { %v2413_v27 = vpop.f32.mrf.mxu2 }
 0x391   : > { %v2414_v60 = vadd.f32 %v2413_v27, %v2300_v22  ;;  %v2303_v62 = vpop.f32.mrf.mxu1 }
 0x392   : > { %v2544_v41 = vpop.f32.mrf.mxu3 }
 0x393   : > { %v5417_v28 = vadd.f32 %v2544_v41, %v2414_v60 }
 0x394   : > { %3983 = vmatmul.msk.f32.gmra.mxu1 %vm485_vm1, %v5243_v21 }
 0x395   : > { %4000 = vmatmul.msk.f32.gmra.mxu2 %vm485_vm1, %v5241_v43 }
 0x397   : > { %4017 = vmatmul.msk.f32.gmra.mxu3 %vm485_vm1, %v5245_v59 }
 0x398   : > { %v2416_v37 = vpop.f32.mrf.mxu2 }
 0x399   : > { %v2417_v54 = vadd.f32 %v2416_v37, %v2303_v62  ;;  %v2306_v7 = vpop.f32.mrf.mxu1 }
 0x39a   : > { %v2547_v6 = vpop.f32.mrf.mxu3 }
 0x39b   : > { %v5427_v57 = vadd.f32 %v2547_v6, %v2417_v54 }
 0x39c   : > { %3984 = vmatmul.msk.f32.gmra.mxu1 %vm485_vm1, %v5255_v36 }
 0x39d   : > { %4001 = vmatmul.msk.f32.gmra.mxu2 %vm485_vm1, %v5253_v58 }
 0x39f   : > { %4018 = vmatmul.msk.f32.gmra.mxu3 %vm485_vm1, %v5257_v1 }
 0x3a0   : > { %v2419_v21 = vpop.f32.mrf.mxu2 }
 0x3a1   : > { %v2420_v19 = vadd.f32 %v2419_v21, %v2306_v7  ;;  %v2309_v38 = vpop.f32.mrf.mxu1 }
 0x3a2   : > { %v2550_v14 = vpop.f32.mrf.mxu3 }
 0x3a3   : > { %v5437_v16 = vadd.f32 %v2550_v14, %v2420_v19 }
 0x3a4   : > { %3985 = vmatmul.msk.f32.gmra.mxu1 %vm485_vm1, %v5267_v50 }
 0x3a5   : > { %4002 = vmatmul.msk.f32.gmra.mxu2 %vm485_vm1, %v5265_v32 }
 0x3a7   : > { %4019 = vmatmul.msk.f32.gmra.mxu3 %vm485_vm1, %v5269_v49 }
 0x3a8   : > { %v2422_v36 = vpop.f32.mrf.mxu2 }
 0x3a9   : > { %v2423_v23 = vadd.f32 %v2422_v36, %v2309_v38  ;;  %v2312_v55 = vpop.f32.mrf.mxu1 }
 0x3aa   : > { %v2553_v40 = vpop.f32.mrf.mxu3 }
 0x3ab   : > { %v5447_v48 = vadd.f32 %v2553_v40, %v2423_v23 }
 0x3ac   : > { %3986 = vmatmul.msk.f32.gmra.mxu1 %vm485_vm1, %v5279_v25 }
 0x3ad   : > { %4003 = vmatmul.msk.f32.gmra.mxu2 %vm485_vm1, %v5277_v51 }
 0x3af   : > { %4020 = vmatmul.msk.f32.gmra.mxu3 %vm485_vm1, %v5281_v33 }
 0x3b0   : > { %v2425_v50 = vpop.f32.mrf.mxu2 }
 0x3b1   : > { %v2426_v15 = vadd.f32 %v2425_v50, %v2312_v55  ;;  %v2315_v52 = vpop.f32.mrf.mxu1 }
 0x3b2   : > { %v2556_v61 = vpop.f32.mrf.mxu3 }
 0x3b3   : > { %v5457_v47 = vadd.f32 %v2556_v61, %v2426_v15 }
 0x3b4   : > { %3987 = vmatmul.msk.f32.gmra.mxu1 %vm485_vm1, %v5291_v42  ;;  %v3052_v42 = vld [vmem:[#allocation2 + $0xc0] sm:$0xff] }
 0x3b5   : > { %4004 = vmatmul.msk.f32.gmra.mxu2 %vm485_vm1, %v5289_v45  ;;  %4042 = vmatmul.msk.f32.gmra.mxu0 %vm485_vm1, %v3052_v42 }
 0x3b7   : > { %4021 = vmatmul.msk.f32.gmra.mxu3 %vm485_vm1, %v5293_v26 }
 0x3b8   : > { %v2428_v25 = vpop.f32.mrf.mxu2 }
 0x3b9   : > { %v2429_v29 = vadd.f32 %v2428_v25, %v2315_v52  ;;  %v2318_v31 = vpop.f32.mrf.mxu1 }
 0x3ba   : > { %v2559_v18 = vpop.f32.mrf.mxu3 }
 0x3bb   : > { %v5467_v22 = vadd.f32 %v2559_v18, %v2429_v29 }
 0x3bc   : > { %3988 = vmatmul.msk.f32.gmra.mxu1 %vm485_vm1, %v5303_v63  ;;  %v3053_v63 = vld [vmem:[#allocation2 + $0xc8] sm:$0xff] }
 0x3bd   : > { %4005 = vmatmul.msk.f32.gmra.mxu2 %vm485_vm1, %v5301_v53  ;;  %4043 = vmatmul.msk.f32.gmra.mxu0 %vm485_vm1, %v3053_v63 }
 0x3bf   : > { %4022 = vmatmul.msk.f32.gmra.mxu3 %vm485_vm1, %v5305_v30 }
 0x3c0   : > { %v2431_v46 = vpop.f32.mrf.mxu2 }
 0x3c1   : > { %v2432_v27 = vadd.f32 %v2431_v46, %v2318_v31  ;;  %v2321_v60 = vpop.f32.mrf.mxu1  ;;  %v5511_v31 = vld [vmem:[#allocation2 + $0xc1] sm:$0xff] }
 0x3c2   : > { %v2562_v62 = vpop.f32.mrf.mxu3  ;;  %v5515_v46 = vld [vmem:[#allocation2 + $0xc2] sm:$0xff] }
 0x3c3   : > { %v5476_v41 = vadd.f32 %v2562_v62, %v2432_v27 }
 0x3c4   : > { %3989 = vmatmul.msk.f32.gmra.mxu1 %vm485_vm1, %v5318_v5  ;;  %v3054_v5 = vld [vmem:[#allocation2 + $0xd8] sm:$0xff] }
 0x3c5   : > { %4006 = vmatmul.msk.f32.gmra.mxu2 %vm485_vm1, %v5316_v11  ;;  %4044 = vmatmul.msk.f32.gmra.mxu0 %vm485_vm1, %v3054_v5 }
 0x3c7   : > { %4023 = vmatmul.msk.f32.gmra.mxu3 %vm485_vm1, %v5320_v9 }
 0x3c8   : > { %v2434_v37 = vpop.f32.mrf.mxu2 }
 0x3c9   : > { %v2435_v54 = vadd.f32 %v2434_v37, %v2321_v60  ;;  %v2324_v7 = vpop.f32.mrf.mxu1  ;;  %v5522_v37 = vld [vmem:[#allocation2 + $0xc9] sm:$0xff] }
 0x3ca   : > { %v2565_v6 = vpop.f32.mrf.mxu3 }
 0x3cb   : > { %v5485_v21 = vadd.f32 %v2565_v6, %v2435_v54 }
 0x3cc   : > { %3990 = vmatmul.msk.f32.gmra.mxu1 %vm485_vm1, %v5336_v13  ;;  %v3055_v13 = vld [vmem:[#allocation2 + $0xe0] sm:$0xff] }
 0x3cd   : > { %4007 = vmatmul.msk.f32.gmra.mxu2 %vm485_vm1, %v5334_v3  ;;  %4045 = vmatmul.msk.f32.gmra.mxu0 %vm485_vm1, %v3055_v13 }
 0x3cf   : > { %4024 = vmatmul.msk.f32.gmra.mxu3 %vm485_vm1, %v5338_v56 }
 0x3d0   : > { %v2437_v19 = vpop.f32.mrf.mxu2 }
 0x3d1   : > { %v2438_v38 = vadd.f32 %v2437_v19, %v2324_v7  ;;  %v2327_v14 = vpop.f32.mrf.mxu1  ;;  %v5526_v7 = vld [vmem:[#allocation2 + $0xca] sm:$0xff] }
 0x3d2   : > { %v2568_v36 = vpop.f32.mrf.mxu3 }
 0x3d3   : > { %v5494_v23 = vadd.f32 %v2568_v36, %v2438_v38 }
 0x3d4   : > { %3991 = vmatmul.msk.f32.gmra.mxu1 %vm485_vm1, %v5353_v10 }
 0x3d5   : > { %4008 = vmatmul.msk.f32.gmra.mxu2 %vm485_vm1, %v5351_v0 }
 0x3d7   : > { %4025 = vmatmul.msk.f32.gmra.mxu3 %vm485_vm1, %v5355_v24 }
 0x3d8   : > { %v2440_v55 = vpop.f32.mrf.mxu2 }
 0x3d9   : > { %v2441_v40 = vadd.f32 %v2440_v55, %v2327_v14  ;;  %v2330_v50 = vpop.f32.mrf.mxu1 }
 0x3da   : > { %v2571_v15 = vpop.f32.mrf.mxu3 }
 0x3db   : > { %v5503_v52 = vadd.f32 %v2571_v15, %v2441_v40 }
 0x3dc   : > { %3992 = vmatmul.msk.f32.gmra.mxu1 %vm485_vm1, %v5367_v17 }
 0x3dd   : > { %4009 = vmatmul.msk.f32.gmra.mxu2 %vm485_vm1, %v5365_v44 }
 0x3df   : > { %4026 = vmatmul.msk.f32.gmra.mxu3 %vm485_vm1, %v5369_v4 }
 0x3e0   : > { %v2443_v10 = vpop.f32.mrf.mxu2 }
 0x3e1   : > { %v2444_v61 = vadd.f32 %v2443_v10, %v2330_v50  ;;  %v2333_v25 = vpop.f32.mrf.mxu1 }
 0x3e2   : > { %v2574_v29 = vpop.f32.mrf.mxu3 }
 0x3e3   : > { %v5513_v18 = vadd.f32 %v2574_v29, %v2444_v61 }
 0x3e4   : > { %3993 = vmatmul.msk.f32.gmra.mxu1 %vm485_vm1, %v3052_v42 }
 0x3e5   : > { %4010 = vmatmul.msk.f32.gmra.mxu2 %vm485_vm1, %v5511_v31 }
 0x3e7   : > { %4027 = vmatmul.msk.f32.gmra.mxu3 %vm485_vm1, %v5515_v46 }
 0x3e8   : > { %v2446_v17 = vpop.f32.mrf.mxu2 }
 0x3e9   : > { %v2447_v27 = vadd.f32 %v2446_v17, %v2333_v25  ;;  %v2336_v60 = vpop.f32.mrf.mxu1 }
 0x3ea   : > { %v2577_v62 = vpop.f32.mrf.mxu3 }
 0x3eb   : > { %v5524_v54 = vadd.f32 %v2577_v62, %v2447_v27 }
 0x3ec   : > { %3994 = vmatmul.msk.f32.gmra.mxu1 %vm485_vm1, %v3053_v63 }
 0x3ed   : > { %4011 = vmatmul.msk.f32.gmra.mxu2 %vm485_vm1, %v5522_v37 }
 0x3ef   : > { %4028 = vmatmul.msk.f32.gmra.mxu3 %vm485_vm1, %v5526_v7 }
 0x3f0   : > { %v2449_v42 = vpop.f32.mrf.mxu2 }
 0x3f1   : > { %v2450_v6 = vadd.f32 %v2449_v42, %v2336_v60  ;;  %v2682_v19 = vpop.f32.mrf.mxu1 }
 0x3f2   : > { %v2580_v5 = vpop.f32.mrf.mxu3  ;;  %v2730_v63 = vadd.f32 %v2682_v19, %v5387_v8 }
 0x3f3   : > { %v5533_v38 = vadd.f32 %v2580_v5, %v2450_v6 }
 0x3f4   : > { %4047 = vmatmul.msk.f32.vlgmr.msra.gmra.mxu1 %vm485_vm1, %v5217_v2 }
 0x3f5   : > { %4064 = vmatmul.msk.f32.vlgmr.msra.gmra.mxu2 %vm485_vm1, %v5221_v39 }
 0x3f8   : > { %v2829_v14 = vpop.f32.mrf.mxu2 }
 0x3f9   : > { %v5540_v36 = vadd.f32 %v2829_v14, %v2730_v63  ;;  %v2685_v13 = vpop.f32.mrf.mxu1 }
 0x3fa   : > { %v2731_v55 = vadd.f32 %v2685_v13, %v5397_v34  ;;  %v3201_v13 = vld [vmem:[#allocation2 + $0xd9] sm:$0xff] }
 0x3fc   : > { %4048 = vmatmul.msk.f32.gmra.mxu1 %vm485_vm1, %v5229_v12 }
 0x3fd   : > { %4065 = vmatmul.msk.f32.gmra.mxu2 %vm485_vm1, %v5233_v20 }
 0x400   : > { %v2832_v40 = vpop.f32.mrf.mxu2 }
 0x401   : > { %v5547_v50 = vadd.f32 %v2832_v40, %v2731_v55  ;;  %v2688_v2 = vpop.f32.mrf.mxu1 }
 0x402   : > { %v2732_v39 = vadd.f32 %v2688_v2, %v5407_v35 }
 0x404   : > { %4049 = vmatmul.msk.f32.gmra.mxu1 %vm485_vm1, %v5241_v43 }
 0x405   : > { %4066 = vmatmul.msk.f32.gmra.mxu2 %vm485_vm1, %v5245_v59 }
 0x408   : > { %v2835_v8 = vpop.f32.mrf.mxu2 }
 0x409   : > { %v5554_v15 = vadd.f32 %v2835_v8, %v2732_v39  ;;  %v2691_v12 = vpop.f32.mrf.mxu1  ;;  %v3349_v8 = vld [vmem:[#allocation2 + $0xe2] sm:$0xff] }
 0x40a   : > { %v2733_v20 = vadd.f32 %v2691_v12, %v5417_v28 }
 0x40c   : > { %4050 = vmatmul.msk.f32.gmra.mxu1 %vm485_vm1, %v5253_v58 }
 0x40d   : > { %4067 = vmatmul.msk.f32.gmra.mxu2 %vm485_vm1, %v5257_v1 }
 0x410   : > { %v2838_v34 = vpop.f32.mrf.mxu2 }
 0x411   : > { %v5561_v10 = vadd.f32 %v2838_v34, %v2733_v20  ;;  %v2694_v43 = vpop.f32.mrf.mxu1 }
 0x412   : > { %v2734_v59 = vadd.f32 %v2694_v43, %v5427_v57 }
 0x414   : > { %4051 = vmatmul.msk.f32.gmra.mxu1 %vm485_vm1, %v5265_v32 }
 0x415   : > { %4068 = vmatmul.msk.f32.gmra.mxu2 %vm485_vm1, %v5269_v49 }
 0x418   : > { %v2841_v35 = vpop.f32.mrf.mxu2 }
 0x419   : > { %v5568_v61 = vadd.f32 %v2841_v35, %v2734_v59  ;;  %v2697_v58 = vpop.f32.mrf.mxu1 }
 0x41a   : > { %v2735_v1 = vadd.f32 %v2697_v58, %v5437_v16 }
 0x41c   : > { %4052 = vmatmul.msk.f32.gmra.mxu1 %vm485_vm1, %v5277_v51 }
 0x41d   : > { %4069 = vmatmul.msk.f32.gmra.mxu2 %vm485_vm1, %v5281_v33 }
 0x420   : > { %v2844_v28 = vpop.f32.mrf.mxu2 }
 0x421   : > { %v5575_v25 = vadd.f32 %v2844_v28, %v2735_v1  ;;  %v2700_v32 = vpop.f32.mrf.mxu1 }
 0x422   : > { %v2736_v49 = vadd.f32 %v2700_v32, %v5447_v48 }
 0x424   : > { %4053 = vmatmul.msk.f32.gmra.mxu1 %vm485_vm1, %v5289_v45 }
 0x425   : > { %4070 = vmatmul.msk.f32.gmra.mxu2 %vm485_vm1, %v5293_v26 }
 0x428   : > { %v2847_v57 = vpop.f32.mrf.mxu2 }
 0x429   : > { %v5582_v29 = vadd.f32 %v2847_v57, %v2736_v49  ;;  %v2703_v51 = vpop.f32.mrf.mxu1 }
 0x42a   : > { %v2737_v33 = vadd.f32 %v2703_v51, %v5457_v47 }
 0x42c   : > { %4054 = vmatmul.msk.f32.gmra.mxu1 %vm485_vm1, %v5301_v53 }
 0x42d   : > { %4071 = vmatmul.msk.f32.gmra.mxu2 %vm485_vm1, %v5305_v30 }
 0x430   : > { %v2850_v16 = vpop.f32.mrf.mxu2 }
 0x431   : > { %v5589_v17 = vadd.f32 %v2850_v16, %v2737_v33  ;;  %v2706_v45 = vpop.f32.mrf.mxu1  ;;  %v3517_v16 = vld [vmem:[%s4279_s22] sm:$0xff] }
 0x432   : > { %v2738_v26 = vadd.f32 %v2706_v45, %v5467_v22 }
 0x434   : > { %4055 = vmatmul.msk.f32.gmra.mxu1 %vm485_vm1, %v5316_v11 }
 0x435   : > { %4072 = vmatmul.msk.f32.gmra.mxu2 %vm485_vm1, %v5320_v9 }
 0x438   : > { %v2853_v48 = vpop.f32.mrf.mxu2 }
 0x439   : > { %v5596_v27 = vadd.f32 %v2853_v48, %v2738_v26  ;;  %v2709_v53 = vpop.f32.mrf.mxu1 }
 0x43a   : > { %v2739_v30 = vadd.f32 %v2709_v53, %v5476_v41 }
 0x43c   : > { %4056 = vmatmul.msk.f32.gmra.mxu1 %vm485_vm1, %v5334_v3 }
 0x43d   : > { %4073 = vmatmul.msk.f32.gmra.mxu2 %vm485_vm1, %v5338_v56  ;;  %v2976_v56 = vpop.f32.mrf.mxu3 }
 0x43e   : > { %v3024_v34 = vadd.f32 %v2976_v56, %v5540_v36 }
 0x440   : > { %v2856_v47 = vpop.f32.mrf.mxu2 }
 0x441   : > { %v5603_v22 = vadd.f32 %v2856_v47, %v2739_v30  ;;  %v2712_v60 = vpop.f32.mrf.mxu1 }
 0x442   : > { %v2740_v11 = vadd.f32 %v2712_v60, %v5485_v21 }
 0x444   : > { %4057 = vmatmul.msk.f32.gmra.mxu1 %vm485_vm1, %v5351_v0 }
 0x445   : > { %4074 = vmatmul.msk.f32.gmra.mxu2 %vm485_vm1, %v5355_v24  ;;  %v3123_v24 = vpop.f32.mrf.mxu0 }
 0x446   : > { %v3171_v58 = vadd.f32 %v3123_v24, %v3024_v34 }
 0x448   : > { %v2859_v9 = vpop.f32.mrf.mxu2 }
 0x449   : > { %v5610_v41 = vadd.f32 %v2859_v9, %v2740_v11  ;;  %v2715_v62 = vpop.f32.mrf.mxu1 }
 0x44a   : > { %v2741_v3 = vadd.f32 %v2715_v62, %v5494_v23  ;;  %v3518_v62 = vld [vmem:[%s4279_s22 + $0x8] sm:$0xff] }
 0x44c   : > { %4058 = vmatmul.msk.f32.gmra.mxu1 %vm485_vm1, %v5365_v44  ;;  %v2979_v44 = vpop.f32.mrf.mxu3 }
 0x44d   : > { %4075 = vmatmul.msk.f32.gmra.mxu2 %vm485_vm1, %v5369_v4  ;;  %v3025_v49 = vadd.f32 %v2979_v44, %v5547_v50 }
 0x450   : > { %v2862_v21 = vpop.f32.mrf.mxu2 }
 0x451   : > { %v5617_v42 = vadd.f32 %v2862_v21, %v2741_v3  ;;  %v2718_v0 = vpop.f32.mrf.mxu1 }
 0x452   : > { %v2742_v6 = vadd.f32 %v2718_v0, %v5503_v52  ;;  %v3126_v52 = vpop.f32.mrf.mxu0 }
 0x453   : > { %v3172_v45 = vadd.f32 %v3126_v52, %v3025_v49  ;;  %v3519_v52 = vld [vmem:[%s4279_s22 + $0x10] sm:$0xff] }
 0x454   : > { %4059 = vmatmul.msk.f32.gmra.mxu1 %vm485_vm1, %v5511_v31  ;;  %v2982_v40 = vpop.f32.mrf.mxu3 }
 0x455   : > { %4076 = vmatmul.msk.f32.gmra.mxu2 %vm485_vm1, %v5515_v46  ;;  %v3348_v46 = vld [vmem:[#allocation2 + $0xda] sm:$0xff]  ;;  %v3026_v47 = vadd.f32 %v2982_v40, %v5554_v15 }
 0x458   : > { %v2865_v23 = vpop.f32.mrf.mxu2 }
 0x459   : > { %v5624_v5 = vadd.f32 %v2865_v23, %v2742_v6  ;;  %v2721_v19 = vpop.f32.mrf.mxu1 }
 0x45a   : > { %v2743_v4 = vadd.f32 %v2721_v19, %v5513_v18  ;;  %v3129_v18 = vpop.f32.mrf.mxu0 }
 0x45b   : > { %v3173_v3 = vadd.f32 %v3129_v18, %v3026_v47 }
 0x45c   : > { %4060 = vmatmul.msk.f32.gmra.mxu1 %vm485_vm1, %v5522_v37  ;;  %v2985_v20 = vpop.f32.mrf.mxu3 }
 0x45d   : > { %4077 = vmatmul.msk.f32.gmra.mxu2 %vm485_vm1, %v5526_v7  ;;  %v3202_v7 = vld [vmem:[#allocation2 + $0xe1] sm:$0xff]  ;;  %v3027_v23 = vadd.f32 %v2985_v20, %v5561_v10 }
 0x460   : > { %v2868_v63 = vpop.f32.mrf.mxu2 }
 0x461   : > { %v5631_v14 = vadd.f32 %v2868_v63, %v2743_v4  ;;  %v2724_v31 = vpop.f32.mrf.mxu1 }
 0x462   : > { %v2744_v55 = vadd.f32 %v2724_v31, %v5524_v54  ;;  %v3132_v59 = vpop.f32.mrf.mxu0 }
 0x463   : > { %v3174_v63 = vadd.f32 %v3132_v59, %v3027_v23 }
 0x464   : > { %4061 = vmatmul.msk.f32.gmra.mxu1 %vm485_vm1, %v3201_v13  ;;  %v2988_v28 = vpop.f32.mrf.mxu3 }
 0x465   : > { %4078 = vmatmul.msk.f32.gmra.mxu2 %vm485_vm1, %v3348_v46  ;;  %v3028_v18 = vadd.f32 %v2988_v28, %v5568_v61 }
 0x468   : > { %v2871_v2 = vpop.f32.mrf.mxu2 }
 0x469   : > { %v5636_v37 = vadd.f32 %v2871_v2, %v2744_v55  ;;  %v2727_v39 = vpop.f32.mrf.mxu1 }
 0x46a   : > { %v2745_v12 = vadd.f32 %v2727_v39, %v5533_v38  ;;  %v5647_v38 = vld [vmem:[%s5749_s6] ss:$0 sm:$0xff]  ;;  %v3135_v33 = vpop.f32.mrf.mxu0 }
 0x46c   : > { %4062 = vmatmul.msk.f32.gmra.mxu1 %vm485_vm1, %v3202_v7  ;;  %v2991_v11 = vpop.f32.mrf.mxu3  ;;  %v3520_v7 = vld [vmem:[%s4279_s22 + $0x18] sm:$0xff] }
 0x46d   : > { %4079 = vmatmul.msk.f32.gmra.mxu2 %vm485_vm1, %v3349_v8  ;;  %v3175_v8 = vadd.f32 %v3135_v33, %v3028_v18 }
 0x470   : > { %v2874_v54 = vpop.f32.mrf.mxu2 }
 0x471   : > { %v5642_v43 = vadd.f32 %v2874_v54, %v2745_v12  ;;  %v3270_v35 = vpop.f32.mrf.mxu1 }
 0x472   : > { %v3318_v1 = vadd.f32 %v3270_v35, %v3171_v58  ;;  %v3138_v21 = vpop.f32.mrf.mxu0  ;;  %v3029_v35 = vadd.f32 %v2991_v11, %v5575_v25 }
 0x474   : > { %v2994_v4 = vpop.f32.mrf.mxu3  ;;  %v3176_v49 = vadd.f32 %v3138_v21, %v3029_v35 }
 0x478   : > { %v3417_v32 = vpop.f32.mrf.mxu2 }
 0x479   : > { %v3465_v57 = vadd.f32 %v3417_v32, %v3318_v1  ;;  %v3273_v51 = vpop.f32.mrf.mxu1  ;;  %v3521_v32 = vld [vmem:[%s4279_s22 + $0x20] sm:$0xff] }
 0x47a   : > { %v3319_v53 = vadd.f32 %v3273_v51, %v3172_v45  ;;  %v3141_v55 = vpop.f32.mrf.mxu0  ;;  %v3030_v45 = vadd.f32 %v2994_v4, %v5582_v29 }
 0x47b   : > { %v3485_v36 = vadd.f32 %v5647_v38, %v3465_v57 }
 0x47c   : > { %v2997_v20 = vpop.f32.mrf.mxu3  ;;  %v3177_v47 = vadd.f32 %v3141_v55, %v3030_v45 }
 0x47d   : > { %v3501_v26 = vmul.f32 0.1, %v3485_v36 }
 0x47f   : > { %v3533_v48 = vadd.f32 %v3517_v16, %v3501_v26 }
 0x480   : > { %v3420_v30 = vpop.f32.mrf.mxu2 }
 0x481   : > { %3549 = vst.msk [vmem:[%s4266_s17] sm:$0xff] %vm485_vm1, %v3533_v48  ;;  %v3466_v60 = vadd.f32 %v3420_v30, %v3319_v53  ;;  %v3276_v50 = vpop.f32.mrf.mxu1  ;;  %v3522_v30 = vld [vmem:[%s4279_s22 + $0x28] sm:$0xff] }
 0x482   : > { %v3320_v6 = vadd.f32 %v3276_v50, %v3173_v3  ;;  %v3144_v58 = vpop.f32.mrf.mxu0 }
 0x483   : > { %v3486_v9 = vadd.f32 %v5647_v38, %v3466_v60 }
 0x484   : > { %v3000_v33 = vpop.f32.mrf.mxu3 }
 0x485   : > { %v3502_v56 = vmul.f32 0.1, %v3486_v9  ;;  %v3032_v4 = vadd.f32 %v3000_v33, %v5596_v27 }
 0x487   : > { %v3534_v0 = vadd.f32 %v3518_v62, %v3502_v56  ;;  %v3031_v62 = vadd.f32 %v2997_v20, %v5589_v17 }
 0x488   : > { %v3423_v24 = vpop.f32.mrf.mxu2 }
 0x489   : > { %3550 = vst.msk [vmem:[%s4266_s17 + $0x8] sm:$0xff] %vm485_vm1, %v3534_v0  ;;  %v3467_v15 = vadd.f32 %v3423_v24, %v3320_v6  ;;  %v3279_v44 = vpop.f32.mrf.mxu1  ;;  %v3523_v0 = vld [vmem:[%s4279_s22 + $0x30] sm:$0xff]  ;;  %v3178_v6 = vadd.f32 %v3144_v58, %v3031_v62 }
 0x48a   : > { %v3321_v46 = vadd.f32 %v3279_v44, %v3174_v63  ;;  %v3147_v53 = vpop.f32.mrf.mxu0 }
 0x48b   : > { %v3487_v19 = vadd.f32 %v5647_v38, %v3467_v15 }
 0x48c   : > { %v3003_v3 = vpop.f32.mrf.mxu3 }
 0x48d   : > { %v3503_v31 = vmul.f32 0.1, %v3487_v19 }
 0x48f   : > { %v3535_v13 = vadd.f32 %v3519_v52, %v3503_v31 }
 0x490   : > { %v3426_v40 = vpop.f32.mrf.mxu2 }
 0x491   : > { %3551 = vst.msk [vmem:[%s4266_s17 + $0x10] sm:$0xff] %vm485_vm1, %v3535_v13  ;;  %v3468_v10 = vadd.f32 %v3426_v40, %v3321_v46  ;;  %v3282_v2 = vpop.f32.mrf.mxu1  ;;  %v3524_v13 = vld [vmem:[%s4279_s22 + $0x38] sm:$0xff]  ;;  %v3179_v46 = vadd.f32 %v3147_v53, %v3032_v4 }
 0x492   : > { %v3322_v34 = vadd.f32 %v3282_v2, %v3175_v8  ;;  %v3150_v23 = vpop.f32.mrf.mxu0 }
 0x493   : > { %v3488_v39 = vadd.f32 %v5647_v38, %v3468_v10 }
 0x494   : > { %v3006_v31 = vpop.f32.mrf.mxu3 }
 0x495   : > { %v3504_v12 = vmul.f32 0.1, %v3488_v39  ;;  %v3033_v39 = vadd.f32 %v3003_v3, %v5603_v22  ;;  %v3034_v58 = vadd.f32 %v3006_v31, %v5610_v41 }
 0x497   : > { %v3536_v54 = vadd.f32 %v3520_v7, %v3504_v12  ;;  %v3525_v12 = vld [vmem:[%s4279_s22 + $0x40] sm:$0xff]  ;;  %v3180_v20 = vadd.f32 %v3150_v23, %v3033_v39 }
 0x498   : > { %v3429_v59 = vpop.f32.mrf.mxu2 }
 0x499   : > { %3552 = vst.msk [vmem:[%s4266_s17 + $0x18] sm:$0xff] %vm485_vm1, %v3536_v54  ;;  %v3469_v61 = vadd.f32 %v3429_v59, %v3322_v34  ;;  %v3285_v1 = vpop.f32.mrf.mxu1 }
 0x49a   : > { %v3323_v36 = vadd.f32 %v3285_v1, %v3176_v49  ;;  %v3153_v10 = vpop.f32.mrf.mxu0  ;;  %v3526_v49 = vld [vmem:[%s4279_s22 + $0x48] sm:$0xff] }
 0x49b   : > { %v3489_v28 = vadd.f32 %v5647_v38, %v3469_v61 }
 0x49c   : > { %v3009_v34 = vpop.f32.mrf.mxu3 }
 0x49d   : > { %v3505_v57 = vmul.f32 0.1, %v3489_v28 }
 0x49f   : > { %v3537_v51 = vadd.f32 %v3521_v32, %v3505_v57  ;;  %v3181_v57 = vadd.f32 %v3153_v10, %v3034_v58  ;;  %v3531_v58 = vld [vmem:[%s4279_s22 + $0x70] sm:$0xff] }
 0x4a0   : > { %v3432_v16 = vpop.f32.mrf.mxu2 }
 0x4a1   : > { %3553 = vst.msk [vmem:[%s4266_s17 + $0x20] sm:$0xff] %vm485_vm1, %v3537_v51  ;;  %v3470_v25 = vadd.f32 %v3432_v16, %v3323_v36  ;;  %v3288_v26 = vpop.f32.mrf.mxu1 }
 0x4a2   : > { %v3324_v50 = vadd.f32 %v3288_v26, %v3177_v47  ;;  %v3156_v1 = vpop.f32.mrf.mxu0 }
 0x4a3   : > { %v3490_v48 = vadd.f32 %v5647_v38, %v3470_v25  ;;  %v3035_v25 = vadd.f32 %v3009_v34, %v5617_v42 }
 0x4a4   : > { %v3012_v16 = vpop.f32.mrf.mxu3 }
 0x4a5   : > { %v3506_v60 = vmul.f32 0.1, %v3490_v48  ;;  %v3182_v47 = vadd.f32 %v3156_v1, %v3035_v25  ;;  %v3036_v62 = vadd.f32 %v3012_v16, %v5624_v5 }
 0x4a7   : > { %v3538_v11 = vadd.f32 %v3522_v30, %v3506_v60  ;;  %v3527_v30 = vld [vmem:[%s4279_s22 + $0x50] sm:$0xff] }
 0x4a8   : > { %v3435_v9 = vpop.f32.mrf.mxu2 }
 0x4a9   : > { %3554 = vst.msk [vmem:[%s4266_s17 + $0x28] sm:$0xff] %vm485_vm1, %v3538_v11  ;;  %v3471_v29 = vadd.f32 %v3435_v9, %v3324_v50  ;;  %v3291_v56 = vpop.f32.mrf.mxu1 }
 0x4aa   : > { %v3325_v44 = vadd.f32 %v3291_v56, %v3178_v6  ;;  %v3159_v53 = vpop.f32.mrf.mxu0 }
 0x4ab   : > { %v3491_v21 = vadd.f32 %v5647_v38, %v3471_v29 }
 0x4ac   : > { %v3015_v29 = vpop.f32.mrf.mxu3 }
 0x4ad   : > { %v3507_v24 = vmul.f32 0.1, %v3491_v21  ;;  %v3528_v21 = vld [vmem:[%s4279_s22 + $0x58] sm:$0xff] }
 0x4af   : > { %v3539_v15 = vadd.f32 %v3523_v0, %v3507_v24  ;;  %v3183_v0 = vadd.f32 %v3159_v53, %v3036_v62 }
 0x4b0   : > { %v3438_v19 = vpop.f32.mrf.mxu2 }
 0x4b1   : > { %3555 = vst.msk [vmem:[%s4266_s17 + $0x30] sm:$0xff] %vm485_vm1, %v3539_v15  ;;  %v3472_v17 = vadd.f32 %v3438_v19, %v3325_v44  ;;  %v3294_v52 = vpop.f32.mrf.mxu1  ;;  %v3037_v19 = vadd.f32 %v3015_v29, %v5631_v14 }
 0x4b2   : > { %v3326_v18 = vadd.f32 %v3294_v52, %v3179_v46  ;;  %v3162_v24 = vpop.f32.mrf.mxu0 }
 0x4b3   : > { %v3492_v63 = vadd.f32 %v5647_v38, %v3472_v17  ;;  %v3184_v31 = vadd.f32 %v3162_v24, %v3037_v19 }
 0x4b4   : > { %v3018_v52 = vpop.f32.mrf.mxu3 }
 0x4b5   : > { %v3508_v55 = vmul.f32 0.1, %v3492_v63  ;;  %v3529_v63 = vld [vmem:[%s4279_s22 + $0x60] sm:$0xff]  ;;  %v3038_v10 = vadd.f32 %v3018_v52, %v5636_v37 }
 0x4b7   : > { %v3540_v40 = vadd.f32 %v3524_v13, %v3508_v55 }
 0x4b8   : > { %v3441_v2 = vpop.f32.mrf.mxu2 }
 0x4b9   : > { %3556 = vst.msk [vmem:[%s4266_s17 + $0x38] sm:$0xff] %vm485_vm1, %v3540_v40  ;;  %v3473_v27 = vadd.f32 %v3441_v2, %v3326_v18  ;;  %v3297_v7 = vpop.f32.mrf.mxu1 }
 0x4ba   : > { %v3327_v35 = vadd.f32 %v3297_v7, %v3180_v20  ;;  %v3165_v40 = vpop.f32.mrf.mxu0 }
 0x4bb   : > { %v3493_v8 = vadd.f32 %v5647_v38, %v3473_v27  ;;  %v3530_v27 = vld [vmem:[%s4279_s22 + $0x68] sm:$0xff]  ;;  %v3185_v7 = vadd.f32 %v3165_v40, %v3038_v10 }
 0x4bd   : > { %v3509_v54 = vmul.f32 0.1, %v3493_v8 }
 0x4bf   : > { %v3541_v59 = vadd.f32 %v3525_v12, %v3509_v54  ;;  %v3021_v12 = vpop.f32.mrf.mxu3 }
 0x4c0   : > { %v3444_v61 = vpop.f32.mrf.mxu2 }
 0x4c1   : > { %3557 = vst.msk [vmem:[%s4266_s17 + $0x40] sm:$0xff] %vm485_vm1, %v3541_v59  ;;  %v3474_v22 = vadd.f32 %v3444_v61, %v3327_v35  ;;  %v3300_v28 = vpop.f32.mrf.mxu1  ;;  %v3039_v59 = vadd.f32 %v3021_v12, %v5642_v43  ;;  %v3532_v43 = vld [vmem:[%s4279_s22 + $0x78] sm:$0xff] }
 0x4c2   : > { %v3328_v33 = vadd.f32 %v3300_v28, %v3181_v57  ;;  %v3168_v35 = vpop.f32.mrf.mxu0 }
 0x4c3   : > { %v3494_v32 = vadd.f32 %v5647_v38, %v3474_v22  ;;  %v3186_v1 = vadd.f32 %v3168_v35, %v3039_v59 }
 0x4c5   : > { %v3510_v51 = vmul.f32 0.1, %v3494_v32 }
 0x4c7   : > { %v3542_v36 = vadd.f32 %v3526_v49, %v3510_v51 }
 0x4c8   : > { %v3447_v45 = vpop.f32.mrf.mxu2 }
 0x4c9   : > { %3558 = vst.msk [vmem:[%s4266_s17 + $0x48] sm:$0xff] %vm485_vm1, %v3542_v36  ;;  %v3475_v41 = vadd.f32 %v3447_v45, %v3328_v33  ;;  %v3303_v26 = vpop.f32.mrf.mxu1 }
 0x4ca   : > { %v3329_v50 = vadd.f32 %v3303_v26, %v3182_v47 }
 0x4cb   : > { %v3495_v48 = vadd.f32 %v5647_v38, %v3475_v41 }
 0x4cd   : > { %v3511_v60 = vmul.f32 0.1, %v3495_v48 }
 0x4cf   : > { %v3543_v11 = vadd.f32 %v3527_v30, %v3511_v60 }
 0x4d0   : > { %v3450_v9 = vpop.f32.mrf.mxu2 }
 0x4d1   : > { %3559 = vst.msk [vmem:[%s4266_s17 + $0x50] sm:$0xff] %vm485_vm1, %v3543_v11  ;;  %v3476_v42 = vadd.f32 %v3450_v9, %v3329_v50  ;;  %v3306_v3 = vpop.f32.mrf.mxu1 }
 0x4d2   : > { %v3330_v15 = vadd.f32 %v3306_v3, %v3183_v0 }
 0x4d3   : > { %v3496_v56 = vadd.f32 %v5647_v38, %v3476_v42 }
 0x4d5   : > { %v3512_v6 = vmul.f32 0.1, %v3496_v56 }
 0x4d7   : > { %v3544_v23 = vadd.f32 %v3528_v21, %v3512_v6 }
 0x4d8   : > { %v3453_v44 = vpop.f32.mrf.mxu2 }
 0x4d9   : > { %3560 = vst.msk [vmem:[%s4266_s17 + $0x58] sm:$0xff] %vm485_vm1, %v3544_v23  ;;  %v3477_v5 = vadd.f32 %v3453_v44, %v3330_v15  ;;  %v3309_v4 = vpop.f32.mrf.mxu1 }
 0x4da   : > { %v3331_v55 = vadd.f32 %v3309_v4, %v3184_v31 }
 0x4db   : > { %v3497_v17 = vadd.f32 %v5647_v38, %v3477_v5 }
 0x4dd   : > { %v3513_v13 = vmul.f32 0.1, %v3497_v17 }
 0x4df   : > { %v3545_v46 = vadd.f32 %v3529_v63, %v3513_v13 }
 0x4e0   : > { %v3456_v18 = vpop.f32.mrf.mxu2 }
 0x4e1   : > { %3561 = vst.msk [vmem:[%s4266_s17 + $0x60] sm:$0xff] %vm485_vm1, %v3545_v46  ;;  %v3478_v14 = vadd.f32 %v3456_v18, %v3331_v55  ;;  %v3312_v2 = vpop.f32.mrf.mxu1 }
 0x4e2   : > { %v3332_v54 = vadd.f32 %v3312_v2, %v3185_v7 }
 0x4e3   : > { %v3498_v39 = vadd.f32 %v5647_v38, %v3478_v14 }
 0x4e5   : > { %v3514_v8 = vmul.f32 0.1, %v3498_v39 }
 0x4e7   : > { %v3546_v20 = vadd.f32 %v3530_v27, %v3514_v8 }
 0x4e8   : > { %v3459_v34 = vpop.f32.mrf.mxu2 }
 0x4e9   : > { %3562 = vst.msk [vmem:[%s4266_s17 + $0x68] sm:$0xff] %vm485_vm1, %v3546_v20  ;;  %v3479_v37 = vadd.f32 %v3459_v34, %v3332_v54  ;;  %v3315_v22 = vpop.f32.mrf.mxu1 }
 0x4ea   : > { %v3333_v49 = vadd.f32 %v3315_v22, %v3186_v1 }
 0x4eb   : > { %v3499_v61 = vadd.f32 %v5647_v38, %v3479_v37 }
 0x4ed   : > { %v3515_v28 = vmul.f32 0.1, %v3499_v61 }
 0x4ef   : > { %v3547_v32 = vadd.f32 %v3531_v58, %v3515_v28 }
 0x4f0   : > { %v3462_v57 = vpop.f32.mrf.mxu2 }
 0x4f1   : > { %3563 = vst.msk [vmem:[%s4266_s17 + $0x70] sm:$0xff] %vm485_vm1, %v3547_v32  ;;  %v3480_v51 = vadd.f32 %v3462_v57, %v3333_v49 }
 0x4f3   : > { %v3500_v36 = vadd.f32 %v5647_v38, %v3480_v51 }
 0x4f5   : > { %v3516_v33 = vmul.f32 0.1, %v3500_v36 }
 0x4f7   : > { %v3548_v16 = vadd.f32 %v3532_v43, %v3516_v33 }
 0x4f9   : > { %3564 = vst.msk [vmem:[%s4266_s17 + $0x78] sm:$0xff] %vm485_vm1, %v3548_v16 }
 0x4fa PF: > { %s17_s28 = sadd.s32 1, %s4170_s28   ;;  %s5823_s24 = smov %s4162_s26 }
 0x4fb   : > { %p14_p1 = scmp.ge.s32.totalorder %s17_s28, 6   ;;  %s5824_s25 = smov %s4166_s27 }
 0x4fc   : > { %s5825_s26 = smov %s5828_s29  ;;  %s5826_s27 = smov %s5832_s30 }
 0x4fd   :  { %16 = sbr.rel (!%p14_p1) target bundleno = 3 (0x3), region = 130 }

</bundles_post_ra>
